<compile_context>
chip_gen: v7x
topology: tpu7x:2x2x1
jax: 0.10.0
libtpu: 0.0.40
codegen_flags: <defaults>
</compile_context>

<pallas_src>
import functools

import jax
import jax.numpy as jnp
import numpy as np
from jax.experimental import pallas as pl
from jax.experimental.pallas import tpu as pltpu

# Matmul operand dtype. float32 tracks the PyTorch reference closely; on
# v6e/v7x set to jnp.bfloat16 for higher MXU throughput (accumulation is f32).
MXU_DTYPE = jnp.float32


def _round_up(x, m):
    return (x + m - 1) // m * m


def _make_fused_decoder_kernel(layer_dims, *, k, H, W):
    """Fused decoder kernel.

    layer_dims: tuple of (cin_padded, cout) per conv layer, in forward order.
    Kernel refs: [x, col_mask, (w_i, b_i) * n_conv, out, act_scratch].
    """
    pad = k // 2
    HW = H * W
    base = pad * W + pad          # flat index of pixel (0, 0) inside the halo'd buffer
    n_conv = len(layer_dims)

    def kernel(*refs):
        x_ref = refs[0]                         # (C0, HW)    one batch element
        mask_ref = refs[1]                      # (k, 1, HW)  column-validity multipliers
        out_ref = refs[2 + 2 * n_conv]          # (Cout_last, HW)
        act_ref = refs[3 + 2 * n_conv]          # VMEM scratch (C_max, HW + 2*base), f32

        # Zero the scratch once per batch element: creates the zero halo
        # (vertical padding rows + horizontal margins) around the image.
        act_ref[...] = jnp.zeros_like(act_ref)
        c0 = x_ref.shape[0]
        act_ref[pl.ds(0, c0), pl.ds(base, HW)] = x_ref[...]

        for li, (cin, cout) in enumerate(layer_dims):
            w_ref = refs[2 + 2 * li]            # (k*k, cout, cin)
            b_ref = refs[3 + 2 * li]            # (cout, 1)
            is_last = li == n_conv - 1

            acc = jnp.zeros((cout, HW), jnp.float32)
            for dh in range(k):
                for dw in range(k):
                    dy, dx = dh - pad, dw - pad
                    start = base + dy * W + dx          # static per tap
                    xs = act_ref[pl.ds(0, cin), pl.ds(start, HW)]
                    if dx != 0:
                        # Zero lanes whose horizontal tap falls outside the row
                        # (the flat layout would otherwise wrap between rows).
                        xs = xs * mask_ref[dw]
                    acc = acc + jnp.dot(
                        w_ref[dh * k + dw].astype(MXU_DTYPE),
                        xs.astype(MXU_DTYPE),
                        preferred_element_type=jnp.float32)

            y = acc + b_ref[...]                        # (cout, 1) lane-broadcast bias
            if not is_last:
                y = jnp.where(y > 0, y, 0.01 * y)       # LeakyReLU(negative_slope=0.01)
                act_ref[pl.ds(0, cout), pl.ds(base, HW)] = y
            else:
                out_ref[...] = y.astype(out_ref.dtype)

    return kernel


def basic_decoder3_forward(x, params, *, kernel_size):
    """x: (N, 3, H, W) float32 -> (N, data_depth, H, W). One fused pallas_call."""
    k = kernel_size
    pad = k // 2
    N, c0, H, W = x.shape
    HW = H * W
    base = pad * W + pad
    L = HW + 2 * base

    # Precomputed column-validity multipliers for horizontal taps (dx = dw - pad).
    cols = np.arange(HW) % W
    cmask = np.ones((k, 1, HW), np.float32)
    for dw in range(k):
        dx = dw - pad
        cmask[dw, 0, :] = ((cols + dx >= 0) & (cols + dx < W)).astype(np.float32)
    cmask = jnp.asarray(cmask)

    # Prepack: weights -> (k*k, cout, cin_padded_to_8), biases -> (cout, 1).
    layer_dims = []
    operands = [x.reshape(N, c0, HW), cmask]
    for (w, b) in params:
        cout, cin = int(w.shape[0]), int(w.shape[1])
        cin_p = _round_up(cin, 8)
        wp = jnp.pad(w, ((0, 0), (0, cin_p - cin), (0, 0), (0, 0)))
        wp = jnp.transpose(wp, (2, 3, 0, 1)).reshape(k * k, cout, cin_p)
        operands += [wp, b.reshape(cout, 1)]
        layer_dims.append((cin_p, cout))
    layer_dims = tuple(layer_dims)
    cout_last = layer_dims[-1][1]
    c_max = _round_up(max([c0] + [d for cc in layer_dims for d in cc]), 8)

    kernel = _make_fused_decoder_kernel(layer_dims, k=k, H=H, W=W)

    in_specs = [
        pl.BlockSpec((None, c0, HW), lambda n: (n, 0, 0)),      # one image per grid step
        pl.BlockSpec((k, 1, HW), lambda n: (0, 0, 0)),          # column masks (grid-invariant)
    ]
    for (cin_p, cout) in layer_dims:
        in_specs.append(pl.BlockSpec((k * k, cout, cin_p), lambda n: (0, 0, 0)))
        in_specs.append(pl.BlockSpec((cout, 1), lambda n: (0, 0)))

    flops = 2 * N * HW * k * k * sum(ci * co for ci, co in layer_dims)
    bytes_accessed = 4 * (sum(int(np.prod(a.shape)) for a in operands)
                          + N * cout_last * HW)

    out = pl.pallas_call(
        kernel,
        grid=(N,),
        in_specs=in_specs,
        out_specs=pl.BlockSpec((None, cout_last, HW), lambda n: (n, 0, 0)),
        out_shape=jax.ShapeDtypeStruct((N, cout_last, HW), jnp.float32),
        scratch_shapes=[pltpu.VMEM((c_max, L), jnp.float32)],
        compiler_params=pltpu.CompilerParams(dimension_semantics=("parallel",)),
        cost_estimate=pl.CostEstimate(flops=flops, transcendentals=0,
                                      bytes_accessed=bytes_accessed),
    )(*operands)
    return out.reshape(N, cout_last, H, W)


def init_basic_decoder3_params(key, *, data_depth, hidden_size, num_layers,
                               kernel_size):
    """Conv stack: (3->hidden) + (hidden->hidden)*(num_layers-1) + (hidden->data_depth)."""
    k = kernel_size
    pairs = ([(3, hidden_size)]
             + [(hidden_size, hidden_size)] * (num_layers - 1)
             + [(hidden_size, data_depth)])
    params = []
    for cin, cout in pairs:
        key, kw, kb = jax.random.split(key, 3)
        bound = 1.0 / float(np.sqrt(cin * k * k))
        w = jax.random.uniform(kw, (cout, cin, k, k), jnp.float32, -bound, bound)
        b = jax.random.uniform(kb, (cout,), jnp.float32, -bound, bound)
        params.append((w, b))
    return params


def reference_forward(x, params, *, kernel_size):
    """Pure-XLA reference for BasicDecoder3.forward (conv -> LeakyReLU ..., final conv)."""
    pad = kernel_size // 2
    y = x
    for i, (w, b) in enumerate(params):
        y = jax.lax.conv_general_dilated(
            y, w, window_strides=(1, 1), padding=[(pad, pad), (pad, pad)],
            dimension_numbers=("NCHW", "OIHW", "NCHW"),
            precision=jax.lax.Precision.HIGHEST)
        y = y + b.reshape(1, -1, 1, 1)
        if i != len(params) - 1:
            y = jnp.where(y > 0, y, 0.01 * y)
    return y


if __name__ == "__main__":
    # Module hyper-parameters (small, consistent with the PyTorch module).
    data_depth, hidden_size, num_layers, kernel_size = 4, 32, 3, 3
    # BasicDecoder3 stores `last_norm` but its Sequential has no norm layer,
    # so it does not affect the forward pass.

    key = jax.random.PRNGKey(0)
    key, kx = jax.random.split(key)
    x = jax.random.normal(kx, (2, 3, 16, 16), jnp.float32)   # first conv takes 3 channels

    params = init_basic_decoder3_params(
        key, data_depth=data_depth, hidden_size=hidden_size,
        num_layers=num_layers, kernel_size=kernel_size)

    fwd = jax.jit(functools.partial(basic_decoder3_forward, kernel_size=kernel_size))
    out = jax.block_until_ready(fwd(x, params))
    assert out.shape == (2, data_depth, 16, 16), out.shape

    ref = jax.block_until_ready(reference_forward(x, params, kernel_size=kernel_size))
    max_err = float(jnp.max(jnp.abs(out - ref)))
    assert max_err < 2e-2, f"mismatch vs XLA conv reference: max_abs_err={max_err}"
    print("KERNEL_OK")
</pallas_src>

<mosaic_0001>
module attributes {stable_mosaic.version = 11 : i64} {
  func.func @kernel(%arg0: i32, %arg1: memref<1x3x256xf32, #tpu.memory_space<vmem>>, %arg2: memref<3x1x256xf32, #tpu.memory_space<vmem>>, %arg3: memref<9x32x8xf32, #tpu.memory_space<vmem>>, %arg4: memref<32x1xf32, #tpu.memory_space<vmem>>, %arg5: memref<9x32x32xf32, #tpu.memory_space<vmem>>, %arg6: memref<32x1xf32, #tpu.memory_space<vmem>>, %arg7: memref<9x32x32xf32, #tpu.memory_space<vmem>>, %arg8: memref<32x1xf32, #tpu.memory_space<vmem>>, %arg9: memref<9x4x32xf32, #tpu.memory_space<vmem>>, %arg10: memref<4x1xf32, #tpu.memory_space<vmem>>, %arg11: memref<1x4x256xf32, #tpu.memory_space<vmem>>, %arg12: memref<32x290xf32, #tpu.memory_space<vmem>>) attributes {dimension_semantics = [#tpu.dimension_semantics<parallel>], iteration_bounds = array<i64: 2>, scalar_prefetch = 0 : i64, scratch_operands = 1 : i64, tpu.core_type = #tpu.core_type<tc>, window_params = [{transform_indices = @transform_0, window_bounds = array<i64: 1, 3, 256>}, {pipeline_mode = #tpu.pipeline_mode<synchronous>, transform_indices = @transform_1, window_bounds = array<i64: 3, 1, 256>}, {pipeline_mode = #tpu.pipeline_mode<synchronous>, transform_indices = @transform_2, window_bounds = array<i64: 9, 32, 8>}, {pipeline_mode = #tpu.pipeline_mode<synchronous>, transform_indices = @transform_3, window_bounds = array<i64: 32, 1>}, {pipeline_mode = #tpu.pipeline_mode<synchronous>, transform_indices = @transform_4, window_bounds = array<i64: 9, 32, 32>}, {pipeline_mode = #tpu.pipeline_mode<synchronous>, transform_indices = @transform_5, window_bounds = array<i64: 32, 1>}, {pipeline_mode = #tpu.pipeline_mode<synchronous>, transform_indices = @transform_6, window_bounds = array<i64: 9, 32, 32>}, {pipeline_mode = #tpu.pipeline_mode<synchronous>, transform_indices = @transform_7, window_bounds = array<i64: 32, 1>}, {pipeline_mode = #tpu.pipeline_mode<synchronous>, transform_indices = @transform_8, window_bounds = array<i64: 9, 4, 32>}, {pipeline_mode = #tpu.pipeline_mode<synchronous>, transform_indices = @transform_9, window_bounds = array<i64: 4, 1>}, {transform_indices = @transform_10, window_bounds = array<i64: 1, 4, 256>}]} {
    %cst = arith.constant 0.000000e+00 : f32
    %0 = vector.broadcast %cst : f32 to vector<32x290xf32>
    %c0 = arith.constant 0 : index
    %c0_0 = arith.constant 0 : index
    %1 = vector.load %arg12[%c0, %c0_0] : memref<32x290xf32, #tpu.memory_space<vmem>>, vector<32x290xf32>
    tpu.vector_store %arg12[%c0, %c0_0], %0 {strides = array<i32>} : memref<32x290xf32, #tpu.memory_space<vmem>>, vector<32x290xf32>,
    %c0_1 = arith.constant 0 : index
    %c0_2 = arith.constant 0 : index
    %c0_3 = arith.constant 0 : index
    %2 = vector.load %arg1[%c0_1, %c0_2, %c0_3] : memref<1x3x256xf32, #tpu.memory_space<vmem>>, vector<1x3x256xf32>
    %3 = vector.shape_cast %2 : vector<1x3x256xf32> to vector<3x256xf32>
    %c0_4 = arith.constant 0 : index
    %c17 = arith.constant 17 : index
    %4 = vector.load %arg12[%c0_4, %c17] : memref<32x290xf32, #tpu.memory_space<vmem>>, vector<3x256xf32>
    tpu.vector_store %arg12[%c0_4, %c17], %3 {strides = array<i32>} : memref<32x290xf32, #tpu.memory_space<vmem>>, vector<3x256xf32>,
    %cst_5 = arith.constant 0.000000e+00 : f32
    %5 = vector.broadcast %cst_5 : f32 to vector<32x256xf32>
    %c0_6 = arith.constant 0 : index
    %c0_7 = arith.constant 0 : index
    %6 = vector.load %arg12[%c0_6, %c0_7] : memref<32x290xf32, #tpu.memory_space<vmem>>, vector<8x256xf32>
    %c0_8 = arith.constant 0 : index
    %c0_9 = arith.constant 0 : index
    %c0_10 = arith.constant 0 : index
    %7 = vector.load %arg2[%c0_8, %c0_9, %c0_10] : memref<3x1x256xf32, #tpu.memory_space<vmem>>, vector<1x1x256xf32>
    %8 = vector.shape_cast %7 : vector<1x1x256xf32> to vector<1x256xf32>
    %9 = vector.broadcast %8 : vector<1x256xf32> to vector<8x256xf32>
    %10 = arith.mulf %6, %9 : vector<8x256xf32>
    %c0_11 = arith.constant 0 : index
    %c0_12 = arith.constant 0 : index
    %c0_13 = arith.constant 0 : index
    %11 = vector.load %arg3[%c0_11, %c0_12, %c0_13] : memref<9x32x8xf32, #tpu.memory_space<vmem>>, vector<1x32x8xf32>
    %12 = vector.shape_cast %11 : vector<1x32x8xf32> to vector<32x8xf32>
    %cst_14 = arith.constant dense<0.000000e+00> : vector<32x256xf32>
    %13 = tpu.matmul %12, %10, %cst_14 {dimension_numbers = #tpu.dot_dimension_numbers<[1], [0], [0], [1], [0, 0, 1, 1], [], []>} : vector<32x8xf32>, vector<8x256xf32>, vector<32x256xf32> -> vector<32x256xf32>
    %14 = arith.addf %5, %13 : vector<32x256xf32>
    %c0_15 = arith.constant 0 : index
    %c1 = arith.constant 1 : index
    %15 = vector.load %arg12[%c0_15, %c1] : memref<32x290xf32, #tpu.memory_space<vmem>>, vector<8x256xf32>
    %c1_16 = arith.constant 1 : index
    %c0_17 = arith.constant 0 : index
    %c0_18 = arith.constant 0 : index
    %16 = vector.load %arg3[%c1_16, %c0_17, %c0_18] : memref<9x32x8xf32, #tpu.memory_space<vmem>>, vector<1x32x8xf32>
    %17 = vector.shape_cast %16 : vector<1x32x8xf32> to vector<32x8xf32>
    %cst_19 = arith.constant dense<0.000000e+00> : vector<32x256xf32>
    %18 = tpu.matmul %17, %15, %cst_19 {dimension_numbers = #tpu.dot_dimension_numbers<[1], [0], [0], [1], [0, 0, 1, 1], [], []>} : vector<32x8xf32>, vector<8x256xf32>, vector<32x256xf32> -> vector<32x256xf32>
    %19 = arith.addf %14, %18 : vector<32x256xf32>
    %c0_20 = arith.constant 0 : index
    %c2 = arith.constant 2 : index
    %20 = vector.load %arg12[%c0_20, %c2] : memref<32x290xf32, #tpu.memory_space<vmem>>, vector<8x256xf32>
    %c2_21 = arith.constant 2 : index
    %c0_22 = arith.constant 0 : index
    %c0_23 = arith.constant 0 : index
    %21 = vector.load %arg2[%c2_21, %c0_22, %c0_23] : memref<3x1x256xf32, #tpu.memory_space<vmem>>, vector<1x1x256xf32>
    %22 = vector.shape_cast %21 : vector<1x1x256xf32> to vector<1x256xf32>
    %23 = vector.broadcast %22 : vector<1x256xf32> to vector<8x256xf32>
    %24 = arith.mulf %20, %23 : vector<8x256xf32>
    %c2_24 = arith.constant 2 : index
    %c0_25 = arith.constant 0 : index
    %c0_26 = arith.constant 0 : index
    %25 = vector.load %arg3[%c2_24, %c0_25, %c0_26] : memref<9x32x8xf32, #tpu.memory_space<vmem>>, vector<1x32x8xf32>
    %26 = vector.shape_cast %25 : vector<1x32x8xf32> to vector<32x8xf32>
    %cst_27 = arith.constant dense<0.000000e+00> : vector<32x256xf32>
    %27 = tpu.matmul %26, %24, %cst_27 {dimension_numbers = #tpu.dot_dimension_numbers<[1], [0], [0], [1], [0, 0, 1, 1], [], []>} : vector<32x8xf32>, vector<8x256xf32>, vector<32x256xf32> -> vector<32x256xf32>
    %28 = arith.addf %19, %27 : vector<32x256xf32>
    %c0_28 = arith.constant 0 : index
    %c16 = arith.constant 16 : index
    %29 = vector.load %arg12[%c0_28, %c16] : memref<32x290xf32, #tpu.memory_space<vmem>>, vector<8x256xf32>
    %c0_29 = arith.constant 0 : index
    %c0_30 = arith.constant 0 : index
    %c0_31 = arith.constant 0 : index
    %30 = vector.load %arg2[%c0_29, %c0_30, %c0_31] : memref<3x1x256xf32, #tpu.memory_space<vmem>>, vector<1x1x256xf32>
    %31 = vector.shape_cast %30 : vector<1x1x256xf32> to vector<1x256xf32>
    %32 = vector.broadcast %31 : vector<1x256xf32> to vector<8x256xf32>
    %33 = arith.mulf %29, %32 : vector<8x256xf32>
    %c3 = arith.constant 3 : index
    %c0_32 = arith.constant 0 : index
    %c0_33 = arith.constant 0 : index
    %34 = vector.load %arg3[%c3, %c0_32, %c0_33] : memref<9x32x8xf32, #tpu.memory_space<vmem>>, vector<1x32x8xf32>
    %35 = vector.shape_cast %34 : vector<1x32x8xf32> to vector<32x8xf32>
    %cst_34 = arith.constant dense<0.000000e+00> : vector<32x256xf32>
    %36 = tpu.matmul %35, %33, %cst_34 {dimension_numbers = #tpu.dot_dimension_numbers<[1], [0], [0], [1], [0, 0, 1, 1], [], []>} : vector<32x8xf32>, vector<8x256xf32>, vector<32x256xf32> -> vector<32x256xf32>
    %37 = arith.addf %28, %36 : vector<32x256xf32>
    %c0_35 = arith.constant 0 : index
    %c17_36 = arith.constant 17 : index
    %38 = vector.load %arg12[%c0_35, %c17_36] : memref<32x290xf32, #tpu.memory_space<vmem>>, vector<8x256xf32>
    %c4 = arith.constant 4 : index
    %c0_37 = arith.constant 0 : index
    %c0_38 = arith.constant 0 : index
    %39 = vector.load %arg3[%c4, %c0_37, %c0_38] : memref<9x32x8xf32, #tpu.memory_space<vmem>>, vector<1x32x8xf32>
    %40 = vector.shape_cast %39 : vector<1x32x8xf32> to vector<32x8xf32>
    %cst_39 = arith.constant dense<0.000000e+00> : vector<32x256xf32>
    %41 = tpu.matmul %40, %38, %cst_39 {dimension_numbers = #tpu.dot_dimension_numbers<[1], [0], [0], [1], [0, 0, 1, 1], [], []>} : vector<32x8xf32>, vector<8x256xf32>, vector<32x256xf32> -> vector<32x256xf32>
    %42 = arith.addf %37, %41 : vector<32x256xf32>
    %c0_40 = arith.constant 0 : index
    %c18 = arith.constant 18 : index
    %43 = vector.load %arg12[%c0_40, %c18] : memref<32x290xf32, #tpu.memory_space<vmem>>, vector<8x256xf32>
    %c2_41 = arith.constant 2 : index
    %c0_42 = arith.constant 0 : index
    %c0_43 = arith.constant 0 : index
    %44 = vector.load %arg2[%c2_41, %c0_42, %c0_43] : memref<3x1x256xf32, #tpu.memory_space<vmem>>, vector<1x1x256xf32>
    %45 = vector.shape_cast %44 : vector<1x1x256xf32> to vector<1x256xf32>
    %46 = vector.broadcast %45 : vector<1x256xf32> to vector<8x256xf32>
    %47 = arith.mulf %43, %46 : vector<8x256xf32>
    %c5 = arith.constant 5 : index
    %c0_44 = arith.constant 0 : index
    %c0_45 = arith.constant 0 : index
    %48 = vector.load %arg3[%c5, %c0_44, %c0_45] : memref<9x32x8xf32, #tpu.memory_space<vmem>>, vector<1x32x8xf32>
    %49 = vector.shape_cast %48 : vector<1x32x8xf32> to vector<32x8xf32>
    %cst_46 = arith.constant dense<0.000000e+00> : vector<32x256xf32>
    %50 = tpu.matmul %49, %47, %cst_46 {dimension_numbers = #tpu.dot_dimension_numbers<[1], [0], [0], [1], [0, 0, 1, 1], [], []>} : vector<32x8xf32>, vector<8x256xf32>, vector<32x256xf32> -> vector<32x256xf32>
    %51 = arith.addf %42, %50 : vector<32x256xf32>
    %c0_47 = arith.constant 0 : index
    %c32 = arith.constant 32 : index
    %52 = vector.load %arg12[%c0_47, %c32] : memref<32x290xf32, #tpu.memory_space<vmem>>, vector<8x256xf32>
    %c0_48 = arith.constant 0 : index
    %c0_49 = arith.constant 0 : index
    %c0_50 = arith.constant 0 : index
    %53 = vector.load %arg2[%c0_48, %c0_49, %c0_50] : memref<3x1x256xf32, #tpu.memory_space<vmem>>, vector<1x1x256xf32>
    %54 = vector.shape_cast %53 : vector<1x1x256xf32> to vector<1x256xf32>
    %55 = vector.broadcast %54 : vector<1x256xf32> to vector<8x256xf32>
    %56 = arith.mulf %52, %55 : vector<8x256xf32>
    %c6 = arith.constant 6 : index
    %c0_51 = arith.constant 0 : index
    %c0_52 = arith.constant 0 : index
    %57 = vector.load %arg3[%c6, %c0_51, %c0_52] : memref<9x32x8xf32, #tpu.memory_space<vmem>>, vector<1x32x8xf32>
    %58 = vector.shape_cast %57 : vector<1x32x8xf32> to vector<32x8xf32>
    %cst_53 = arith.constant dense<0.000000e+00> : vector<32x256xf32>
    %59 = tpu.matmul %58, %56, %cst_53 {dimension_numbers = #tpu.dot_dimension_numbers<[1], [0], [0], [1], [0, 0, 1, 1], [], []>} : vector<32x8xf32>, vector<8x256xf32>, vector<32x256xf32> -> vector<32x256xf32>
    %60 = arith.addf %51, %59 : vector<32x256xf32>
    %c0_54 = arith.constant 0 : index
    %c33 = arith.constant 33 : index
    %61 = vector.load %arg12[%c0_54, %c33] : memref<32x290xf32, #tpu.memory_space<vmem>>, vector<8x256xf32>
    %c7 = arith.constant 7 : index
    %c0_55 = arith.constant 0 : index
    %c0_56 = arith.constant 0 : index
    %62 = vector.load %arg3[%c7, %c0_55, %c0_56] : memref<9x32x8xf32, #tpu.memory_space<vmem>>, vector<1x32x8xf32>
    %63 = vector.shape_cast %62 : vector<1x32x8xf32> to vector<32x8xf32>
    %cst_57 = arith.constant dense<0.000000e+00> : vector<32x256xf32>
    %64 = tpu.matmul %63, %61, %cst_57 {dimension_numbers = #tpu.dot_dimension_numbers<[1], [0], [0], [1], [0, 0, 1, 1], [], []>} : vector<32x8xf32>, vector<8x256xf32>, vector<32x256xf32> -> vector<32x256xf32>
    %65 = arith.addf %60, %64 : vector<32x256xf32>
    %c0_58 = arith.constant 0 : index
    %c34 = arith.constant 34 : index
    %66 = vector.load %arg12[%c0_58, %c34] : memref<32x290xf32, #tpu.memory_space<vmem>>, vector<8x256xf32>
    %c2_59 = arith.constant 2 : index
    %c0_60 = arith.constant 0 : index
    %c0_61 = arith.constant 0 : index
    %67 = vector.load %arg2[%c2_59, %c0_60, %c0_61] : memref<3x1x256xf32, #tpu.memory_space<vmem>>, vector<1x1x256xf32>
    %68 = vector.shape_cast %67 : vector<1x1x256xf32> to vector<1x256xf32>
    %69 = vector.broadcast %68 : vector<1x256xf32> to vector<8x256xf32>
    %70 = arith.mulf %66, %69 : vector<8x256xf32>
    %c8 = arith.constant 8 : index
    %c0_62 = arith.constant 0 : index
    %c0_63 = arith.constant 0 : index
    %71 = vector.load %arg3[%c8, %c0_62, %c0_63] : memref<9x32x8xf32, #tpu.memory_space<vmem>>, vector<1x32x8xf32>
    %72 = vector.shape_cast %71 : vector<1x32x8xf32> to vector<32x8xf32>
    %cst_64 = arith.constant dense<0.000000e+00> : vector<32x256xf32>
    %73 = tpu.matmul %72, %70, %cst_64 {dimension_numbers = #tpu.dot_dimension_numbers<[1], [0], [0], [1], [0, 0, 1, 1], [], []>} : vector<32x8xf32>, vector<8x256xf32>, vector<32x256xf32> -> vector<32x256xf32>
    %74 = arith.addf %65, %73 : vector<32x256xf32>
    %c0_65 = arith.constant 0 : index
    %c0_66 = arith.constant 0 : index
    %75 = vector.load %arg4[%c0_65, %c0_66] : memref<32x1xf32, #tpu.memory_space<vmem>>, vector<32x1xf32>
    %76 = vector.broadcast %75 : vector<32x1xf32> to vector<32x256xf32>
    %77 = arith.addf %74, %76 : vector<32x256xf32>
    %cst_67 = arith.constant 0.000000e+00 : f32
    %78 = vector.broadcast %cst_67 : f32 to vector<32x256xf32>
    %79 = arith.cmpf ogt, %77, %78 : vector<32x256xf32>
    %cst_68 = arith.constant 0.00999999977 : f32
    %80 = vector.broadcast %cst_68 : f32 to vector<32x256xf32>
    %81 = arith.mulf %80, %77 : vector<32x256xf32>
    %82 = arith.select %79, %77, %81 : vector<32x256xi1>, vector<32x256xf32>
    %c0_69 = arith.constant 0 : index
    %c17_70 = arith.constant 17 : index
    %83 = vector.load %arg12[%c0_69, %c17_70] : memref<32x290xf32, #tpu.memory_space<vmem>>, vector<32x256xf32>
    tpu.vector_store %arg12[%c0_69, %c17_70], %82 {strides = array<i32>} : memref<32x290xf32, #tpu.memory_space<vmem>>, vector<32x256xf32>,
    %cst_71 = arith.constant 0.000000e+00 : f32
    %84 = vector.broadcast %cst_71 : f32 to vector<32x256xf32>
    %c0_72 = arith.constant 0 : index
    %c0_73 = arith.constant 0 : index
    %85 = vector.load %arg12[%c0_72, %c0_73] : memref<32x290xf32, #tpu.memory_space<vmem>>, vector<32x256xf32>
    %c0_74 = arith.constant 0 : index
    %c0_75 = arith.constant 0 : index
    %c0_76 = arith.constant 0 : index
    %86 = vector.load %arg2[%c0_74, %c0_75, %c0_76] : memref<3x1x256xf32, #tpu.memory_space<vmem>>, vector<1x1x256xf32>
    %87 = vector.shape_cast %86 : vector<1x1x256xf32> to vector<1x256xf32>
    %88 = vector.broadcast %87 : vector<1x256xf32> to vector<32x256xf32>
    %89 = arith.mulf %85, %88 : vector<32x256xf32>
    %c0_77 = arith.constant 0 : index
    %c0_78 = arith.constant 0 : index
    %c0_79 = arith.constant 0 : index
    %90 = vector.load %arg5[%c0_77, %c0_78, %c0_79] : memref<9x32x32xf32, #tpu.memory_space<vmem>>, vector<1x32x32xf32>
    %91 = vector.shape_cast %90 : vector<1x32x32xf32> to vector<32x32xf32>
    %cst_80 = arith.constant dense<0.000000e+00> : vector<32x256xf32>
    %92 = tpu.matmul %91, %89, %cst_80 {dimension_numbers = #tpu.dot_dimension_numbers<[1], [0], [0], [1], [0, 0, 1, 1], [], []>} : vector<32x32xf32>, vector<32x256xf32>, vector<32x256xf32> -> vector<32x256xf32>
    %93 = arith.addf %84, %92 : vector<32x256xf32>
    %c0_81 = arith.constant 0 : index
    %c1_82 = arith.constant 1 : index
    %94 = vector.load %arg12[%c0_81, %c1_82] : memref<32x290xf32, #tpu.memory_space<vmem>>, vector<32x256xf32>
    %c1_83 = arith.constant 1 : index
    %c0_84 = arith.constant 0 : index
    %c0_85 = arith.constant 0 : index
    %95 = vector.load %arg5[%c1_83, %c0_84, %c0_85] : memref<9x32x32xf32, #tpu.memory_space<vmem>>, vector<1x32x32xf32>
    %96 = vector.shape_cast %95 : vector<1x32x32xf32> to vector<32x32xf32>
    %cst_86 = arith.constant dense<0.000000e+00> : vector<32x256xf32>
    %97 = tpu.matmul %96, %94, %cst_86 {dimension_numbers = #tpu.dot_dimension_numbers<[1], [0], [0], [1], [0, 0, 1, 1], [], []>} : vector<32x32xf32>, vector<32x256xf32>, vector<32x256xf32> -> vector<32x256xf32>
    %98 = arith.addf %93, %97 : vector<32x256xf32>
    %c0_87 = arith.constant 0 : index
    %c2_88 = arith.constant 2 : index
    %99 = vector.load %arg12[%c0_87, %c2_88] : memref<32x290xf32, #tpu.memory_space<vmem>>, vector<32x256xf32>
    %c2_89 = arith.constant 2 : index
    %c0_90 = arith.constant 0 : index
    %c0_91 = arith.constant 0 : index
    %100 = vector.load %arg2[%c2_89, %c0_90, %c0_91] : memref<3x1x256xf32, #tpu.memory_space<vmem>>, vector<1x1x256xf32>
    %101 = vector.shape_cast %100 : vector<1x1x256xf32> to vector<1x256xf32>
    %102 = vector.broadcast %101 : vector<1x256xf32> to vector<32x256xf32>
    %103 = arith.mulf %99, %102 : vector<32x256xf32>
    %c2_92 = arith.constant 2 : index
    %c0_93 = arith.constant 0 : index
    %c0_94 = arith.constant 0 : index
    %104 = vector.load %arg5[%c2_92, %c0_93, %c0_94] : memref<9x32x32xf32, #tpu.memory_space<vmem>>, vector<1x32x32xf32>
    %105 = vector.shape_cast %104 : vector<1x32x32xf32> to vector<32x32xf32>
    %cst_95 = arith.constant dense<0.000000e+00> : vector<32x256xf32>
    %106 = tpu.matmul %105, %103, %cst_95 {dimension_numbers = #tpu.dot_dimension_numbers<[1], [0], [0], [1], [0, 0, 1, 1], [], []>} : vector<32x32xf32>, vector<32x256xf32>, vector<32x256xf32> -> vector<32x256xf32>
    %107 = arith.addf %98, %106 : vector<32x256xf32>
    %c0_96 = arith.constant 0 : index
    %c16_97 = arith.constant 16 : index
    %108 = vector.load %arg12[%c0_96, %c16_97] : memref<32x290xf32, #tpu.memory_space<vmem>>, vector<32x256xf32>
    %c0_98 = arith.constant 0 : index
    %c0_99 = arith.constant 0 : index
    %c0_100 = arith.constant 0 : index
    %109 = vector.load %arg2[%c0_98, %c0_99, %c0_100] : memref<3x1x256xf32, #tpu.memory_space<vmem>>, vector<1x1x256xf32>
    %110 = vector.shape_cast %109 : vector<1x1x256xf32> to vector<1x256xf32>
    %111 = vector.broadcast %110 : vector<1x256xf32> to vector<32x256xf32>
    %112 = arith.mulf %108, %111 : vector<32x256xf32>
    %c3_101 = arith.constant 3 : index
    %c0_102 = arith.constant 0 : index
    %c0_103 = arith.constant 0 : index
    %113 = vector.load %arg5[%c3_101, %c0_102, %c0_103] : memref<9x32x32xf32, #tpu.memory_space<vmem>>, vector<1x32x32xf32>
    %114 = vector.shape_cast %113 : vector<1x32x32xf32> to vector<32x32xf32>
    %cst_104 = arith.constant dense<0.000000e+00> : vector<32x256xf32>
    %115 = tpu.matmul %114, %112, %cst_104 {dimension_numbers = #tpu.dot_dimension_numbers<[1], [0], [0], [1], [0, 0, 1, 1], [], []>} : vector<32x32xf32>, vector<32x256xf32>, vector<32x256xf32> -> vector<32x256xf32>
    %116 = arith.addf %107, %115 : vector<32x256xf32>
    %c0_105 = arith.constant 0 : index
    %c17_106 = arith.constant 17 : index
    %117 = vector.load %arg12[%c0_105, %c17_106] : memref<32x290xf32, #tpu.memory_space<vmem>>, vector<32x256xf32>
    %c4_107 = arith.constant 4 : index
    %c0_108 = arith.constant 0 : index
    %c0_109 = arith.constant 0 : index
    %118 = vector.load %arg5[%c4_107, %c0_108, %c0_109] : memref<9x32x32xf32, #tpu.memory_space<vmem>>, vector<1x32x32xf32>
    %119 = vector.shape_cast %118 : vector<1x32x32xf32> to vector<32x32xf32>
    %cst_110 = arith.constant dense<0.000000e+00> : vector<32x256xf32>
    %120 = tpu.matmul %119, %117, %cst_110 {dimension_numbers = #tpu.dot_dimension_numbers<[1], [0], [0], [1], [0, 0, 1, 1], [], []>} : vector<32x32xf32>, vector<32x256xf32>, vector<32x256xf32> -> vector<32x256xf32>
    %121 = arith.addf %116, %120 : vector<32x256xf32>
    %c0_111 = arith.constant 0 : index
    %c18_112 = arith.constant 18 : index
    %122 = vector.load %arg12[%c0_111, %c18_112] : memref<32x290xf32, #tpu.memory_space<vmem>>, vector<32x256xf32>
    %c2_113 = arith.constant 2 : index
    %c0_114 = arith.constant 0 : index
    %c0_115 = arith.constant 0 : index
    %123 = vector.load %arg2[%c2_113, %c0_114, %c0_115] : memref<3x1x256xf32, #tpu.memory_space<vmem>>, vector<1x1x256xf32>
    %124 = vector.shape_cast %123 : vector<1x1x256xf32> to vector<1x256xf32>
    %125 = vector.broadcast %124 : vector<1x256xf32> to vector<32x256xf32>
    %126 = arith.mulf %122, %125 : vector<32x256xf32>
    %c5_116 = arith.constant 5 : index
    %c0_117 = arith.constant 0 : index
    %c0_118 = arith.constant 0 : index
    %127 = vector.load %arg5[%c5_116, %c0_117, %c0_118] : memref<9x32x32xf32, #tpu.memory_space<vmem>>, vector<1x32x32xf32>
    %128 = vector.shape_cast %127 : vector<1x32x32xf32> to vector<32x32xf32>
    %cst_119 = arith.constant dense<0.000000e+00> : vector<32x256xf32>
    %129 = tpu.matmul %128, %126, %cst_119 {dimension_numbers = #tpu.dot_dimension_numbers<[1], [0], [0], [1], [0, 0, 1, 1], [], []>} : vector<32x32xf32>, vector<32x256xf32>, vector<32x256xf32> -> vector<32x256xf32>
    %130 = arith.addf %121, %129 : vector<32x256xf32>
    %c0_120 = arith.constant 0 : index
    %c32_121 = arith.constant 32 : index
    %131 = vector.load %arg12[%c0_120, %c32_121] : memref<32x290xf32, #tpu.memory_space<vmem>>, vector<32x256xf32>
    %c0_122 = arith.constant 0 : index
    %c0_123 = arith.constant 0 : index
    %c0_124 = arith.constant 0 : index
    %132 = vector.load %arg2[%c0_122, %c0_123, %c0_124] : memref<3x1x256xf32, #tpu.memory_space<vmem>>, vector<1x1x256xf32>
    %133 = vector.shape_cast %132 : vector<1x1x256xf32> to vector<1x256xf32>
    %134 = vector.broadcast %133 : vector<1x256xf32> to vector<32x256xf32>
    %135 = arith.mulf %131, %134 : vector<32x256xf32>
    %c6_125 = arith.constant 6 : index
    %c0_126 = arith.constant 0 : index
    %c0_127 = arith.constant 0 : index
    %136 = vector.load %arg5[%c6_125, %c0_126, %c0_127] : memref<9x32x32xf32, #tpu.memory_space<vmem>>, vector<1x32x32xf32>
    %137 = vector.shape_cast %136 : vector<1x32x32xf32> to vector<32x32xf32>
    %cst_128 = arith.constant dense<0.000000e+00> : vector<32x256xf32>
    %138 = tpu.matmul %137, %135, %cst_128 {dimension_numbers = #tpu.dot_dimension_numbers<[1], [0], [0], [1], [0, 0, 1, 1], [], []>} : vector<32x32xf32>, vector<32x256xf32>, vector<32x256xf32> -> vector<32x256xf32>
    %139 = arith.addf %130, %138 : vector<32x256xf32>
    %c0_129 = arith.constant 0 : index
    %c33_130 = arith.constant 33 : index
    %140 = vector.load %arg12[%c0_129, %c33_130] : memref<32x290xf32, #tpu.memory_space<vmem>>, vector<32x256xf32>
    %c7_131 = arith.constant 7 : index
    %c0_132 = arith.constant 0 : index
    %c0_133 = arith.constant 0 : index
    %141 = vector.load %arg5[%c7_131, %c0_132, %c0_133] : memref<9x32x32xf32, #tpu.memory_space<vmem>>, vector<1x32x32xf32>
    %142 = vector.shape_cast %141 : vector<1x32x32xf32> to vector<32x32xf32>
    %cst_134 = arith.constant dense<0.000000e+00> : vector<32x256xf32>
    %143 = tpu.matmul %142, %140, %cst_134 {dimension_numbers = #tpu.dot_dimension_numbers<[1], [0], [0], [1], [0, 0, 1, 1], [], []>} : vector<32x32xf32>, vector<32x256xf32>, vector<32x256xf32> -> vector<32x256xf32>
    %144 = arith.addf %139, %143 : vector<32x256xf32>
    %c0_135 = arith.constant 0 : index
    %c34_136 = arith.constant 34 : index
    %145 = vector.load %arg12[%c0_135, %c34_136] : memref<32x290xf32, #tpu.memory_space<vmem>>, vector<32x256xf32>
    %c2_137 = arith.constant 2 : index
    %c0_138 = arith.constant 0 : index
    %c0_139 = arith.constant 0 : index
    %146 = vector.load %arg2[%c2_137, %c0_138, %c0_139] : memref<3x1x256xf32, #tpu.memory_space<vmem>>, vector<1x1x256xf32>
    %147 = vector.shape_cast %146 : vector<1x1x256xf32> to vector<1x256xf32>
    %148 = vector.broadcast %147 : vector<1x256xf32> to vector<32x256xf32>
    %149 = arith.mulf %145, %148 : vector<32x256xf32>
    %c8_140 = arith.constant 8 : index
    %c0_141 = arith.constant 0 : index
    %c0_142 = arith.constant 0 : index
    %150 = vector.load %arg5[%c8_140, %c0_141, %c0_142] : memref<9x32x32xf32, #tpu.memory_space<vmem>>, vector<1x32x32xf32>
    %151 = vector.shape_cast %150 : vector<1x32x32xf32> to vector<32x32xf32>
    %cst_143 = arith.constant dense<0.000000e+00> : vector<32x256xf32>
    %152 = tpu.matmul %151, %149, %cst_143 {dimension_numbers = #tpu.dot_dimension_numbers<[1], [0], [0], [1], [0, 0, 1, 1], [], []>} : vector<32x32xf32>, vector<32x256xf32>, vector<32x256xf32> -> vector<32x256xf32>
    %153 = arith.addf %144, %152 : vector<32x256xf32>
    %c0_144 = arith.constant 0 : index
    %c0_145 = arith.constant 0 : index
    %154 = vector.load %arg6[%c0_144, %c0_145] : memref<32x1xf32, #tpu.memory_space<vmem>>, vector<32x1xf32>
    %155 = vector.broadcast %154 : vector<32x1xf32> to vector<32x256xf32>
    %156 = arith.addf %153, %155 : vector<32x256xf32>
    %cst_146 = arith.constant 0.000000e+00 : f32
    %157 = vector.broadcast %cst_146 : f32 to vector<32x256xf32>
    %158 = arith.cmpf ogt, %156, %157 : vector<32x256xf32>
    %cst_147 = arith.constant 0.00999999977 : f32
    %159 = vector.broadcast %cst_147 : f32 to vector<32x256xf32>
    %160 = arith.mulf %159, %156 : vector<32x256xf32>
    %161 = arith.select %158, %156, %160 : vector<32x256xi1>, vector<32x256xf32>
    %c0_148 = arith.constant 0 : index
    %c17_149 = arith.constant 17 : index
    %162 = vector.load %arg12[%c0_148, %c17_149] : memref<32x290xf32, #tpu.memory_space<vmem>>, vector<32x256xf32>
    tpu.vector_store %arg12[%c0_148, %c17_149], %161 {strides = array<i32>} : memref<32x290xf32, #tpu.memory_space<vmem>>, vector<32x256xf32>,
    %cst_150 = arith.constant 0.000000e+00 : f32
    %163 = vector.broadcast %cst_150 : f32 to vector<32x256xf32>
    %c0_151 = arith.constant 0 : index
    %c0_152 = arith.constant 0 : index
    %164 = vector.load %arg12[%c0_151, %c0_152] : memref<32x290xf32, #tpu.memory_space<vmem>>, vector<32x256xf32>
    %c0_153 = arith.constant 0 : index
    %c0_154 = arith.constant 0 : index
    %c0_155 = arith.constant 0 : index
    %165 = vector.load %arg2[%c0_153, %c0_154, %c0_155] : memref<3x1x256xf32, #tpu.memory_space<vmem>>, vector<1x1x256xf32>
    %166 = vector.shape_cast %165 : vector<1x1x256xf32> to vector<1x256xf32>
    %167 = vector.broadcast %166 : vector<1x256xf32> to vector<32x256xf32>
    %168 = arith.mulf %164, %167 : vector<32x256xf32>
    %c0_156 = arith.constant 0 : index
    %c0_157 = arith.constant 0 : index
    %c0_158 = arith.constant 0 : index
    %169 = vector.load %arg7[%c0_156, %c0_157, %c0_158] : memref<9x32x32xf32, #tpu.memory_space<vmem>>, vector<1x32x32xf32>
    %170 = vector.shape_cast %169 : vector<1x32x32xf32> to vector<32x32xf32>
    %cst_159 = arith.constant dense<0.000000e+00> : vector<32x256xf32>
    %171 = tpu.matmul %170, %168, %cst_159 {dimension_numbers = #tpu.dot_dimension_numbers<[1], [0], [0], [1], [0, 0, 1, 1], [], []>} : vector<32x32xf32>, vector<32x256xf32>, vector<32x256xf32> -> vector<32x256xf32>
    %172 = arith.addf %163, %171 : vector<32x256xf32>
    %c0_160 = arith.constant 0 : index
    %c1_161 = arith.constant 1 : index
    %173 = vector.load %arg12[%c0_160, %c1_161] : memref<32x290xf32, #tpu.memory_space<vmem>>, vector<32x256xf32>
    %c1_162 = arith.constant 1 : index
    %c0_163 = arith.constant 0 : index
    %c0_164 = arith.constant 0 : index
    %174 = vector.load %arg7[%c1_162, %c0_163, %c0_164] : memref<9x32x32xf32, #tpu.memory_space<vmem>>, vector<1x32x32xf32>
    %175 = vector.shape_cast %174 : vector<1x32x32xf32> to vector<32x32xf32>
    %cst_165 = arith.constant dense<0.000000e+00> : vector<32x256xf32>
    %176 = tpu.matmul %175, %173, %cst_165 {dimension_numbers = #tpu.dot_dimension_numbers<[1], [0], [0], [1], [0, 0, 1, 1], [], []>} : vector<32x32xf32>, vector<32x256xf32>, vector<32x256xf32> -> vector<32x256xf32>
    %177 = arith.addf %172, %176 : vector<32x256xf32>
    %c0_166 = arith.constant 0 : index
    %c2_167 = arith.constant 2 : index
    %178 = vector.load %arg12[%c0_166, %c2_167] : memref<32x290xf32, #tpu.memory_space<vmem>>, vector<32x256xf32>
    %c2_168 = arith.constant 2 : index
    %c0_169 = arith.constant 0 : index
    %c0_170 = arith.constant 0 : index
    %179 = vector.load %arg2[%c2_168, %c0_169, %c0_170] : memref<3x1x256xf32, #tpu.memory_space<vmem>>, vector<1x1x256xf32>
    %180 = vector.shape_cast %179 : vector<1x1x256xf32> to vector<1x256xf32>
    %181 = vector.broadcast %180 : vector<1x256xf32> to vector<32x256xf32>
    %182 = arith.mulf %178, %181 : vector<32x256xf32>
    %c2_171 = arith.constant 2 : index
    %c0_172 = arith.constant 0 : index
    %c0_173 = arith.constant 0 : index
    %183 = vector.load %arg7[%c2_171, %c0_172, %c0_173] : memref<9x32x32xf32, #tpu.memory_space<vmem>>, vector<1x32x32xf32>
    %184 = vector.shape_cast %183 : vector<1x32x32xf32> to vector<32x32xf32>
    %cst_174 = arith.constant dense<0.000000e+00> : vector<32x256xf32>
    %185 = tpu.matmul %184, %182, %cst_174 {dimension_numbers = #tpu.dot_dimension_numbers<[1], [0], [0], [1], [0, 0, 1, 1], [], []>} : vector<32x32xf32>, vector<32x256xf32>, vector<32x256xf32> -> vector<32x256xf32>
    %186 = arith.addf %177, %185 : vector<32x256xf32>
    %c0_175 = arith.constant 0 : index
    %c16_176 = arith.constant 16 : index
    %187 = vector.load %arg12[%c0_175, %c16_176] : memref<32x290xf32, #tpu.memory_space<vmem>>, vector<32x256xf32>
    %c0_177 = arith.constant 0 : index
    %c0_178 = arith.constant 0 : index
    %c0_179 = arith.constant 0 : index
    %188 = vector.load %arg2[%c0_177, %c0_178, %c0_179] : memref<3x1x256xf32, #tpu.memory_space<vmem>>, vector<1x1x256xf32>
    %189 = vector.shape_cast %188 : vector<1x1x256xf32> to vector<1x256xf32>
    %190 = vector.broadcast %189 : vector<1x256xf32> to vector<32x256xf32>
    %191 = arith.mulf %187, %190 : vector<32x256xf32>
    %c3_180 = arith.constant 3 : index
    %c0_181 = arith.constant 0 : index
    %c0_182 = arith.constant 0 : index
    %192 = vector.load %arg7[%c3_180, %c0_181, %c0_182] : memref<9x32x32xf32, #tpu.memory_space<vmem>>, vector<1x32x32xf32>
    %193 = vector.shape_cast %192 : vector<1x32x32xf32> to vector<32x32xf32>
    %cst_183 = arith.constant dense<0.000000e+00> : vector<32x256xf32>
    %194 = tpu.matmul %193, %191, %cst_183 {dimension_numbers = #tpu.dot_dimension_numbers<[1], [0], [0], [1], [0, 0, 1, 1], [], []>} : vector<32x32xf32>, vector<32x256xf32>, vector<32x256xf32> -> vector<32x256xf32>
    %195 = arith.addf %186, %194 : vector<32x256xf32>
    %c0_184 = arith.constant 0 : index
    %c17_185 = arith.constant 17 : index
    %196 = vector.load %arg12[%c0_184, %c17_185] : memref<32x290xf32, #tpu.memory_space<vmem>>, vector<32x256xf32>
    %c4_186 = arith.constant 4 : index
    %c0_187 = arith.constant 0 : index
    %c0_188 = arith.constant 0 : index
    %197 = vector.load %arg7[%c4_186, %c0_187, %c0_188] : memref<9x32x32xf32, #tpu.memory_space<vmem>>, vector<1x32x32xf32>
    %198 = vector.shape_cast %197 : vector<1x32x32xf32> to vector<32x32xf32>
    %cst_189 = arith.constant dense<0.000000e+00> : vector<32x256xf32>
    %199 = tpu.matmul %198, %196, %cst_189 {dimension_numbers = #tpu.dot_dimension_numbers<[1], [0], [0], [1], [0, 0, 1, 1], [], []>} : vector<32x32xf32>, vector<32x256xf32>, vector<32x256xf32> -> vector<32x256xf32>
    %200 = arith.addf %195, %199 : vector<32x256xf32>
    %c0_190 = arith.constant 0 : index
    %c18_191 = arith.constant 18 : index
    %201 = vector.load %arg12[%c0_190, %c18_191] : memref<32x290xf32, #tpu.memory_space<vmem>>, vector<32x256xf32>
    %c2_192 = arith.constant 2 : index
    %c0_193 = arith.constant 0 : index
    %c0_194 = arith.constant 0 : index
    %202 = vector.load %arg2[%c2_192, %c0_193, %c0_194] : memref<3x1x256xf32, #tpu.memory_space<vmem>>, vector<1x1x256xf32>
    %203 = vector.shape_cast %202 : vector<1x1x256xf32> to vector<1x256xf32>
    %204 = vector.broadcast %203 : vector<1x256xf32> to vector<32x256xf32>
    %205 = arith.mulf %201, %204 : vector<32x256xf32>
    %c5_195 = arith.constant 5 : index
    %c0_196 = arith.constant 0 : index
    %c0_197 = arith.constant 0 : index
    %206 = vector.load %arg7[%c5_195, %c0_196, %c0_197] : memref<9x32x32xf32, #tpu.memory_space<vmem>>, vector<1x32x32xf32>
    %207 = vector.shape_cast %206 : vector<1x32x32xf32> to vector<32x32xf32>
    %cst_198 = arith.constant dense<0.000000e+00> : vector<32x256xf32>
    %208 = tpu.matmul %207, %205, %cst_198 {dimension_numbers = #tpu.dot_dimension_numbers<[1], [0], [0], [1], [0, 0, 1, 1], [], []>} : vector<32x32xf32>, vector<32x256xf32>, vector<32x256xf32> -> vector<32x256xf32>
    %209 = arith.addf %200, %208 : vector<32x256xf32>
    %c0_199 = arith.constant 0 : index
    %c32_200 = arith.constant 32 : index
    %210 = vector.load %arg12[%c0_199, %c32_200] : memref<32x290xf32, #tpu.memory_space<vmem>>, vector<32x256xf32>
    %c0_201 = arith.constant 0 : index
    %c0_202 = arith.constant 0 : index
    %c0_203 = arith.constant 0 : index
    %211 = vector.load %arg2[%c0_201, %c0_202, %c0_203] : memref<3x1x256xf32, #tpu.memory_space<vmem>>, vector<1x1x256xf32>
    %212 = vector.shape_cast %211 : vector<1x1x256xf32> to vector<1x256xf32>
    %213 = vector.broadcast %212 : vector<1x256xf32> to vector<32x256xf32>
    %214 = arith.mulf %210, %213 : vector<32x256xf32>
    %c6_204 = arith.constant 6 : index
    %c0_205 = arith.constant 0 : index
    %c0_206 = arith.constant 0 : index
    %215 = vector.load %arg7[%c6_204, %c0_205, %c0_206] : memref<9x32x32xf32, #tpu.memory_space<vmem>>, vector<1x32x32xf32>
    %216 = vector.shape_cast %215 : vector<1x32x32xf32> to vector<32x32xf32>
    %cst_207 = arith.constant dense<0.000000e+00> : vector<32x256xf32>
    %217 = tpu.matmul %216, %214, %cst_207 {dimension_numbers = #tpu.dot_dimension_numbers<[1], [0], [0], [1], [0, 0, 1, 1], [], []>} : vector<32x32xf32>, vector<32x256xf32>, vector<32x256xf32> -> vector<32x256xf32>
    %218 = arith.addf %209, %217 : vector<32x256xf32>
    %c0_208 = arith.constant 0 : index
    %c33_209 = arith.constant 33 : index
    %219 = vector.load %arg12[%c0_208, %c33_209] : memref<32x290xf32, #tpu.memory_space<vmem>>, vector<32x256xf32>
    %c7_210 = arith.constant 7 : index
    %c0_211 = arith.constant 0 : index
    %c0_212 = arith.constant 0 : index
    %220 = vector.load %arg7[%c7_210, %c0_211, %c0_212] : memref<9x32x32xf32, #tpu.memory_space<vmem>>, vector<1x32x32xf32>
    %221 = vector.shape_cast %220 : vector<1x32x32xf32> to vector<32x32xf32>
    %cst_213 = arith.constant dense<0.000000e+00> : vector<32x256xf32>
    %222 = tpu.matmul %221, %219, %cst_213 {dimension_numbers = #tpu.dot_dimension_numbers<[1], [0], [0], [1], [0, 0, 1, 1], [], []>} : vector<32x32xf32>, vector<32x256xf32>, vector<32x256xf32> -> vector<32x256xf32>
    %223 = arith.addf %218, %222 : vector<32x256xf32>
    %c0_214 = arith.constant 0 : index
    %c34_215 = arith.constant 34 : index
    %224 = vector.load %arg12[%c0_214, %c34_215] : memref<32x290xf32, #tpu.memory_space<vmem>>, vector<32x256xf32>
    %c2_216 = arith.constant 2 : index
    %c0_217 = arith.constant 0 : index
    %c0_218 = arith.constant 0 : index
    %225 = vector.load %arg2[%c2_216, %c0_217, %c0_218] : memref<3x1x256xf32, #tpu.memory_space<vmem>>, vector<1x1x256xf32>
    %226 = vector.shape_cast %225 : vector<1x1x256xf32> to vector<1x256xf32>
    %227 = vector.broadcast %226 : vector<1x256xf32> to vector<32x256xf32>
    %228 = arith.mulf %224, %227 : vector<32x256xf32>
    %c8_219 = arith.constant 8 : index
    %c0_220 = arith.constant 0 : index
    %c0_221 = arith.constant 0 : index
    %229 = vector.load %arg7[%c8_219, %c0_220, %c0_221] : memref<9x32x32xf32, #tpu.memory_space<vmem>>, vector<1x32x32xf32>
    %230 = vector.shape_cast %229 : vector<1x32x32xf32> to vector<32x32xf32>
    %cst_222 = arith.constant dense<0.000000e+00> : vector<32x256xf32>
    %231 = tpu.matmul %230, %228, %cst_222 {dimension_numbers = #tpu.dot_dimension_numbers<[1], [0], [0], [1], [0, 0, 1, 1], [], []>} : vector<32x32xf32>, vector<32x256xf32>, vector<32x256xf32> -> vector<32x256xf32>
    %232 = arith.addf %223, %231 : vector<32x256xf32>
    %c0_223 = arith.constant 0 : index
    %c0_224 = arith.constant 0 : index
    %233 = vector.load %arg8[%c0_223, %c0_224] : memref<32x1xf32, #tpu.memory_space<vmem>>, vector<32x1xf32>
    %234 = vector.broadcast %233 : vector<32x1xf32> to vector<32x256xf32>
    %235 = arith.addf %232, %234 : vector<32x256xf32>
    %cst_225 = arith.constant 0.000000e+00 : f32
    %236 = vector.broadcast %cst_225 : f32 to vector<32x256xf32>
    %237 = arith.cmpf ogt, %235, %236 : vector<32x256xf32>
    %cst_226 = arith.constant 0.00999999977 : f32
    %238 = vector.broadcast %cst_226 : f32 to vector<32x256xf32>
    %239 = arith.mulf %238, %235 : vector<32x256xf32>
    %240 = arith.select %237, %235, %239 : vector<32x256xi1>, vector<32x256xf32>
    %c0_227 = arith.constant 0 : index
    %c17_228 = arith.constant 17 : index
    %241 = vector.load %arg12[%c0_227, %c17_228] : memref<32x290xf32, #tpu.memory_space<vmem>>, vector<32x256xf32>
    tpu.vector_store %arg12[%c0_227, %c17_228], %240 {strides = array<i32>} : memref<32x290xf32, #tpu.memory_space<vmem>>, vector<32x256xf32>,
    %cst_229 = arith.constant 0.000000e+00 : f32
    %242 = vector.broadcast %cst_229 : f32 to vector<4x256xf32>
    %c0_230 = arith.constant 0 : index
    %c0_231 = arith.constant 0 : index
    %243 = vector.load %arg12[%c0_230, %c0_231] : memref<32x290xf32, #tpu.memory_space<vmem>>, vector<32x256xf32>
    %c0_232 = arith.constant 0 : index
    %c0_233 = arith.constant 0 : index
    %c0_234 = arith.constant 0 : index
    %244 = vector.load %arg2[%c0_232, %c0_233, %c0_234] : memref<3x1x256xf32, #tpu.memory_space<vmem>>, vector<1x1x256xf32>
    %245 = vector.shape_cast %244 : vector<1x1x256xf32> to vector<1x256xf32>
    %246 = vector.broadcast %245 : vector<1x256xf32> to vector<32x256xf32>
    %247 = arith.mulf %243, %246 : vector<32x256xf32>
    %c0_235 = arith.constant 0 : index
    %c0_236 = arith.constant 0 : index
    %c0_237 = arith.constant 0 : index
    %248 = vector.load %arg9[%c0_235, %c0_236, %c0_237] : memref<9x4x32xf32, #tpu.memory_space<vmem>>, vector<1x4x32xf32>
    %249 = vector.shape_cast %248 : vector<1x4x32xf32> to vector<4x32xf32>
    %cst_238 = arith.constant dense<0.000000e+00> : vector<4x256xf32>
    %250 = tpu.matmul %249, %247, %cst_238 {dimension_numbers = #tpu.dot_dimension_numbers<[1], [0], [0], [1], [0, 0, 1, 1], [], []>} : vector<4x32xf32>, vector<32x256xf32>, vector<4x256xf32> -> vector<4x256xf32>
    %251 = arith.addf %242, %250 : vector<4x256xf32>
    %c0_239 = arith.constant 0 : index
    %c1_240 = arith.constant 1 : index
    %252 = vector.load %arg12[%c0_239, %c1_240] : memref<32x290xf32, #tpu.memory_space<vmem>>, vector<32x256xf32>
    %c1_241 = arith.constant 1 : index
    %c0_242 = arith.constant 0 : index
    %c0_243 = arith.constant 0 : index
    %253 = vector.load %arg9[%c1_241, %c0_242, %c0_243] : memref<9x4x32xf32, #tpu.memory_space<vmem>>, vector<1x4x32xf32>
    %254 = vector.shape_cast %253 : vector<1x4x32xf32> to vector<4x32xf32>
    %cst_244 = arith.constant dense<0.000000e+00> : vector<4x256xf32>
    %255 = tpu.matmul %254, %252, %cst_244 {dimension_numbers = #tpu.dot_dimension_numbers<[1], [0], [0], [1], [0, 0, 1, 1], [], []>} : vector<4x32xf32>, vector<32x256xf32>, vector<4x256xf32> -> vector<4x256xf32>
    %256 = arith.addf %251, %255 : vector<4x256xf32>
    %c0_245 = arith.constant 0 : index
    %c2_246 = arith.constant 2 : index
    %257 = vector.load %arg12[%c0_245, %c2_246] : memref<32x290xf32, #tpu.memory_space<vmem>>, vector<32x256xf32>
    %c2_247 = arith.constant 2 : index
    %c0_248 = arith.constant 0 : index
    %c0_249 = arith.constant 0 : index
    %258 = vector.load %arg2[%c2_247, %c0_248, %c0_249] : memref<3x1x256xf32, #tpu.memory_space<vmem>>, vector<1x1x256xf32>
    %259 = vector.shape_cast %258 : vector<1x1x256xf32> to vector<1x256xf32>
    %260 = vector.broadcast %259 : vector<1x256xf32> to vector<32x256xf32>
    %261 = arith.mulf %257, %260 : vector<32x256xf32>
    %c2_250 = arith.constant 2 : index
    %c0_251 = arith.constant 0 : index
    %c0_252 = arith.constant 0 : index
    %262 = vector.load %arg9[%c2_250, %c0_251, %c0_252] : memref<9x4x32xf32, #tpu.memory_space<vmem>>, vector<1x4x32xf32>
    %263 = vector.shape_cast %262 : vector<1x4x32xf32> to vector<4x32xf32>
    %cst_253 = arith.constant dense<0.000000e+00> : vector<4x256xf32>
    %264 = tpu.matmul %263, %261, %cst_253 {dimension_numbers = #tpu.dot_dimension_numbers<[1], [0], [0], [1], [0, 0, 1, 1], [], []>} : vector<4x32xf32>, vector<32x256xf32>, vector<4x256xf32> -> vector<4x256xf32>
    %265 = arith.addf %256, %264 : vector<4x256xf32>
    %c0_254 = arith.constant 0 : index
    %c16_255 = arith.constant 16 : index
    %266 = vector.load %arg12[%c0_254, %c16_255] : memref<32x290xf32, #tpu.memory_space<vmem>>, vector<32x256xf32>
    %c0_256 = arith.constant 0 : index
    %c0_257 = arith.constant 0 : index
    %c0_258 = arith.constant 0 : index
    %267 = vector.load %arg2[%c0_256, %c0_257, %c0_258] : memref<3x1x256xf32, #tpu.memory_space<vmem>>, vector<1x1x256xf32>
    %268 = vector.shape_cast %267 : vector<1x1x256xf32> to vector<1x256xf32>
    %269 = vector.broadcast %268 : vector<1x256xf32> to vector<32x256xf32>
    %270 = arith.mulf %266, %269 : vector<32x256xf32>
    %c3_259 = arith.constant 3 : index
    %c0_260 = arith.constant 0 : index
    %c0_261 = arith.constant 0 : index
    %271 = vector.load %arg9[%c3_259, %c0_260, %c0_261] : memref<9x4x32xf32, #tpu.memory_space<vmem>>, vector<1x4x32xf32>
    %272 = vector.shape_cast %271 : vector<1x4x32xf32> to vector<4x32xf32>
    %cst_262 = arith.constant dense<0.000000e+00> : vector<4x256xf32>
    %273 = tpu.matmul %272, %270, %cst_262 {dimension_numbers = #tpu.dot_dimension_numbers<[1], [0], [0], [1], [0, 0, 1, 1], [], []>} : vector<4x32xf32>, vector<32x256xf32>, vector<4x256xf32> -> vector<4x256xf32>
    %274 = arith.addf %265, %273 : vector<4x256xf32>
    %c0_263 = arith.constant 0 : index
    %c17_264 = arith.constant 17 : index
    %275 = vector.load %arg12[%c0_263, %c17_264] : memref<32x290xf32, #tpu.memory_space<vmem>>, vector<32x256xf32>
    %c4_265 = arith.constant 4 : index
    %c0_266 = arith.constant 0 : index
    %c0_267 = arith.constant 0 : index
    %276 = vector.load %arg9[%c4_265, %c0_266, %c0_267] : memref<9x4x32xf32, #tpu.memory_space<vmem>>, vector<1x4x32xf32>
    %277 = vector.shape_cast %276 : vector<1x4x32xf32> to vector<4x32xf32>
    %cst_268 = arith.constant dense<0.000000e+00> : vector<4x256xf32>
    %278 = tpu.matmul %277, %275, %cst_268 {dimension_numbers = #tpu.dot_dimension_numbers<[1], [0], [0], [1], [0, 0, 1, 1], [], []>} : vector<4x32xf32>, vector<32x256xf32>, vector<4x256xf32> -> vector<4x256xf32>
    %279 = arith.addf %274, %278 : vector<4x256xf32>
    %c0_269 = arith.constant 0 : index
    %c18_270 = arith.constant 18 : index
    %280 = vector.load %arg12[%c0_269, %c18_270] : memref<32x290xf32, #tpu.memory_space<vmem>>, vector<32x256xf32>
    %c2_271 = arith.constant 2 : index
    %c0_272 = arith.constant 0 : index
    %c0_273 = arith.constant 0 : index
    %281 = vector.load %arg2[%c2_271, %c0_272, %c0_273] : memref<3x1x256xf32, #tpu.memory_space<vmem>>, vector<1x1x256xf32>
    %282 = vector.shape_cast %281 : vector<1x1x256xf32> to vector<1x256xf32>
    %283 = vector.broadcast %282 : vector<1x256xf32> to vector<32x256xf32>
    %284 = arith.mulf %280, %283 : vector<32x256xf32>
    %c5_274 = arith.constant 5 : index
    %c0_275 = arith.constant 0 : index
    %c0_276 = arith.constant 0 : index
    %285 = vector.load %arg9[%c5_274, %c0_275, %c0_276] : memref<9x4x32xf32, #tpu.memory_space<vmem>>, vector<1x4x32xf32>
    %286 = vector.shape_cast %285 : vector<1x4x32xf32> to vector<4x32xf32>
    %cst_277 = arith.constant dense<0.000000e+00> : vector<4x256xf32>
    %287 = tpu.matmul %286, %284, %cst_277 {dimension_numbers = #tpu.dot_dimension_numbers<[1], [0], [0], [1], [0, 0, 1, 1], [], []>} : vector<4x32xf32>, vector<32x256xf32>, vector<4x256xf32> -> vector<4x256xf32>
    %288 = arith.addf %279, %287 : vector<4x256xf32>
    %c0_278 = arith.constant 0 : index
    %c32_279 = arith.constant 32 : index
    %289 = vector.load %arg12[%c0_278, %c32_279] : memref<32x290xf32, #tpu.memory_space<vmem>>, vector<32x256xf32>
    %c0_280 = arith.constant 0 : index
    %c0_281 = arith.constant 0 : index
    %c0_282 = arith.constant 0 : index
    %290 = vector.load %arg2[%c0_280, %c0_281, %c0_282] : memref<3x1x256xf32, #tpu.memory_space<vmem>>, vector<1x1x256xf32>
    %291 = vector.shape_cast %290 : vector<1x1x256xf32> to vector<1x256xf32>
    %292 = vector.broadcast %291 : vector<1x256xf32> to vector<32x256xf32>
    %293 = arith.mulf %289, %292 : vector<32x256xf32>
    %c6_283 = arith.constant 6 : index
    %c0_284 = arith.constant 0 : index
    %c0_285 = arith.constant 0 : index
    %294 = vector.load %arg9[%c6_283, %c0_284, %c0_285] : memref<9x4x32xf32, #tpu.memory_space<vmem>>, vector<1x4x32xf32>
    %295 = vector.shape_cast %294 : vector<1x4x32xf32> to vector<4x32xf32>
    %cst_286 = arith.constant dense<0.000000e+00> : vector<4x256xf32>
    %296 = tpu.matmul %295, %293, %cst_286 {dimension_numbers = #tpu.dot_dimension_numbers<[1], [0], [0], [1], [0, 0, 1, 1], [], []>} : vector<4x32xf32>, vector<32x256xf32>, vector<4x256xf32> -> vector<4x256xf32>
    %297 = arith.addf %288, %296 : vector<4x256xf32>
    %c0_287 = arith.constant 0 : index
    %c33_288 = arith.constant 33 : index
    %298 = vector.load %arg12[%c0_287, %c33_288] : memref<32x290xf32, #tpu.memory_space<vmem>>, vector<32x256xf32>
    %c7_289 = arith.constant 7 : index
    %c0_290 = arith.constant 0 : index
    %c0_291 = arith.constant 0 : index
    %299 = vector.load %arg9[%c7_289, %c0_290, %c0_291] : memref<9x4x32xf32, #tpu.memory_space<vmem>>, vector<1x4x32xf32>
    %300 = vector.shape_cast %299 : vector<1x4x32xf32> to vector<4x32xf32>
    %cst_292 = arith.constant dense<0.000000e+00> : vector<4x256xf32>
    %301 = tpu.matmul %300, %298, %cst_292 {dimension_numbers = #tpu.dot_dimension_numbers<[1], [0], [0], [1], [0, 0, 1, 1], [], []>} : vector<4x32xf32>, vector<32x256xf32>, vector<4x256xf32> -> vector<4x256xf32>
    %302 = arith.addf %297, %301 : vector<4x256xf32>
    %c0_293 = arith.constant 0 : index
    %c34_294 = arith.constant 34 : index
    %303 = vector.load %arg12[%c0_293, %c34_294] : memref<32x290xf32, #tpu.memory_space<vmem>>, vector<32x256xf32>
    %c2_295 = arith.constant 2 : index
    %c0_296 = arith.constant 0 : index
    %c0_297 = arith.constant 0 : index
    %304 = vector.load %arg2[%c2_295, %c0_296, %c0_297] : memref<3x1x256xf32, #tpu.memory_space<vmem>>, vector<1x1x256xf32>
    %305 = vector.shape_cast %304 : vector<1x1x256xf32> to vector<1x256xf32>
    %306 = vector.broadcast %305 : vector<1x256xf32> to vector<32x256xf32>
    %307 = arith.mulf %303, %306 : vector<32x256xf32>
    %c8_298 = arith.constant 8 : index
    %c0_299 = arith.constant 0 : index
    %c0_300 = arith.constant 0 : index
    %308 = vector.load %arg9[%c8_298, %c0_299, %c0_300] : memref<9x4x32xf32, #tpu.memory_space<vmem>>, vector<1x4x32xf32>
    %309 = vector.shape_cast %308 : vector<1x4x32xf32> to vector<4x32xf32>
    %cst_301 = arith.constant dense<0.000000e+00> : vector<4x256xf32>
    %310 = tpu.matmul %309, %307, %cst_301 {dimension_numbers = #tpu.dot_dimension_numbers<[1], [0], [0], [1], [0, 0, 1, 1], [], []>} : vector<4x32xf32>, vector<32x256xf32>, vector<4x256xf32> -> vector<4x256xf32>
    %311 = arith.addf %302, %310 : vector<4x256xf32>
    %c0_302 = arith.constant 0 : index
    %c0_303 = arith.constant 0 : index
    %312 = vector.load %arg10[%c0_302, %c0_303] : memref<4x1xf32, #tpu.memory_space<vmem>>, vector<4x1xf32>
    %313 = vector.broadcast %312 : vector<4x1xf32> to vector<4x256xf32>
    %314 = arith.addf %311, %313 : vector<4x256xf32>
    %c0_304 = arith.constant 0 : index
    %c0_305 = arith.constant 0 : index
    %c0_306 = arith.constant 0 : index
    %315 = vector.load %arg11[%c0_304, %c0_305, %c0_306] : memref<1x4x256xf32, #tpu.memory_space<vmem>>, vector<1x4x256xf32>
    %316 = vector.shape_cast %315 : vector<1x4x256xf32> to vector<4x256xf32>
    %317 = vector.shape_cast %314 : vector<4x256xf32> to vector<1x4x256xf32>
    tpu.vector_store %arg11[%c0_304, %c0_305, %c0_306], %317 {strides = array<i32>} : memref<1x4x256xf32, #tpu.memory_space<vmem>>, vector<1x4x256xf32>,
    return
  }
  func.func @transform_0(%arg0: i32) -> (i32, i32, i32) {
    %c0_i32 = arith.constant 0 : i32
    %c0_i32_0 = arith.constant 0 : i32
    %c0_i32_1 = arith.constant 0 : i32
    return %arg0, %c0_i32, %c0_i32_0 : i32, i32, i32
  }
  func.func @transform_1(%arg0: i32) -> (i32, i32, i32) {
    %c0_i32 = arith.constant 0 : i32
    %c0_i32_0 = arith.constant 0 : i32
    %c0_i32_1 = arith.constant 0 : i32
    %c0_i32_2 = arith.constant 0 : i32
    return %c0_i32, %c0_i32_0, %c0_i32_1 : i32, i32, i32
  }
  func.func @transform_2(%arg0: i32) -> (i32, i32, i32) {
    %c0_i32 = arith.constant 0 : i32
    %c0_i32_0 = arith.constant 0 : i32
    %c0_i32_1 = arith.constant 0 : i32
    %c0_i32_2 = arith.constant 0 : i32
    return %c0_i32, %c0_i32_0, %c0_i32_1 : i32, i32, i32
  }
  func.func @transform_3(%arg0: i32) -> (i32, i32) {
    %c0_i32 = arith.constant 0 : i32
    %c0_i32_0 = arith.constant 0 : i32
    %c0_i32_1 = arith.constant 0 : i32
    return %c0_i32, %c0_i32_0 : i32, i32
  }
  func.func @transform_4(%arg0: i32) -> (i32, i32, i32) {
    %c0_i32 = arith.constant 0 : i32
    %c0_i32_0 = arith.constant 0 : i32
    %c0_i32_1 = arith.constant 0 : i32
    %c0_i32_2 = arith.constant 0 : i32
    return %c0_i32, %c0_i32_0, %c0_i32_1 : i32, i32, i32
  }
  func.func @transform_5(%arg0: i32) -> (i32, i32) {
    %c0_i32 = arith.constant 0 : i32
    %c0_i32_0 = arith.constant 0 : i32
    %c0_i32_1 = arith.constant 0 : i32
    return %c0_i32, %c0_i32_0 : i32, i32
  }
  func.func @transform_6(%arg0: i32) -> (i32, i32, i32) {
    %c0_i32 = arith.constant 0 : i32
    %c0_i32_0 = arith.constant 0 : i32
    %c0_i32_1 = arith.constant 0 : i32
    %c0_i32_2 = arith.constant 0 : i32
    return %c0_i32, %c0_i32_0, %c0_i32_1 : i32, i32, i32
  }
  func.func @transform_7(%arg0: i32) -> (i32, i32) {
    %c0_i32 = arith.constant 0 : i32
    %c0_i32_0 = arith.constant 0 : i32
    %c0_i32_1 = arith.constant 0 : i32
    return %c0_i32, %c0_i32_0 : i32, i32
  }
  func.func @transform_8(%arg0: i32) -> (i32, i32, i32) {
    %c0_i32 = arith.constant 0 : i32
    %c0_i32_0 = arith.constant 0 : i32
    %c0_i32_1 = arith.constant 0 : i32
    %c0_i32_2 = arith.constant 0 : i32
    return %c0_i32, %c0_i32_0, %c0_i32_1 : i32, i32, i32
  }
  func.func @transform_9(%arg0: i32) -> (i32, i32) {
    %c0_i32 = arith.constant 0 : i32
    %c0_i32_0 = arith.constant 0 : i32
    %c0_i32_1 = arith.constant 0 : i32
    return %c0_i32, %c0_i32_0 : i32, i32
  }
  func.func @transform_10(%arg0: i32) -> (i32, i32, i32) {
    %c0_i32 = arith.constant 0 : i32
    %c0_i32_0 = arith.constant 0 : i32
    %c0_i32_1 = arith.constant 0 : i32
    return %arg0, %c0_i32, %c0_i32_0 : i32, i32, i32
  }
}

</mosaic_0001>

<bundles_post_ra>
// kernel: basic_decoder3_forward.1
= control target key start
LH: loop header
LB: loop body
LE: loop exit
PB: predicated region body
PF: predicated region fallthrough
CT: control target
= control target key end

     0   :  { %s7793_s13 = smov 0   ;;  %s9813_s0 = inlined_call_operand.vmem [shape: f32[2,3,256], index: 0, kind: input, shape index: {}]   ;;  %s9814_s1 = inlined_call_operand.vmem [shape: f32[3,1,256], index: 1, kind: input, shape index: {}]   ;;  %s9815_s2 = inlined_call_operand.vmem [shape: f32[9,32,8], index: 2, kind: input, shape index: {}]   ;;  %s9816_s3 = inlined_call_operand.vmem [shape: f32[32,1], index: 3, kind: input, shape index: {}]   ;;  %s9817_s4 = inlined_call_operand.vmem [shape: f32[9,32,32], index: 4, kind: input, shape index: {}]   ;;  %s9818_s5 = inlined_call_operand.vmem [shape: f32[32,1], index: 5, kind: input, shape index: {}]   ;;  %s9819_s6 = inlined_call_operand.vmem [shape: f32[9,32,32], index: 6, kind: input, shape index: {}]   ;;  %s9820_s7 = inlined_call_operand.vmem [shape: f32[32,1], index: 7, kind: input, shape index: {}]   ;;  %s9821_s8 = inlined_call_operand.vmem [shape: f32[9,4,32], index: 8, kind: input, shape index: {}]   ;;  %s9822_s9 = inlined_call_operand.vmem [shape: f32[4,1], index: 9, kind: input, shape index: {}]   ;;  %s9823_s10 = inlined_call_operand.vmem [shape: f32[2,4,256], index: 10, kind: output, shape index: {}]  }
   0x1 LB: > { %s6303_s14 = sadd.s32 4294967295, %s7720_s13   ;;  %p6307_p0 = scmp.ge.s32.totalorder %s7720_s13, 1  ;;  %s7720_s13 = sphi %s7793_s13, %s20_s13  }
   0x2   : > { %p312_p1 = scmp.lt.s32.totalorder %s7720_s13, 3 }
   0x4   : > { %p313_p2 = pnand %p6307_p0, %p312_p1 }
   0x5   : > { %p350_p3 = scmp.lt.s32.totalorder (!%p313_p2), %s6303_s14, 1  ;;  %v394_v0 = vlaneseq (!%p313_p2)  ;;  %vm362_vm0 = vcmask (!%p313_p2), 277504   ;;  %v9850_v2 = vmov (!%p313_p2), 0.0   ;;  %v6324_v3 = vld [vmem:[%s9814_s1 + $0x4] sm:$0x3] (!%p313_p2)  ;;  %s7723_s21 = smov (!%p313_p2), 17  }
   0x6   : > { %316 = sbr.rel (%p313_p2) target bundleno = 2529 (0x9e1), region = 60  ;;  %360 = vst [vmem:[#allocation2] sm:$0xff] (!%p313_p2), %v9850_v2  ;;  %361 = vst [vmem:[#allocation2 + $0x8] sm:$0xff] (!%p313_p2), %v9850_v2  ;;  %751 = vmatprep.mubr.f32.mxu0 (!%p313_p2), %v9850_v2  ;;  %507 = vmatprep.mubr.f32.mxu1 (!%p313_p2), %v9850_v2  ;;  %s7724_s22 = smov (!%p313_p2), 2   ;;  %v392_v10 = vld [vmem:[%s9814_s1] sm:$0x3] (!%p313_p2) }
   0x7   : > { %v395_v1 = vshrl.u32 (!%p313_p2), %v394_v0, 7  ;;  %364 = vst [vmem:[#allocation2 + $0x18] sm:$0xff] (!%p313_p2), %v9850_v2  ;;  %367 = vst [vmem:[#allocation2 + $0x30] sm:$0xff] (!%p313_p2), %v9850_v2  ;;  %s7725_s25 = smov (!%p313_p2), 16   ;;  %s9848_s26 = smov (!%p313_p2), 18   ;;  %vm385_vm1 = vcmask (!%p313_p2), 1042568  }
   0x8   : > { %370 = vst [vmem:[#allocation2 + $0x48] sm:$0xff] (!%p313_p2), %v9850_v2  ;;  %363 = vst.msk [vmem:[#allocation2 + $0x10] sm:$0xff] (!%p313_p2), %vm362_vm0, %v9850_v2  ;;  %vm380_vm2 = vcmask (!%p313_p2), 138240   ;;  %vm388_vm3 = vcmask (!%p313_p2), 133120   ;;  %vm648_vm4 = vcmask (!%p313_p2), 15360   ;;  %s9842_s27 = smov (!%p313_p2), 126  }
   0x9   : > { %366 = vst.msk [vmem:[#allocation2 + $0x28] sm:$0xff] (!%p313_p2), %vm362_vm0, %v9850_v2  ;;  %369 = vst.msk [vmem:[#allocation2 + $0x40] sm:$0xff] (!%p313_p2), %vm362_vm0, %v9850_v2  ;;  %v7822_v4 = vsub.s32 (!%p313_p2), 0, %v395_v1  ;;  %v7824_v5 = vsub.s32 (!%p313_p2), 1, %v395_v1  ;;  %vm788_vm5 = vcmask (!%p313_p2), 130048   ;;  %s9846_s28 = smov (!%p313_p2), 32  }
   0xa   : > { %372 = vst.msk [vmem:[#allocation2 + $0x58] sm:$0xff] (!%p313_p2), %vm362_vm0, %v9850_v2  ;;  %s9840_s29 = smov (!%p313_p2), 112   ;;  %s9838_s30 = smov (!%p313_p2), 111   ;;  %vm1053_vm6 = vcmask (!%p313_p2), 146432   ;;  %vm670_vm7 = vcmask (!%p313_p2), 1031168   ;;  %vm430_vm8 = vcmask (!%p313_p2), 64512  }
   0xb   : > { %v7832_v7 = vrot.slane (!%p313_p2), %v6324_v3, %v7822_v4  ;;  %v643_v9 = vrot.slane (!%p313_p2), %v6324_v3, %v7824_v5  ;;  %v7843_v11 = vrot.slane (!%p313_p2), %v392_v10, %v7822_v4  ;;  %v7847_v12 = vrot.slane (!%p313_p2), %v392_v10, %v7824_v5  ;;  %s9836_s11 = smov (!%p313_p2), 34   ;;  %s9831_s12 = smov (!%p313_p2), 110   ;;  %v6325_v42 = vld [vmem:[%s9815_s2 + $0x40] sm:$0xff] (!%p313_p2)  ;;  %v6326_v48 = vld [vmem:[%s9815_s2 + $0x48] sm:$0xff] (!%p313_p2)  ;;  %v6327_v53 = vld [vmem:[%s9815_s2 + $0x50] sm:$0xff] (!%p313_p2) }
   0xc   : > { %vm1193_vm9 = vcmask (!%p313_p2), 261120   ;;  %vm810_vm10 = vcmask (!%p313_p2), 916480   ;;  %s9844_s15 = smov (!%p313_p2), 127   ;;  %v6328_v57 = vld [vmem:[%s9815_s2 + $0x58] sm:$0xff] (!%p313_p2)  ;;  %vm935_vm11 = vcmask (!%p313_p2), 908288   ;;  %v6333_v61 = vld [vmem:[%s9815_s2 + $0x60] sm:$0xff] (!%p313_p2) }
   0xd   : > { %s9937_s14 = smov (!%p350_p3, %s6303_s14), 1  ;;  %644 = vrot.lane.b32.xlu1 %v7832_v7, %s7724_s22  ;;  %s9827_s24 = smov 95   ;;  %v6334_v3 = vld [vmem:[%s9815_s2 + $0x68] sm:$0xff]  ;;  %vm1075_vm12 = vcmask 900096   ;;  %vm9835_vm13 = vcmask 785408   ;;  %vm425_vm14 = vcmask 1039360  }
   0xe   : > { %s9824_s17 = sshll.u32 %s9937_s14, 3  ;;  %s9825_s19 = smov 94   ;;  %vm9834_vm15 = vcmask 777216  }
   0xf   : > { %s354_s20 = scalar_lea.vmem %s9813_s0, %s9824_s17  ;;  %s9852_s18 = smov 110  }
  0x10   : > { %v373_v6 = vld [vmem:[%s354_s20] sm:$0x77]  ;;  %s9829_s20 = smov 96   ;;  %s9855_s16 = smov 94  }
  0x11   : > { %376 = vrot.lane.b32.xlu0 %v373_v6, %s7723_s21  ;;  %v375_v8 = vcombine.high %v373_v6, %v373_v6  ;;  %646 = vrot.lane.b32.xlu1 %v643_v9, %s7724_s22 }
  0x15   : > { %378 = vrot.lane.b32.xlu0 %v375_v8, %s7723_s21  ;;  %786 = vrot.lane.b32.xlu1 %v7847_v12, %s7725_s25 }
  0x19   : > { %784 = vrot.lane.b32.xlu0 %v7843_v11, %s7725_s25  ;;  %1051 = vrot.lane.b32.xlu1 %v643_v9, %s9848_s26 }
  0x1d   : > { %1049 = vrot.lane.b32.xlu0 %v7832_v7, %s9848_s26 }
  0x7f   : > { %v645_v15 = vpop.permute.xlu1 %644 }
  0x83   : > { %v377_v13 = vpop.permute.xlu0 %376  ;;  %v647_v19 = vpop.permute.xlu1 %646 }
  0x84   : > { %386 = vst.msk [vmem:[#allocation2] sm:$0x7] %vm385_vm1, %v377_v13  ;;  %v649_v21 = vsel %vm648_vm4, %v645_v15, %v647_v19  ;;  %vm9833_vm1 = vcmask 769024  }
  0x87   : > { %v379_v14 = vpop.permute.xlu0 %378  ;;  %v787_v26 = vpop.permute.xlu1 %786 }
  0x88   : > { %v381_v16 = vsel %vm380_vm2, %v377_v13, %v379_v14  ;;  %389 = vst.msk [vmem:[#allocation2 + $0x10] sm:$0x7] %vm388_vm3, %v379_v14  ;;  %v6335_v13 = vld [vmem:[%s9815_s2 + $0x70] sm:$0xff] }
  0x89   : > { %387 = vst [vmem:[#allocation2 + $0x8] sm:$0x7] %v381_v16 }
  0x8b   : > { %v7857_v17 = vld [vmem:[#allocation2] sm:$0xff]  ;;  %v785_v25 = vpop.permute.xlu0 %784  ;;  %v1052_v32 = vpop.permute.xlu1 %1051 }
  0x8c   : > { %v653_v18 = vmul.f32 %v645_v15, %v7857_v17  ;;  %v789_v27 = vsel %vm788_vm5, %v785_v25, %v787_v26  ;;  %v793_v30 = vmul.f32 %v785_v25, %v7857_v17  ;;  %v6336_v15 = vld [vmem:[%s9815_s2 + $0x78] sm:$0xff]  ;;  %v7737_v25 = vmov 0  }
  0x8d   : > { %6992 = vset.pattern.permute.xlu1 %v7737_v25  ;;  %6991 = vset.pattern.permute.xlu0 %v7737_v25 }
  0x8e   : > { %664 = vrot.lane.b32.xlu0 %v653_v18, %s9842_s27  ;;  %v6341_v18 = vld [vmem:[%s9815_s2 + $0x80] sm:$0xff] }
  0x8f   : > { %v7861_v20 = vld [vmem:[#allocation2 + $0x10] sm:$0xff]  ;;  %v1050_v31 = vpop.permute.xlu0 %1049 }
  0x90   : > { %v655_v22 = vmul.f32 %v647_v19, %v7861_v20  ;;  %v7865_v23 = vld [vmem:[#allocation2 + $0x8] sm:$0xff]  ;;  %v795_v29 = vmul.f32 %v787_v26, %v7861_v20  ;;  %v1054_v33 = vsel %vm1053_vm6, %v1050_v31, %v1052_v32  ;;  %v1060_v35 = vmul.f32 %v1052_v32, %v7861_v20  ;;  %v1595_v26 = vld [vmem:[%s9816_s3 + $0x10] sm:$0xff]  ;;  %v6352_v32 = vld [vmem:[%s9815_s2 + $0xb8] sm:$0xff] }
  0x91   : > { %v654_v24 = vmul.f32 %v649_v21, %v7865_v23  ;;  %v794_v28 = vmul.f32 %v789_v27, %v7865_v23  ;;  %v1059_v34 = vmul.f32 %v1054_v33, %v7865_v23  ;;  %v1058_v36 = vmul.f32 %v1050_v31, %v7857_v17  ;;  %v1594_v21 = vld [vmem:[%s9816_s3 + $0x8] sm:$0xff]  ;;  %v1596_v27 = vld [vmem:[%s9816_s3 + $0x18] sm:$0xff]  ;;  %v6351_v31 = vld [vmem:[%s9815_s2 + $0xb0] sm:$0xff] }
  0x92   : > { %668 = vrot.lane.b32.xlu1 %v655_v22, %s9842_s27  ;;  %v1593_v22 = vld [vmem:[%s9816_s3] sm:$0xff] }
  0x93   : > { %666 = vrot.lane.b32.xlu0 %v654_v24, %s9842_s27  ;;  %v6343_v24 = vld [vmem:[%s9815_s2 + $0x90] sm:$0xff] }
  0x96   : > { %1189 = vrot.lane.b32.xlu1 %v7843_v11, %s9846_s28 }
  0x97   : > { %1191 = vrot.lane.b32.xlu0 %v7847_v12, %s9846_s28 }
  0x9a   : > { %806 = vrot.lane.b32.xlu1 %v794_v28, %s9840_s29  ;;  %v6344_v28 = vld [vmem:[%s9815_s2 + $0x98] sm:$0xff] }
  0x9b   : > { %808 = vrot.lane.b32.xlu0 %v795_v29, %s9840_s29  ;;  %v6349_v29 = vld [vmem:[%s9815_s2 + $0xa0] sm:$0xff] }
  0x9e   : > { %804 = vrot.lane.b32.xlu1 %v793_v30, %s9840_s29  ;;  %v6350_v30 = vld [vmem:[%s9815_s2 + $0xa8] sm:$0xff] }
  0x9f   : > { %931 = vrot.lane.b32.xlu0 %v7865_v23, %s9838_s30 }
  0xa2   : > { %933 = vrot.lane.b32.xlu1 %v7861_v20, %s9838_s30 }
  0xa3   : > { %929 = vrot.lane.b32.xlu0 %v7857_v17, %s9838_s30 }
  0xa6   : > { %1454 = vrot.lane.b32.xlu1 %v7832_v7, %s9836_s11 }
  0xa7   : > { %1456 = vrot.lane.b32.xlu0 %v643_v9, %s9836_s11 }
  0xaa   : > { %1071 = vrot.lane.b32.xlu1 %v1059_v34, %s9831_s12 }
  0xab   : > { %1073 = vrot.lane.b32.xlu0 %v1060_v35, %s9831_s12 }
  0xae   : > { %1069 = vrot.lane.b32.xlu1 %v1058_v36, %s9831_s12  ;;  %s9854_s12 = smov 95  }
 0x100   : > { %v665_v37 = vpop.permute.xlu0 %664 }
 0x104   : > { %v669_v38 = vpop.permute.xlu1 %668 }
 0x105   : > { %v667_v39 = vpop.permute.xlu0 %666 }
 0x106   : > { %v672_v40 = vsel %vm670_vm7, %v667_v39, %v669_v38  ;;  %v671_v41 = vsel %vm670_vm7, %v665_v37, %v667_v39  ;;  %v6357_v39 = vld [vmem:[%s9815_s2 + $0xc0] sm:$0xff] }
 0x107   : > { %687 = vmatprep.subr.mxu0 %v672_v40 }
 0x108   : > { %v1190_v43 = vpop.permute.xlu1 %1189  ;;  %688 = vmatpush1.msra.mxu0 %v671_v41 }
 0x109   : > { %v1198_v44 = vmul.f32 %v1190_v43, %v7857_v17  ;;  %6329 = vmatmul.mubr.msk.f32.vlgmr.msra.gmra.mrb[0].mxu0 %vm430_vm8, %v6325_v42  ;;  %v1192_v45 = vpop.permute.xlu0 %1191 }
 0x10a   : > { %v1194_v46 = vsel %vm1193_vm9, %v1190_v43, %v1192_v45  ;;  %v1200_v47 = vmul.f32 %v1192_v45, %v7861_v20  ;;  %757 = vmatprep.mubr.f32.mxu0 %v9850_v2  ;;  %v6312_v43 = vld [vmem:[%s9815_s2 + $0x20] sm:$0xff]  ;;  %v405_v45 = vmul.f32 %v7847_v12, %v7865_v23  ;;  %v6313_v12 = vld [vmem:[%s9815_s2 + $0x28] sm:$0xff] }
 0x10b   : > { %1209 = vrot.lane.b32.xlu0 %v1198_v44, %s9829_s20  ;;  %v1199_v51 = vmul.f32 %v1194_v46, %v7865_v23  ;;  %v6358_v46 = vld [vmem:[%s9815_s2 + $0xc8] sm:$0xff] }
 0x10c   : > { %v807_v49 = vpop.permute.xlu1 %806  ;;  %1213 = vrot.lane.b32.xlu1 %v1200_v47, %s9829_s20  ;;  %v404_v47 = vmul.f32 %v7843_v11, %v7857_v17  ;;  %v6359_v11 = vld [vmem:[%s9815_s2 + $0xd0] sm:$0xff] }
 0x10d   : > { %6330 = vmatmul.mubr.msk.f32.gmra.mrb[2].mxu0 %vm430_vm8, %v6326_v48  ;;  %v809_v50 = vpop.permute.xlu0 %808 }
 0x10e   : > { %v812_v52 = vsel %vm810_vm10, %v807_v49, %v809_v50  ;;  %763 = vmatprep.mubr.f32.mxu0 %v9850_v2 }
 0x10f   : > { %1211 = vrot.lane.b32.xlu0 %v1199_v51, %s9829_s20  ;;  %827 = vmatprep.subr.mxu0 %v812_v52  ;;  %v6314_v51 = vld [vmem:[%s9815_s2 + $0x30] sm:$0xff]  ;;  %s9853_s20 = smov 96  }
 0x110   : > { %v805_v54 = vpop.permute.xlu1 %804  ;;  %421 = vrot.lane.b32.xlu1 %v7865_v23, %s9844_s15 }
 0x111   : > { %v811_v55 = vsel %vm810_vm10, %v805_v54, %v807_v49  ;;  %6331 = vmatmul.mubr.msk.f32.gmra.mrb[4].mxu0 %vm430_vm8, %v6327_v53  ;;  %v932_v56 = vpop.permute.xlu0 %931  ;;  %v6360_v53 = vld [vmem:[%s9815_s2 + $0xd8] sm:$0xff] }
 0x112   : > { %828 = vmatpush1.msra.mxu0 %v811_v55  ;;  %769 = vmatprep.mubr.f32.mxu0 %v9850_v2 }
 0x113   : > { %423 = vrot.lane.b32.xlu0 %v7861_v20, %s9844_s15 }
 0x114   : > { %v934_v58 = vpop.permute.xlu1 %933  ;;  %419 = vrot.lane.b32.xlu1 %v7857_v17, %s9844_s15 }
 0x115   : > { %6332 = vmatmul.mubr.msk.f32.gmra.mrb[6].mxu0 %vm430_vm8, %v6328_v57  ;;  %v930_v59 = vpop.permute.xlu0 %929  ;;  %v937_v60 = vsel %vm935_vm11, %v932_v56, %v934_v58  ;;  %v6365_v58 = vld [vmem:[%s9815_s2 + $0xe0] sm:$0xff] }
 0x116   : > { %952 = vmatprep.subr.mxu0 %v937_v60  ;;  %891 = vmatprep.mubr.f32.mxu0 %v9850_v2  ;;  %v936_v63 = vsel %vm935_vm11, %v930_v59, %v932_v56  ;;  %v6315_v56 = vld [vmem:[%s9815_s2 + $0x38] sm:$0xff]  ;;  %v406_v60 = vld [vmem:[%s9815_s2] sm:$0xff] }
 0x117   : > { %1336 = vrot.lane.b32.xlu0 %v7865_v23, %s9827_s24 }
 0x118   : > { %v1455_v62 = vpop.permute.xlu1 %1454  ;;  %1338 = vrot.lane.b32.xlu1 %v7861_v20, %s9827_s24 }
 0x119   : > { %6337 = vmatmul.mubr.msk.f32.vlgmr.msra.gmra.mrb[0].mxu0 %vm430_vm8, %v6333_v61  ;;  %v1457_v0 = vpop.permute.xlu0 %1456  ;;  %v1462_v14 = vmul.f32 %v1455_v62, %v7857_v17  ;;  %v6366_v61 = vld [vmem:[%s9815_s2 + $0xe8] sm:$0xff] }
 0x11a   : > { %953 = vmatpush1.msra.mxu0 %v936_v63  ;;  %v1458_v1 = vsel %vm362_vm0, %v1455_v62, %v1457_v0  ;;  %897 = vmatprep.mubr.f32.mxu0 %v9850_v2  ;;  %v1464_v8 = vmul.f32 %v1457_v0, %v7861_v20  ;;  %v6342_v20 = vld [vmem:[%s9815_s2 + $0x88] sm:$0xff]  ;;  %v6367_v63 = vld [vmem:[%s9815_s2 + $0xf0] sm:$0xff] }
 0x11b   : > { %1334 = vrot.lane.b32.xlu0 %v7857_v17, %s9827_s24  ;;  %v1463_v6 = vmul.f32 %v1458_v1, %v7865_v23  ;;  %v407_v62 = vld [vmem:[%s9815_s2 + $0x8] sm:$0xff]  ;;  %v408_v0 = vld [vmem:[%s9815_s2 + $0x10] sm:$0xff]  ;;  %v6368_v1 = vld [vmem:[%s9815_s2 + $0xf8] sm:$0xff]  ;;  %s9879_s24 = smov 34  }
 0x11c   : > { %v1072_v7 = vpop.permute.xlu1 %1071 }
 0x11d   : > { %6338 = vmatmul.mubr.msk.f32.gmra.mrb[2].mxu0 %vm430_vm8, %v6334_v3  ;;  %1475 = vrot.lane.b32.xlu1 %v1463_v6, %s9825_s19  ;;  %v1074_v9 = vpop.permute.xlu0 %1073  ;;  %v409_v3 = vld [vmem:[%s9815_s2 + $0x18] sm:$0xff]  ;;  %v6373_v6 = vld [vmem:[%s9815_s2 + $0x100] sm:$0xff] }
 0x11e   : > { %v1077_v10 = vsel %vm1075_vm12, %v1072_v7, %v1074_v9  ;;  %903 = vmatprep.mubr.f32.mxu0 %v9850_v2  ;;  %v6376_v9 = vld [vmem:[%s9815_s2 + $0x118] sm:$0xff] }
 0x11f   : > { %1477 = vrot.lane.b32.xlu0 %v1464_v8, %s9825_s19  ;;  %1092 = vmatprep.subr.mxu0 %v1077_v10  ;;  %v6374_v8 = vld [vmem:[%s9815_s2 + $0x108] sm:$0xff] }
 0x120   : > { %v1070_v16 = vpop.permute.xlu1 %1069 }
 0x121   : > { %6339 = vmatmul.mubr.msk.f32.gmra.mrb[4].mxu0 %vm430_vm8, %v6335_v13  ;;  %1473 = vrot.lane.b32.xlu1 %v1462_v14, %s9825_s19  ;;  %v1076_v19 = vsel %vm1075_vm12, %v1070_v16, %v1072_v7  ;;  %v6375_v7 = vld [vmem:[%s9815_s2 + $0x110] sm:$0xff]  ;;  %s9902_s19 = smov 32  }
 0x122   : > { %909 = vmatprep.mubr.f32.mxu0 %v9850_v2 }
 0x123   : > { %1599 = vperm.xlu0 %6991, %v1593_v22  }
 0x125   : > { %6340 = vmatmul.mubr.msk.f32.gmra.mrb[6].mxu0 %vm430_vm8, %v6336_v15  ;;  %1604 = vperm.xlu1 %6992, %v1594_v21  }
 0x126   : > { %1016 = vmatprep.mubr.f32.mxu0 %v9850_v2 }
 0x127   : > { %1614 = vperm.xlu0 %6991, %v1596_v27  }
 0x129   : > { %6345 = vmatmul.mubr.msk.f32.vlgmr.msra.gmra.mrb[0].mxu0 %vm430_vm8, %v6341_v18  ;;  %1609 = vperm.xlu1 %6992, %v1595_v26  }
 0x12a   : > { %1093 = vmatpush1.msra.mxu0 %v1076_v19  ;;  %1022 = vmatprep.mubr.f32.mxu0 %v9850_v2 }
 0x12d   : > { %6346 = vmatmul.mubr.msk.f32.gmra.mrb[2].mxu0 %vm430_vm8, %v6342_v20 }
 0x12e   : > { %1028 = vmatprep.mubr.f32.mxu0 %v9850_v2 }
 0x131   : > { %6347 = vmatmul.mubr.msk.f32.gmra.mrb[4].mxu0 %vm430_vm8, %v6343_v24 }
 0x132   : > { %1034 = vmatprep.mubr.f32.mxu0 %v9850_v2 }
 0x135   : > { %6348 = vmatmul.mubr.msk.f32.gmra.mrb[6].mxu0 %vm430_vm8, %v6344_v28 }
 0x136   : > { %1156 = vmatprep.mubr.f32.mxu0 %v9850_v2 }
 0x139   : > { %6353 = vmatmul.mubr.msk.f32.vlgmr.msra.gmra.mrb[0].mxu0 %vm430_vm8, %v6349_v29 }
 0x13a   : > { %1162 = vmatprep.mubr.f32.mxu0 %v9850_v2 }
 0x13d   : > { %6354 = vmatmul.mubr.msk.f32.gmra.mrb[2].mxu0 %vm430_vm8, %v6350_v30 }
 0x13e   : > { %1168 = vmatprep.mubr.f32.mxu0 %v9850_v2 }
 0x141   : > { %6355 = vmatmul.mubr.msk.f32.gmra.mrb[4].mxu0 %vm430_vm8, %v6351_v31 }
 0x142   : > { %1174 = vmatprep.mubr.f32.mxu0 %v9850_v2 }
 0x145   : > { %6356 = vmatmul.mubr.msk.f32.gmra.mrb[6].mxu0 %vm430_vm8, %v6352_v32 }
 0x146   : > { %1296 = vmatprep.mubr.f32.mxu0 %v9850_v2 }
 0x17d   : > { %v1210_v33 = vpop.permute.xlu0 %1209 }
 0x17e   : > { %v1214_v34 = vpop.permute.xlu1 %1213 }
 0x181   : > { %v1212_v35 = vpop.permute.xlu0 %1211 }
 0x182   : > { %v422_v36 = vpop.permute.xlu1 %421  ;;  %v1217_v37 = vsel %vm9835_vm13, %v1212_v35, %v1214_v34  ;;  %v1216_v38 = vsel %vm9835_vm13, %v1210_v33, %v1212_v35 }
 0x183   : > { %1232 = vmatprep.subr.mxu0 %v1217_v37 }
 0x184   : > { %1233 = vmatpush1.msra.mxu0 %v1216_v38 }
 0x185   : > { %6361 = vmatmul.mubr.msk.f32.vlgmr.msra.gmra.mrb[0].mxu0 %vm430_vm8, %v6357_v39  ;;  %v424_v40 = vpop.permute.xlu0 %423 }
 0x186   : > { %v420_v41 = vpop.permute.xlu1 %419  ;;  %v427_v42 = vsel %vm425_vm14, %v422_v36, %v424_v40  ;;  %1302 = vmatprep.mubr.f32.mxu0 %v9850_v2 }
 0x187   : > { %443 = vmatprep.subr.mxu1 %v427_v42  ;;  %v426_v44 = vsel %vm425_vm14, %v420_v41, %v422_v36 }
 0x188   : > { %444 = vmatpush1.msra.mxu1 %v426_v44 }
 0x189   : > { %6316 = vmatmul.mubr.msk.f32.vlgmr.msra.gmra.mrb[0].mxu1 %vm430_vm8, %v6312_v43  ;;  %544 = vmatprep.subr.mxu1 %v405_v45  ;;  %v1337_v48 = vpop.permute.xlu0 %1336 }
 0x18a   : > { %6362 = vmatmul.mubr.msk.f32.gmra.mrb[2].mxu0 %vm430_vm8, %v6358_v46  ;;  %v1339_v49 = vpop.permute.xlu1 %1338  ;;  %545 = vmatpush1.msra.mxu1 %v404_v47 }
 0x18b   : > { %513 = vmatprep.mubr.f32.mxu1 %v9850_v2  ;;  %1308 = vmatprep.mubr.f32.mxu0 %v9850_v2  ;;  %v1342_v23 = vsel %vm9834_vm15, %v1337_v48, %v1339_v49 }
 0x18c   : > { %1357 = vmatprep.subr.mxu0 %v1342_v23 }
 0x18d   : > { %6317 = vmatmul.mubr.msk.f32.gmra.mrb[2].mxu1 %vm430_vm8, %v6313_v12  ;;  %v1335_v17 = vpop.permute.xlu0 %1334 }
 0x18e   : > { %6363 = vmatmul.mubr.msk.f32.gmra.mrb[4].mxu0 %vm430_vm8, %v6359_v11  ;;  %v1341_v50 = vsel %vm9834_vm15, %v1335_v17, %v1337_v48  ;;  %519 = vmatprep.mubr.f32.mxu1 %v9850_v2 }
 0x18f   : > { %v1476_v52 = vpop.permute.xlu1 %1475  ;;  %1358 = vmatpush1.msra.mxu0 %v1341_v50  ;;  %1314 = vmatprep.mubr.f32.mxu0 %v9850_v2 }
 0x191   : > { %6318 = vmatmul.mubr.msk.f32.gmra.mrb[4].mxu1 %vm430_vm8, %v6314_v51  ;;  %v1478_v54 = vpop.permute.xlu0 %1477 }
 0x192   : > { %6364 = vmatmul.mubr.msk.f32.gmra.mrb[6].mxu0 %vm430_vm8, %v6360_v53  ;;  %v1481_v55 = vsel %vm9833_vm1, %v1476_v52, %v1478_v54  ;;  %525 = vmatprep.mubr.f32.mxu1 %v9850_v2 }
 0x193   : > { %v1474_v57 = vpop.permute.xlu1 %1473  ;;  %1496 = vmatprep.subr.mxu0 %v1481_v55  ;;  %6757 = vmatprep.subr.mxu1 %v1481_v55 }
 0x194   : > { %v1480_v59 = vsel %vm9833_vm1, %v1474_v57, %v1476_v52  ;;  %1421 = vmatprep.mubr.f32.mxu0 %v9850_v2 }
 0x195   : > { %6319 = vmatmul.mubr.msk.f32.gmra.mrb[6].mxu1 %vm430_vm8, %v6315_v56 }
 0x196   : > { %6369 = vmatmul.mubr.msk.f32.vlgmr.msra.gmra.mrb[0].mxu0 %vm430_vm8, %v6365_v58  ;;  %608 = vmatprep.mubr.f32.mxu1 %v9850_v2 }
 0x197   : > { %1497 = vmatpush1.msra.mxu0 %v1480_v59  ;;  %1427 = vmatprep.mubr.f32.mxu0 %v9850_v2 }
 0x199   : > { %6320 = vmatmul.mubr.msk.f32.vlgmr.msra.gmra.mrb[0].mxu1 %vm430_vm8, %v406_v60 }
 0x19a   : > { %6370 = vmatmul.mubr.msk.f32.gmra.mrb[2].mxu0 %vm430_vm8, %v6366_v61  ;;  %6758 = vmatpush1.msra.mxu1 %v1480_v59 }
 0x19b   : > { %614 = vmatprep.mubr.f32.mxu1 %v9850_v2  ;;  %1433 = vmatprep.mubr.f32.mxu0 %v9850_v2 }
 0x19d   : > { %6321 = vmatmul.mubr.msk.f32.gmra.mrb[2].mxu1 %vm430_vm8, %v407_v62 }
 0x19e   : > { %6371 = vmatmul.mubr.msk.f32.gmra.mrb[4].mxu0 %vm430_vm8, %v6367_v63  ;;  %620 = vmatprep.mubr.f32.mxu1 %v9850_v2 }
 0x19f   : > { %1439 = vmatprep.mubr.f32.mxu0 %v9850_v2 }
 0x1a1   : > { %6322 = vmatmul.mubr.msk.f32.gmra.mrb[4].mxu1 %vm430_vm8, %v408_v0 }
 0x1a2   : > { %6372 = vmatmul.mubr.msk.f32.gmra.mrb[6].mxu0 %vm430_vm8, %v6368_v1  ;;  %626 = vmatprep.mubr.f32.mxu1 %v9850_v2  ;;  %v1600_v35 = vpop.permute.xlu0 %1599 }
 0x1a3   : > { %1560 = vmatprep.mubr.f32.mxu0 %v9850_v2 }
 0x1a4   : > { %v1605_v26 = vpop.permute.xlu1 %1604 }
 0x1a5   : > { %6323 = vmatmul.mubr.msk.f32.gmra.mrb[6].mxu1 %vm430_vm8, %v409_v3 }
 0x1a6   : > { %6377 = vmatmul.mubr.msk.f32.vlgmr.msra.gmra.mrb[0].mxu0 %vm430_vm8, %v6373_v6  ;;  %1572 = vmatprep.mubr.f32.mxu1 %v9850_v2  ;;  %v1615_v55 = vpop.permute.xlu0 %1614 }
 0x1a7   : > { %1566 = vmatprep.mubr.f32.mxu0 %v9850_v2 }
 0x1a8   : > { %v1610_v40 = vpop.permute.xlu1 %1609 }
 0x1a9   : > { %6379 = vmatmul.mubr.msk.f32.vlgmr.msra.gmra.mrb[8].mxu1 %vm430_vm8, %v6375_v7  ;;  %v6393_v7 = vld [vmem:[%s9814_s1 + $0x4] sm:$0x3] }
 0x1aa   : > { %6378 = vmatmul.mubr.msk.f32.gmra.mrb[2].mxu0 %vm430_vm8, %v6374_v8  ;;  %1578 = vmatprep.mubr.f32.mxu1 %v9850_v2 }
 0x1ab   : > { %3522 = vmatprep.mubr.f32.mxu0 %v9850_v2 }
 0x1ad   : > { %6380 = vmatmul.mubr.msk.f32.gmra.mrb[10].mxu1 %vm430_vm8, %v6376_v9 }
 0x1ae   : > { %1871 = vmatprep.mubr.f32.mxu1 %v9850_v2 }
 0x26c   : > { %v610_v10 = vpop.f32.mrb[0].mxu1 }
 0x26d   : > { %v612_v13 = vpop.f32.mrb[1].mxu1 }
 0x270   : > { %v616_v14 = vpop.f32.mrb[2].mxu1 }
 0x271   : > { %v1435_v15 = vpop.f32.mrb[4].mxu0  ;;  %v618_v16 = vpop.f32.mrb[3].mxu1 }
 0x272   : > { %v1437_v18 = vpop.f32.mrb[5].mxu0 }
 0x274   : > { %v622_v19 = vpop.f32.mrb[4].mxu1 }
 0x275   : > { %v6763_v20 = vadd.f32 %v1435_v15, %v622_v19  ;;  %v1441_v21 = vpop.f32.mrb[6].mxu0  ;;  %v624_v22 = vpop.f32.mrb[5].mxu1 }
 0x276   : > { %v6765_v24 = vadd.f32 %v1437_v18, %v624_v22  ;;  %v1443_v25 = vpop.f32.mrb[7].mxu0 }
 0x278   : > { %v628_v27 = vpop.f32.mrb[6].mxu1 }
 0x279   : > { %v6767_v28 = vadd.f32 %v1441_v21, %v628_v27  ;;  %v1562_v29 = vpop.f32.mrb[0].mxu0  ;;  %v630_v30 = vpop.f32.mrb[7].mxu1 }
 0x27a   : > { %v6759_v31 = vadd.f32 %v1562_v29, %v610_v10  ;;  %v6769_v32 = vadd.f32 %v1443_v25, %v630_v30  ;;  %v1564_v33 = vpop.f32.mrb[1].mxu0  ;;  %v8146_v10 = vrot.slane %v6393_v7, %v7822_v4 }
 0x27b   : > { %v6760_v34 = vadd.f32 %v1564_v33, %v612_v13  ;;  %v8150_v13 = vrot.slane %v6393_v7, %v7824_v5 }
 0x27c   : > { %v1574_v36 = vpop.f32.mrb[8].mxu1  ;;  %v1617_v44 = vadd.f32 %v6759_v31, %v1600_v35 }
 0x27d   : > { %v1568_v37 = vpop.f32.mrb[2].mxu0  ;;  %v6764_v38 = vadd.f32 %v6763_v20, %v1574_v36  ;;  %v1576_v39 = vpop.f32.mrb[9].mxu1  ;;  %v1618_v47 = vadd.f32 %v6760_v34, %v1600_v35 }
 0x27e   : > { %v6761_v41 = vadd.f32 %v1568_v37, %v616_v14  ;;  %v1570_v42 = vpop.f32.mrb[3].mxu0  ;;  %v6766_v43 = vadd.f32 %v6765_v24, %v1576_v39  ;;  %v1633_v53 = vmul.f32 0.01, %v1617_v44  ;;  %vm1625_vm1 = vcmp.gt.f32.partialorder %v1617_v44, 0.0  ;;  %v1710_v14 = vld [vmem:[%s9814_s1] sm:$0x3] }
 0x27f   : > { %v1621_v45 = vadd.f32 %v6764_v38, %v1610_v40  ;;  %v6762_v46 = vadd.f32 %v1570_v42, %v618_v16  ;;  %v1634_v57 = vmul.f32 0.01, %v1618_v47  ;;  %vm1626_vm15 = vcmp.gt.f32.partialorder %v1618_v47, 0.0 }
 0x280   : > { %v1622_v48 = vadd.f32 %v6766_v43, %v1610_v40  ;;  %v1580_v49 = vpop.f32.mrb[10].mxu1  ;;  %v1619_v51 = vadd.f32 %v6761_v41, %v1605_v26  ;;  %v1641_v59 = vsel %vm1625_vm1, %v1617_v44, %v1633_v53  ;;  %v8158_v15 = vrot.slane %v1710_v14, %v7822_v4 }
 0x281   : > { %v6768_v12 = vadd.f32 %v6767_v28, %v1580_v49  ;;  %v1582_v23 = vpop.f32.mrb[11].mxu1  ;;  %vm1629_vm3 = vcmp.gt.f32.partialorder %v1621_v45, 0.0  ;;  %v1637_v11 = vmul.f32 0.01, %v1621_v45  ;;  %v1620_v54 = vadd.f32 %v6762_v46, %v1605_v26 }
 0x282   : > { %v6770_v17 = vadd.f32 %v6769_v32, %v1582_v23  ;;  %vm1630_vm8 = vcmp.gt.f32.partialorder %v1622_v48, 0.0  ;;  %v1638_v50 = vmul.f32 0.01, %v1622_v48  ;;  %v1635_v60 = vmul.f32 0.01, %v1619_v51 }
 0x283   : > { %v1645_v52 = vsel %vm1629_vm3, %v1621_v45, %v1637_v11  ;;  %v1623_v58 = vadd.f32 %v6768_v12, %v1615_v55  ;;  %v1642_v62 = vsel %vm1626_vm15, %v1618_v47, %v1634_v57  ;;  %vm1627_vm13 = vcmp.gt.f32.partialorder %v1619_v51, 0.0 }
 0x284   : > { %1665 = vrot.lane.b32.xlu1 %v1645_v52, %s7723_s21  ;;  %v1646_v56 = vsel %vm1630_vm8, %v1622_v48, %v1638_v50  ;;  %v1624_v61 = vadd.f32 %v6770_v17, %v1615_v55  ;;  %v1636_v63 = vmul.f32 0.01, %v1620_v54  ;;  %vm1628_vm3 = vcmp.gt.f32.partialorder %v1620_v54, 0.0 }
 0x285   : > { %1667 = vrot.lane.b32.xlu0 %v1646_v56, %s7723_s21  ;;  %v1643_v0 = vsel %vm1627_vm13, %v1619_v51, %v1635_v60  ;;  %v1639_v1 = vmul.f32 0.01, %v1623_v58  ;;  %vm1631_vm8 = vcmp.gt.f32.partialorder %v1623_v58, 0.0  ;;  %v8163_v16 = vrot.slane %v1710_v14, %v7824_v5 }
 0x286   : > { %v1644_v3 = vsel %vm1628_vm3, %v1620_v54, %v1636_v63  ;;  %v1640_v6 = vmul.f32 0.01, %v1624_v61  ;;  %vm1632_vm1 = vcmp.gt.f32.partialorder %v1624_v61, 0.0  ;;  %vm1689_vm13 = vcmask 1047688  }
 0x287   : > { %v1647_v8 = vsel %vm1631_vm8, %v1623_v58, %v1639_v1  ;;  %vm9856_vm15 = vcmask 785408  }
 0x288   : > { %1657 = vrot.lane.b32.xlu1 %v1641_v59, %s7723_s21  ;;  %v1648_v9 = vsel %vm1632_vm1, %v1624_v61, %v1640_v6  ;;  %vm9857_vm3 = vmmov %vm9856_vm15 }
 0x289   : > { %1659 = vrot.lane.b32.xlu0 %v1642_v62, %s7723_s21  ;;  %vm9858_vm8 = vmmov %vm9857_vm3 }
 0x28a   : > { %vm9859_vm1 = vmmov %vm9857_vm3 }
 0x28c   : > { %1661 = vrot.lane.b32.xlu1 %v1643_v0, %s7723_s21 }
 0x28d   : > { %1663 = vrot.lane.b32.xlu0 %v1644_v3, %s7723_s21 }
 0x290   : > { %1669 = vrot.lane.b32.xlu1 %v1647_v8, %s7723_s21 }
 0x291   : > { %1671 = vrot.lane.b32.xlu0 %v1648_v9, %s7723_s21 }
 0x294   : > { %2007 = vrot.lane.b32.xlu1 %v8146_v10, %s7724_s22 }
 0x295   : > { %2009 = vrot.lane.b32.xlu0 %v8150_v13, %s7724_s22 }
 0x298   : > { %2193 = vrot.lane.b32.xlu1 %v8158_v15, %s7725_s25 }
 0x299   : > { %2195 = vrot.lane.b32.xlu0 %v8163_v16, %s7725_s25 }
 0x2f6   : > { %v1666_v18 = vpop.permute.xlu1 %1665 }
 0x2f7   : > { %1696 = vst.msk [vmem:[#allocation2 + $0x30] sm:$0xff] %vm1689_vm13, %v1666_v18  ;;  %v1668_v19 = vpop.permute.xlu0 %1667 }
 0x2f8   : > { %1698 = vst.msk [vmem:[#allocation2 + $0x40] sm:$0xff] %vm380_vm2, %v1668_v19  ;;  %v8212_v39 = vsel %vm380_vm2, %v1666_v18, %v1668_v19 }
 0x2fa   : > { %v1658_v20 = vpop.permute.xlu1 %1657 }
 0x2fb   : > { %1690 = vst.msk [vmem:[#allocation2] sm:$0xff] %vm1689_vm13, %v1658_v20  ;;  %v1660_v21 = vpop.permute.xlu0 %1659 }
 0x2fc   : > { %1692 = vst.msk [vmem:[#allocation2 + $0x10] sm:$0xff] %vm380_vm2, %v1660_v21  ;;  %v8176_v26 = vsel %vm380_vm2, %v1658_v20, %v1660_v21 }
 0x2fe   : > { %v1662_v22 = vpop.permute.xlu1 %1661  ;;  %v8234_v46 = vld [vmem:[#allocation2 + $0x30] sm:$0xff] }
 0x2ff   : > { %1693 = vst.msk [vmem:[#allocation2 + $0x18] sm:$0xff] %vm1689_vm13, %v1662_v22  ;;  %v1664_v24 = vpop.permute.xlu0 %1663  ;;  %v8205_v36 = vld [vmem:[#allocation2 + $0x40] sm:$0xff] }
 0x300   : > { %1695 = vst.msk [vmem:[#allocation2 + $0x28] sm:$0xff] %vm380_vm2, %v1664_v24  ;;  %v8193_v32 = vsel %vm380_vm2, %v1662_v22, %v1664_v24  ;;  %v8221_v42 = vpack.i.bf16 %v8205_v36, %v8212_v39 }
 0x302   : > { %v1670_v25 = vpop.permute.xlu1 %1669  ;;  %v8188_v30 = vld [vmem:[#allocation2] sm:$0xff] }
 0x303   : > { %1699 = vst.msk [vmem:[#allocation2 + $0x48] sm:$0xff] %vm1689_vm13, %v1670_v25  ;;  %v1672_v27 = vpop.permute.xlu0 %1671  ;;  %v8179_v28 = vld [vmem:[#allocation2 + $0x10] sm:$0xff] }
 0x304   : > { %1701 = vst.msk [vmem:[#allocation2 + $0x58] sm:$0xff] %vm380_vm2, %v1672_v27  ;;  %v8184_v29 = vpack.i.bf16 %v8179_v28, %v8176_v26  ;;  %v8215_v40 = vsel %vm380_vm2, %v1670_v25, %v1672_v27 }
 0x306   : > { %6994 = vrot.lane.b32.xlu1 %v8184_v29, %s9844_s15  ;;  %v8190_v31 = vld [vmem:[#allocation2 + $0x18] sm:$0xff]  ;;  %v2008_v37 = vpop.permute.xlu1 %2007 }
 0x307   : > { %v8197_v33 = vpack.i.bf16 %v8190_v31, %v8188_v30  ;;  %v8199_v34 = vld [vmem:[#allocation2 + $0x28] sm:$0xff]  ;;  %v2010_v38 = vpop.permute.xlu0 %2009  ;;  %v2015_v23 = vmul.f32 %v2008_v37, %v8188_v30  ;;  %v2018_v11 = vmul.f32 %v2008_v37, %v8190_v31  ;;  %v2021_v1 = vmul.f32 %v2008_v37, %v8234_v46 }
 0x308   : > { %v8203_v35 = vpack.i.bf16 %v8199_v34, %v8193_v32  ;;  %v2011_v45 = vsel %vm648_vm4, %v2008_v37, %v2010_v38  ;;  %v2017_v49 = vmul.f32 %v2010_v38, %v8179_v28  ;;  %v2020_v50 = vmul.f32 %v2010_v38, %v8199_v34 }
 0x309   : > { %v2016_v48 = vmul.f32 %v2011_v45, %v8176_v26  ;;  %v2019_v17 = vmul.f32 %v2011_v45, %v8193_v32  ;;  %v7028_v53 = vpack.i.bf16 %v2018_v11, %v2015_v23  ;;  %v2022_v55 = vmul.f32 %v2011_v45, %v8212_v39 }
 0x30a   : > { %6999 = vrot.lane.b32.xlu1 %v8197_v33, %s9844_s15  ;;  %7004 = vrot.lane.b32.xlu0 %v8203_v35, %s9844_s15  ;;  %v8227_v44 = vld [vmem:[#allocation2 + $0x48] sm:$0xff]  ;;  %v2194_v51 = vpop.permute.xlu1 %2193  ;;  %v2023_v56 = vmul.f32 %v2010_v38, %v8205_v36  ;;  %v2025_v59 = vmul.f32 %v2011_v45, %v8215_v40 }
 0x30b   : > { %v8217_v41 = vld [vmem:[#allocation2 + $0x58] sm:$0xff]  ;;  %v8238_v47 = vpack.i.bf16 %v8227_v44, %v8234_v46  ;;  %v7023_v12 = vpack.i.bf16 %v2017_v49, %v2016_v48  ;;  %v2196_v52 = vpop.permute.xlu0 %2195  ;;  %v7033_v54 = vpack.i.bf16 %v2020_v50, %v2019_v17  ;;  %v2024_v60 = vmul.f32 %v2008_v37, %v8227_v44 }
 0x30c   : > { %v8225_v43 = vpack.i.bf16 %v8217_v41, %v8215_v40  ;;  %v2026_v57 = vmul.f32 %v2010_v38, %v8217_v41  ;;  %v2197_v58 = vsel %vm788_vm5, %v2194_v51, %v2196_v52  ;;  %v7038_v61 = vpack.i.bf16 %v2023_v56, %v2022_v55 }
 0x30d   : > { %v2202_v63 = vmul.f32 %v2197_v58, %v8176_v26  ;;  %v2203_v0 = vmul.f32 %v2196_v52, %v8179_v28  ;;  %v7048_v3 = vpack.i.bf16 %v2024_v60, %v2021_v1  ;;  %v2205_v6 = vmul.f32 %v2197_v58, %v8193_v32 }
 0x30e   : > { %7009 = vrot.lane.b32.xlu0 %v8221_v42, %s9844_s15  ;;  %7014 = vrot.lane.b32.xlu1 %v8225_v43, %s9844_s15  ;;  %v7043_v62 = vpack.i.bf16 %v2026_v57, %v2025_v59  ;;  %v2206_v8 = vmul.f32 %v2196_v52, %v8199_v34  ;;  %v2201_v9 = vmul.f32 %v2194_v51, %v8188_v30 }
 0x30f   : > { %v7053_v7 = vpack.i.bf16 %v2203_v0, %v2202_v63  ;;  %v2204_v14 = vmul.f32 %v2194_v51, %v8190_v31  ;;  %v2208_v18 = vmul.f32 %v2197_v58, %v8212_v39  ;;  %v2209_v19 = vmul.f32 %v2196_v52, %v8205_v36 }
 0x310   : > { %v7063_v20 = vpack.i.bf16 %v2206_v8, %v2205_v6  ;;  %v2211_v22 = vmul.f32 %v2197_v58, %v8215_v40  ;;  %v2212_v24 = vmul.f32 %v2196_v52, %v8217_v41  ;;  %v2207_v37 = vmul.f32 %v2194_v51, %v8234_v46 }
 0x311   : > { %v7058_v21 = vpack.i.bf16 %v2204_v14, %v2201_v9  ;;  %v7068_v25 = vpack.i.bf16 %v2209_v19, %v2208_v18  ;;  %v2210_v38 = vmul.f32 %v2194_v51, %v8227_v44  ;;  %v1725_v9 = vmul.f32 %v8163_v16, %v8193_v32 }
 0x312   : > { %7019 = vrot.lane.b32.xlu0 %v8238_v47, %s9844_s15  ;;  %2533 = vrot.lane.b32.xlu1 %v8146_v10, %s9848_s26  ;;  %v7073_v27 = vpack.i.bf16 %v2212_v24, %v2211_v22  ;;  %v1723_v19 = vmul.f32 %v8163_v16, %v8176_v26 }
 0x313   : > { %v7078_v45 = vpack.i.bf16 %v2210_v38, %v2207_v37 }
 0x316   : > { %2535 = vrot.lane.b32.xlu0 %v8150_v13, %s9848_s26  ;;  %7024 = vrot.lane.b32.xlu1 %v7023_v12, %s9842_s27 }
 0x31a   : > { %2719 = vrot.lane.b32.xlu0 %v8158_v15, %s9846_s28  ;;  %2721 = vrot.lane.b32.xlu1 %v8163_v16, %s9846_s28 }
 0x31e   : > { %7034 = vrot.lane.b32.xlu0 %v7033_v54, %s9842_s27  ;;  %7029 = vrot.lane.b32.xlu1 %v7028_v53, %s9842_s27 }
 0x322   : > { %7039 = vrot.lane.b32.xlu0 %v7038_v61, %s9842_s27  ;;  %7044 = vrot.lane.b32.xlu1 %v7043_v62, %s9842_s27 }
 0x326   : > { %7049 = vrot.lane.b32.xlu0 %v7048_v3, %s9842_s27  ;;  %7054 = vrot.lane.b32.xlu1 %v7053_v7, %s9840_s29 }
 0x32a   : > { %7064 = vrot.lane.b32.xlu0 %v7063_v20, %s9840_s29  ;;  %7059 = vrot.lane.b32.xlu1 %v7058_v21, %s9840_s29  ;;  %v1729_v20 = vmul.f32 %v8163_v16, %v8215_v40 }
 0x32e   : > { %7069 = vrot.lane.b32.xlu0 %v7068_v25, %s9840_s29  ;;  %7074 = vrot.lane.b32.xlu1 %v7073_v27, %s9840_s29  ;;  %v1727_v25 = vmul.f32 %v8163_v16, %v8212_v39  ;;  %v6549_v27 = vpack.c.bf16 %v1725_v9, %v1723_v19  ;;  %v1722_v16 = vmul.f32 %v8158_v15, %v8188_v30 }
 0x332   : > { %7079 = vrot.lane.b32.xlu0 %v7078_v45, %s9840_s29  ;;  %7084 = vrot.lane.b32.xlu1 %v8184_v29, %s9838_s30  ;;  %v1724_v45 = vmul.f32 %v8158_v15, %v8190_v31  ;;  %s9877_s29 = smov 112  }
 0x336   : > { %7089 = vrot.lane.b32.xlu0 %v8203_v35, %s9838_s30  ;;  %7094 = vrot.lane.b32.xlu1 %v8197_v33, %s9838_s30 }
 0x33a   : > { %3059 = vrot.lane.b32.xlu0 %v8146_v10, %s9836_s11  ;;  %3061 = vrot.lane.b32.xlu1 %v8150_v13, %s9836_s11  ;;  %s9878_s11 = smov 111  }
 0x33e   : > { %7099 = vrot.lane.b32.xlu0 %v8221_v42, %s9838_s30  ;;  %7104 = vrot.lane.b32.xlu1 %v8225_v43, %s9838_s30 }
 0x342   : > { %7109 = vrot.lane.b32.xlu0 %v8238_v47, %s9838_s30 }
 0x378   : > { %v6995_v48 = vpop.permute.xlu1 %6994 }
 0x379   : > { %v6997_v49 = vunpack.i.h.bf16 %v6995_v48  ;;  %v6996_v12 = vunpack.i.l.bf16 %v6995_v48  ;;  %v6381_v48 = vld [vmem:[%s9817_s4 + $0x20] sm:$0xff] }
 0x37b   : > { %v1780_v53 = vsel %vm425_vm14, %v6996_v12, %v6997_v49 }
 0x37c   : > { %v7000_v23 = vpop.permute.xlu1 %6999  ;;  %v7005_v11 = vpop.permute.xlu0 %7004 }
 0x37d   : > { %v7002_v17 = vunpack.i.h.bf16 %v7000_v23  ;;  %v7001_v50 = vunpack.i.l.bf16 %v7000_v23  ;;  %v7007_v10 = vunpack.i.h.bf16 %v7005_v11  ;;  %v7006_v51 = vunpack.i.l.bf16 %v7005_v11 }
 0x37e   : > { %v6553_v11 = vpack.c.bf16 %v1729_v20, %v1727_v25 }
 0x37f   : > { %v1779_v13 = vsel %vm425_vm14, %v7001_v50, %v6996_v12  ;;  %v1781_v52 = vsel %vm425_vm14, %v7002_v17, %v7006_v51  ;;  %v1782_v54 = vsel %vm425_vm14, %v7006_v51, %v7007_v10 }
 0x380   : > { %v7015_v55 = vpop.permute.xlu1 %7014  ;;  %v7010_v56 = vpop.permute.xlu0 %7009  ;;  %v6541_v57 = vpack.c.bf16 %v1782_v54, %v1780_v53  ;;  %v6543_v58 = vpack.c.bf16 %v1781_v52, %v1779_v13 }
 0x381   : > { %v7017_v59 = vunpack.i.h.bf16 %v7015_v55  ;;  %v7016_v60 = vunpack.i.l.bf16 %v7015_v55  ;;  %v7012_v61 = vunpack.i.h.bf16 %v7010_v56  ;;  %v7011_v62 = vunpack.i.l.bf16 %v7010_v56 }
 0x382   : > { %6542 = vmatprep.subr.bf16.mxu1 %v6541_v57  ;;  %v6551_v55 = vpack.c.bf16 %v1724_v45, %v1722_v16  ;;  %v1728_v56 = vmul.f32 %v8158_v15, %v8227_v44 }
 0x383   : > { %6544 = vmatpush1.bf16.msra.mxu1 %v6543_v58  ;;  %v1784_v63 = vsel %vm425_vm14, %v7011_v62, %v7012_v61  ;;  %v1786_v0 = vsel %vm425_vm14, %v7016_v60, %v7017_v59  ;;  %v6382_v61 = vld [vmem:[%s9817_s4 + $0x28] sm:$0xff] }
 0x384   : > { %v2534_v1 = vpop.permute.xlu1 %2533  ;;  %v7020_v3 = vpop.permute.xlu0 %7019  ;;  %v6545_v6 = vpack.c.bf16 %v1786_v0, %v1784_v63  ;;  %v1726_v0 = vmul.f32 %v8158_v15, %v8234_v46  ;;  %v6383_v15 = vld [vmem:[%s9817_s4 + $0x30] sm:$0xff] }
 0x385   : > { %v7022_v7 = vunpack.i.h.bf16 %v7020_v3  ;;  %v7021_v8 = vunpack.i.l.bf16 %v7020_v3  ;;  %v2541_v17 = vmul.f32 %v2534_v1, %v8188_v30  ;;  %v2544_v50 = vmul.f32 %v2534_v1, %v8190_v31 }
 0x386   : > { %6546 = vmatprep.subr.bf16.mxu1 %v6545_v6  ;;  %v2547_v57 = vmul.f32 %v2534_v1, %v8234_v46  ;;  %v2550_v58 = vmul.f32 %v2534_v1, %v8227_v44 }
 0x387   : > { %v1785_v14 = vsel %vm425_vm14, %v7022_v7, %v7016_v60  ;;  %v1783_v18 = vsel %vm425_vm14, %v7021_v8, %v7011_v62  ;;  %v7118_v7 = vpack.i.bf16 %v2544_v50, %v2541_v17  ;;  %v6384_v50 = vld [vmem:[%s9817_s4 + $0x38] sm:$0xff] }
 0x388   : > { %v8317_v21 = vpop.permute.xlu1 %7024  ;;  %v2536_v22 = vpop.permute.xlu0 %2535  ;;  %v6547_v24 = vpack.c.bf16 %v1785_v14, %v1783_v18  ;;  %v6555_v18 = vpack.c.bf16 %v1728_v56, %v1726_v0  ;;  %v7138_v19 = vpack.i.bf16 %v2550_v58, %v2547_v57 }
 0x389   : > { %v2537_v37 = vsel %vm1053_vm6, %v2534_v1, %v2536_v22  ;;  %v2546_v38 = vmul.f32 %v2536_v22, %v8199_v34  ;;  %v2543_v23 = vmul.f32 %v2536_v22, %v8179_v28  ;;  %v2549_v54 = vmul.f32 %v2536_v22, %v8205_v36 }
 0x38a   : > { %6548 = vmatpush1.bf16.msra.mxu1 %v6547_v24  ;;  %v2545_v49 = vmul.f32 %v2537_v37, %v8193_v32  ;;  %v2542_v12 = vmul.f32 %v2537_v37, %v8176_v26  ;;  %v2548_v53 = vmul.f32 %v2537_v37, %v8212_v39  ;;  %v7027_v59 = vunpack.i.h.bf16 %v8317_v21 }
 0x38b   : > { %6550 = vmatprep.subr.bf16.mxu1 %v6549_v27  ;;  %v7026_v60 = vunpack.i.l.bf16 %v8317_v21  ;;  %v2551_v62 = vmul.f32 %v2537_v37, %v8215_v40  ;;  %v2552_v63 = vmul.f32 %v2536_v22, %v8217_v41 }
 0x38c   : > { %v8335_v10 = vpop.permute.xlu1 %2721  ;;  %v8337_v51 = vpop.permute.xlu0 %2719  ;;  %v7123_v13 = vpack.i.bf16 %v2546_v38, %v2545_v49  ;;  %v7113_v52 = vpack.i.bf16 %v2543_v23, %v2542_v12  ;;  %v7128_v6 = vpack.i.bf16 %v2549_v54, %v2548_v53 }
 0x38d   : > { %6385 = vmatmul.mubr.msk.f32.vlgmr.msra.gmra.mrb[12].mxu1 %vm1193_vm9, %v6381_v48  ;;  %v2723_v8 = vsel %vm1193_vm9, %v8337_v51, %v8335_v10  ;;  %v7133_v20 = vpack.i.bf16 %v2552_v63, %v2551_v62  ;;  %v2069_v21 = vsel %vm670_vm7, %v7026_v60, %v7027_v59  ;;  %v2732_v22 = vmul.f32 %v8335_v10, %v8199_v34 }
 0x38e   : > { %7124 = vrot.lane.b32.xlu0 %v7123_v13, %s9852_s18  ;;  %7114 = vrot.lane.b32.xlu1 %v7113_v52, %s9852_s18  ;;  %v2731_v25 = vmul.f32 %v2723_v8, %v8193_v32  ;;  %v2728_v27 = vmul.f32 %v2723_v8, %v8176_v26  ;;  %v2729_v12 = vmul.f32 %v8335_v10, %v8179_v28 }
 0x38f   : > { %6552 = vmatpush1.bf16.msra.mxu1 %v6551_v55  ;;  %1877 = vmatprep.mubr.f32.mxu1 %v9850_v2  ;;  %v2734_v13 = vmul.f32 %v2723_v8, %v8212_v39  ;;  %v2735_v52 = vmul.f32 %v8335_v10, %v8205_v36  ;;  %v2727_v53 = vmul.f32 %v8337_v51, %v8188_v30 }
 0x390   : > { %6554 = vmatprep.subr.bf16.mxu1 %v6553_v11  ;;  %v7030_v1 = vpop.permute.xlu1 %7029  ;;  %v7035_v3 = vpop.permute.xlu0 %7034  ;;  %v2730_v54 = vmul.f32 %v8337_v51, %v8190_v31  ;;  %v7153_v59 = vpack.i.bf16 %v2732_v22, %v2731_v25  ;;  %v2737_v22 = vmul.f32 %v2723_v8, %v8215_v40 }
 0x391   : > { %v7037_v9 = vunpack.i.h.bf16 %v7035_v3  ;;  %v7036_v14 = vunpack.i.l.bf16 %v7035_v3  ;;  %6386 = vmatmul.mubr.msk.f32.gmra.mrb[14].mxu1 %vm1193_vm9, %v6382_v61  ;;  %v7032_v37 = vunpack.i.h.bf16 %v7030_v1  ;;  %v7031_v38 = vunpack.i.l.bf16 %v7030_v1 }
 0x392   : > { %7129 = vrot.lane.b32.xlu0 %v7128_v6, %s9852_s18  ;;  %7119 = vrot.lane.b32.xlu1 %v7118_v7, %s9852_s18  ;;  %v7143_v61 = vpack.i.bf16 %v2729_v12, %v2728_v27  ;;  %v7158_v3 = vpack.i.bf16 %v2735_v52, %v2734_v13  ;;  %v2733_v6 = vmul.f32 %v8337_v51, %v8234_v46 }
 0x393   : > { %6556 = vmatpush1.bf16.msra.mxu1 %v6555_v18  ;;  %1883 = vmatprep.mubr.f32.mxu1 %v9850_v2  ;;  %v2071_v24 = vsel %vm670_vm7, %v7036_v14, %v7037_v9  ;;  %v2068_v55 = vsel %vm670_vm7, %v7031_v38, %v7026_v60  ;;  %v2070_v56 = vsel %vm670_vm7, %v7032_v37, %v7036_v14  ;;  %v1730_v60 = vld [vmem:[%s9817_s4] sm:$0xff] }
 0x394   : > { %v7045_v45 = vpop.permute.xlu1 %7044  ;;  %v7040_v48 = vpop.permute.xlu0 %7039  ;;  %v6557_v49 = vpack.c.bf16 %v2071_v24, %v2069_v21  ;;  %v7148_v14 = vpack.i.bf16 %v2730_v54, %v2727_v53  ;;  %v2736_v18 = vmul.f32 %v8337_v51, %v8227_v44  ;;  %v2738_v24 = vmul.f32 %v8335_v10, %v8217_v41  ;;  %v1731_v51 = vld [vmem:[%s9817_s4 + $0x8] sm:$0xff] }
 0x395   : > { %v7047_v23 = vunpack.i.h.bf16 %v7045_v45  ;;  %v7046_v16 = vunpack.i.l.bf16 %v7045_v45  ;;  %v7042_v11 = vunpack.i.h.bf16 %v7040_v48  ;;  %v7041_v17 = vunpack.i.l.bf16 %v7040_v48  ;;  %6387 = vmatmul.mubr.msk.f32.gmra.mrb[16].mxu1 %vm1193_vm9, %v6383_v15 }
 0x396   : > { %7139 = vrot.lane.b32.xlu0 %v7138_v19, %s9852_s18  ;;  %7134 = vrot.lane.b32.xlu1 %v7133_v20, %s9852_s18  ;;  %v6559_v20 = vpack.c.bf16 %v2070_v56, %v2068_v55  ;;  %v7168_v12 = vpack.i.bf16 %v2736_v18, %v2733_v6 }
 0x397   : > { %6558 = vmatprep.subr.bf16.mxu1 %v6557_v49  ;;  %1889 = vmatprep.mubr.f32.mxu1 %v9850_v2  ;;  %v2073_v0 = vsel %vm670_vm7, %v7041_v17, %v7042_v11  ;;  %v2075_v1 = vsel %vm670_vm7, %v7046_v16, %v7047_v23  ;;  %v1732_v11 = vld [vmem:[%s9817_s4 + $0x10] sm:$0xff] }
 0x398   : > { %v8392_v57 = vpop.permute.xlu1 %7054  ;;  %v7050_v58 = vpop.permute.xlu0 %7049  ;;  %v6561_v21 = vpack.c.bf16 %v2075_v1, %v2073_v0 }
 0x399   : > { %v7052_v62 = vunpack.i.h.bf16 %v7050_v58  ;;  %v7051_v63 = vunpack.i.l.bf16 %v7050_v58  ;;  %6388 = vmatmul.mubr.msk.f32.gmra.mrb[18].mxu1 %vm1193_vm9, %v6384_v50  ;;  %v7057_v7 = vunpack.i.h.bf16 %v8392_v57  ;;  %v7056_v9 = vunpack.i.l.bf16 %v8392_v57  ;;  %v1733_v57 = vld [vmem:[%s9817_s4 + $0x18] sm:$0xff] }
 0x39a   : > { %7154 = vrot.lane.b32.xlu0 %v7153_v59, %s9853_s20  ;;  %7144 = vrot.lane.b32.xlu1 %v7143_v61, %s9853_s20 }
 0x39b   : > { %1972 = vmatprep.mubr.f32.mxu1 %v9850_v2  ;;  %v2074_v25 = vsel %vm670_vm7, %v7052_v62, %v7046_v16  ;;  %v2072_v27 = vsel %vm670_vm7, %v7051_v63, %v7041_v17  ;;  %v2255_v10 = vsel %vm810_vm10, %v7056_v9, %v7057_v7  ;;  %v7163_v16 = vpack.i.bf16 %v2738_v24, %v2737_v22 }
 0x39c   : > { %v7060_v19 = vpop.permute.xlu1 %7059  ;;  %v7065_v15 = vpop.permute.xlu0 %7064  ;;  %v6563_v49 = vpack.c.bf16 %v2074_v25, %v2072_v27 }
 0x39d   : > { %v7067_v37 = vunpack.i.h.bf16 %v7065_v15  ;;  %v7066_v38 = vunpack.i.l.bf16 %v7065_v15  ;;  %6389 = vmatmul.mubr.msk.f32.vlgmr.msra.gmra.mrb[12].mxu1 %vm1193_vm9, %v1730_v60  ;;  %v7062_v13 = vunpack.i.h.bf16 %v7060_v19  ;;  %v7061_v52 = vunpack.i.l.bf16 %v7060_v19 }
 0x39e   : > { %6560 = vmatpush1.bf16.msra.mxu1 %v6559_v20  ;;  %7159 = vrot.lane.b32.xlu0 %v7158_v3, %s9853_s20 }
 0x39f   : > { %7149 = vrot.lane.b32.xlu1 %v7148_v14, %s9853_s20  ;;  %6562 = vmatprep.subr.bf16.mxu1 %v6561_v21  ;;  %v2257_v8 = vsel %vm810_vm10, %v7066_v38, %v7067_v37  ;;  %v2254_v63 = vsel %vm810_vm10, %v7061_v52, %v7056_v9  ;;  %v2256_v0 = vsel %vm810_vm10, %v7062_v13, %v7066_v38 }
 0x3a0   : > { %v7075_v45 = vpop.permute.xlu1 %7074  ;;  %v7070_v48 = vpop.permute.xlu0 %7069  ;;  %1978 = vmatprep.mubr.f32.mxu1 %v9850_v2  ;;  %v6565_v23 = vpack.c.bf16 %v2257_v8, %v2255_v10  ;;  %v6567_v19 = vpack.c.bf16 %v2256_v0, %v2254_v63  ;;  %v6396_v8 = vld [vmem:[%s9817_s4 + $0x50] sm:$0xff] }
 0x3a1   : > { %6390 = vmatmul.mubr.msk.f32.gmra.mrb[14].mxu1 %vm1193_vm9, %v1731_v51  ;;  %v7077_v53 = vunpack.i.h.bf16 %v7075_v45  ;;  %v7076_v54 = vunpack.i.l.bf16 %v7075_v45  ;;  %v7072_v55 = vunpack.i.h.bf16 %v7070_v48  ;;  %v7071_v56 = vunpack.i.l.bf16 %v7070_v48 }
 0x3a2   : > { %6564 = vmatpush1.bf16.msra.mxu1 %v6563_v49  ;;  %7169 = vrot.lane.b32.xlu0 %v7168_v12, %s9853_s20 }
 0x3a3   : > { %7164 = vrot.lane.b32.xlu1 %v7163_v16, %s9853_s20  ;;  %6566 = vmatprep.subr.bf16.mxu1 %v6565_v23  ;;  %v2259_v60 = vsel %vm810_vm10, %v7071_v56, %v7072_v55  ;;  %v2261_v3 = vsel %vm810_vm10, %v7076_v54, %v7077_v53  ;;  %v6402_v55 = vld [vmem:[%s9817_s4 + $0x60] sm:$0xff] }
 0x3a4   : > { %v8429_v17 = vpop.permute.xlu1 %7084  ;;  %v7080_v50 = vpop.permute.xlu0 %7079  ;;  %1984 = vmatprep.mubr.f32.mxu1 %v9850_v2  ;;  %v6569_v20 = vpack.c.bf16 %v2261_v3, %v2259_v60  ;;  %v3247_v60 = vld [vmem:[%s9818_s5 + $0x10] sm:$0xff] }
 0x3a5   : > { %6391 = vmatmul.mubr.msk.f32.gmra.mrb[16].mxu1 %vm1193_vm9, %v1732_v11  ;;  %v7082_v58 = vunpack.i.h.bf16 %v7080_v50  ;;  %v7081_v59 = vunpack.i.l.bf16 %v7080_v50  ;;  %v7087_v6 = vunpack.i.h.bf16 %v8429_v17  ;;  %v7086_v7 = vunpack.i.l.bf16 %v8429_v17  ;;  %v6404_v3 = vld [vmem:[%s9817_s4 + $0x70] sm:$0xff] }
 0x3a6   : > { %7179 = vrot.lane.b32.xlu0 %v8203_v35, %s9854_s12  ;;  %1990 = vmatprep.mubr.f32.mxu1 %v9850_v2 }
 0x3a7   : > { %7174 = vrot.lane.b32.xlu1 %v8184_v29, %s9854_s12  ;;  %v6394_v29 = vld [vmem:[%s9817_s4 + $0x40] sm:$0xff]  ;;  %v2260_v9 = vsel %vm810_vm10, %v7082_v58, %v7076_v54  ;;  %v3246_v58 = vld [vmem:[%s9818_s5 + $0x8] sm:$0xff] }
 0x3a8   : > { %v8441_v61 = vpop.permute.xlu1 %7094  ;;  %v8443_v62 = vpop.permute.xlu0 %7089 }
 0x3a9   : > { %6392 = vmatmul.mubr.msk.f32.gmra.mrb[18].mxu1 %vm1193_vm9, %v1733_v57  ;;  %v7092_v35 = vunpack.i.h.bf16 %v8443_v62  ;;  %v7091_v1 = vunpack.i.l.bf16 %v8443_v62  ;;  %v7097_v48 = vunpack.i.h.bf16 %v8441_v61 }
 0x3aa   : > { %7189 = vrot.lane.b32.xlu0 %v8221_v42, %s9854_s12  ;;  %2160 = vmatprep.mubr.f32.mxu1 %v9850_v2  ;;  %v2258_v42 = vsel %vm810_vm10, %v7081_v59, %v7071_v56 }
 0x3ab   : > { %7184 = vrot.lane.b32.xlu1 %v8197_v33, %s9854_s12  ;;  %v6395_v33 = vld [vmem:[%s9817_s4 + $0x48] sm:$0xff]  ;;  %v2411_v27 = vsel %vm935_vm11, %v7091_v1, %v7092_v35 }
 0x3ac   : > { %v3062_v14 = vpop.permute.xlu1 %3061  ;;  %v3060_v18 = vpop.permute.xlu0 %3059  ;;  %v6403_v35 = vld [vmem:[%s9817_s4 + $0x68] sm:$0xff] }
 0x3ad   : > { %v3063_v15 = vsel %vm362_vm0, %v3060_v18, %v3062_v14  ;;  %6398 = vmatmul.mubr.msk.f32.vlgmr.msra.gmra.mrb[12].mxu1 %vm1193_vm9, %v6394_v29  ;;  %v3072_v21 = vmul.f32 %v3062_v14, %v8199_v34  ;;  %v3069_v22 = vmul.f32 %v3062_v14, %v8179_v28  ;;  %v6571_v28 = vpack.c.bf16 %v2260_v9, %v2258_v42  ;;  %v6411_v9 = vld [vmem:[%s9817_s4 + $0x88] sm:$0xff]  ;;  %v6412_v42 = vld [vmem:[%s9817_s4 + $0x90] sm:$0xff] }
 0x3ae   : > { %6568 = vmatpush1.bf16.msra.mxu1 %v6567_v19  ;;  %7199 = vrot.lane.b32.xlu0 %v8238_v47, %s9854_s12  ;;  %v3071_v24 = vmul.f32 %v3063_v15, %v8193_v32  ;;  %v3068_v25 = vmul.f32 %v3063_v15, %v8176_v26  ;;  %v2409_v34 = vsel %vm935_vm11, %v7086_v7, %v7087_v6  ;;  %v6405_v6 = vld [vmem:[%s9817_s4 + $0x78] sm:$0xff] }
 0x3af   : > { %7194 = vrot.lane.b32.xlu1 %v8225_v43, %s9854_s12  ;;  %6570 = vmatprep.subr.bf16.mxu1 %v6569_v20  ;;  %v3074_v32 = vmul.f32 %v3063_v15, %v8212_v39  ;;  %v3075_v26 = vmul.f32 %v3062_v14, %v8205_v36  ;;  %v6573_v51 = vpack.c.bf16 %v2411_v27, %v2409_v34  ;;  %v7096_v36 = vunpack.i.l.bf16 %v8441_v61  ;;  %v3245_v61 = vld [vmem:[%s9818_s5] sm:$0xff] }
 0x3b0   : > { %v7100_v47 = vpop.permute.xlu0 %7099  ;;  %2166 = vmatprep.mubr.f32.mxu1 %v9850_v2  ;;  %v7213_v37 = vpack.i.bf16 %v3072_v21, %v3071_v24  ;;  %v7203_v38 = vpack.i.bf16 %v3069_v22, %v3068_v25  ;;  %v3067_v10 = vmul.f32 %v3060_v18, %v8188_v30  ;;  %v3070_v43 = vmul.f32 %v3060_v18, %v8190_v31  ;;  %v7105_v45 = vpop.permute.xlu1 %7104 }
 0x3b1   : > { %6399 = vmatmul.mubr.msk.f32.gmra.mrb[14].mxu1 %vm1193_vm9, %v6395_v33  ;;  %v7218_v39 = vpack.i.bf16 %v3075_v26, %v3074_v32  ;;  %v3073_v30 = vmul.f32 %v3060_v18, %v8234_v46  ;;  %v3076_v31 = vmul.f32 %v3060_v18, %v8227_v44  ;;  %v3077_v12 = vmul.f32 %v3063_v15, %v8215_v40  ;;  %v6397_v44 = vld [vmem:[%s9817_s4 + $0x58] sm:$0xff] }
 0x3b2   : > { %6572 = vmatpush1.bf16.msra.mxu1 %v6571_v28  ;;  %7214 = vrot.lane.b32.xlu0 %v7213_v37, %s9855_s16  ;;  %v7208_v49 = vpack.i.bf16 %v3070_v43, %v3067_v10  ;;  %v3078_v23 = vmul.f32 %v3062_v14, %v8217_v41  ;;  %v7107_v16 = vunpack.i.h.bf16 %v7105_v45  ;;  %v7106_v11 = vunpack.i.l.bf16 %v7105_v45  ;;  %v6413_v14 = vld [vmem:[%s9817_s4 + $0x98] sm:$0xff] }
 0x3b3   : > { %7204 = vrot.lane.b32.xlu1 %v7203_v38, %s9855_s16  ;;  %6574 = vmatprep.subr.bf16.mxu1 %v6573_v51  ;;  %v7102_v17 = vunpack.i.h.bf16 %v7100_v47  ;;  %v7101_v50 = vunpack.i.l.bf16 %v7100_v47  ;;  %v2408_v46 = vsel %vm935_vm11, %v7096_v36, %v7086_v7  ;;  %v7228_v40 = vpack.i.bf16 %v3076_v31, %v3073_v30  ;;  %v6410_v7 = vld [vmem:[%s9817_s4 + $0x80] sm:$0xff] }
 0x3b4   : > { %2172 = vmatprep.mubr.f32.mxu1 %v9850_v2  ;;  %v7110_v13 = vpop.permute.xlu0 %7109  ;;  %v2410_v41 = vsel %vm935_vm11, %v7097_v48, %v7091_v1  ;;  %v7223_v54 = vpack.i.bf16 %v3078_v23, %v3077_v12  ;;  %v2415_v57 = vsel %vm935_vm11, %v7106_v11, %v7107_v16  ;;  %v3248_v1 = vld [vmem:[%s9818_s5 + $0x18] sm:$0xff] }
 0x3b5   : > { %6400 = vmatmul.mubr.msk.f32.gmra.mrb[16].mxu1 %vm1193_vm9, %v6396_v8  ;;  %v7112_v52 = vunpack.i.h.bf16 %v7110_v13  ;;  %v7111_v53 = vunpack.i.l.bf16 %v7110_v13  ;;  %v2413_v56 = vsel %vm935_vm11, %v7101_v50, %v7102_v17  ;;  %v6575_v59 = vpack.c.bf16 %v2410_v41, %v2408_v46  ;;  %v6418_v46 = vld [vmem:[%s9817_s4 + $0xa0] sm:$0xff] }
 0x3b6   : > { %7219 = vrot.lane.b32.xlu0 %v7218_v39, %s9855_s16  ;;  %2178 = vmatprep.mubr.f32.mxu1 %v9850_v2  ;;  %v6577_v0 = vpack.c.bf16 %v2415_v57, %v2413_v56  ;;  %v6419_v57 = vld [vmem:[%s9817_s4 + $0xa8] sm:$0xff] }
 0x3b7   : > { %7209 = vrot.lane.b32.xlu1 %v7208_v49, %s9855_s16  ;;  %v2414_v62 = vsel %vm935_vm11, %v7112_v52, %v7106_v11  ;;  %v2412_v63 = vsel %vm935_vm11, %v7111_v53, %v7101_v50 }
 0x3b8   : > { %v6579_v29 = vpack.c.bf16 %v2414_v62, %v2412_v63 }
 0x3b9   : > { %6401 = vmatmul.mubr.msk.f32.gmra.mrb[18].mxu1 %vm1193_vm9, %v6397_v44 }
 0x3ba   : > { %7229 = vrot.lane.b32.xlu0 %v7228_v40, %s9855_s16  ;;  %2346 = vmatprep.mubr.f32.mxu1 %v9850_v2 }
 0x3bb   : > { %7224 = vrot.lane.b32.xlu1 %v7223_v54, %s9855_s16 }
 0x3bd   : > { %6406 = vmatmul.mubr.msk.f32.vlgmr.msra.gmra.mrb[12].mxu1 %vm1193_vm9, %v6402_v55 }
 0x3be   : > { %6576 = vmatpush1.bf16.msra.mxu1 %v6575_v59  ;;  %3256 = vperm.xlu0 %6991, %v3246_v58  }
 0x3bf   : > { %3251 = vperm.xlu1 %6992, %v3245_v61   ;;  %6578 = vmatprep.subr.bf16.mxu1 %v6577_v0 }
 0x3c0   : > { %2352 = vmatprep.mubr.f32.mxu1 %v9850_v2 }
 0x3c1   : > { %6407 = vmatmul.mubr.msk.f32.gmra.mrb[14].mxu1 %vm1193_vm9, %v6403_v35 }
 0x3c2   : > { %6580 = vmatpush1.bf16.msra.mxu1 %v6579_v29  ;;  %3266 = vperm.xlu0 %6991, %v3248_v1  }
 0x3c3   : > { %3261 = vperm.xlu1 %6992, %v3247_v60   ;;  %2358 = vmatprep.mubr.f32.mxu1 %v9850_v2 }
 0x3c5   : > { %6408 = vmatmul.mubr.msk.f32.gmra.mrb[16].mxu1 %vm1193_vm9, %v6404_v3 }
 0x3c6   : > { %2364 = vmatprep.mubr.f32.mxu1 %v9850_v2 }
 0x3c9   : > { %6409 = vmatmul.mubr.msk.f32.gmra.mrb[18].mxu1 %vm1193_vm9, %v6405_v6 }
 0x3ca   : > { %2500 = vmatprep.mubr.f32.mxu1 %v9850_v2 }
 0x3cd   : > { %6414 = vmatmul.mubr.msk.f32.vlgmr.msra.gmra.mrb[12].mxu1 %vm1193_vm9, %v6410_v7  ;;  %v6420_v7 = vld [vmem:[%s9817_s4 + $0xb0] sm:$0xff] }
 0x3ce   : > { %2506 = vmatprep.mubr.f32.mxu1 %v9850_v2 }
 0x3d1   : > { %6415 = vmatmul.mubr.msk.f32.gmra.mrb[14].mxu1 %vm1193_vm9, %v6411_v9 }
 0x3d2   : > { %2512 = vmatprep.mubr.f32.mxu1 %v9850_v2 }
 0x3d5   : > { %6416 = vmatmul.mubr.msk.f32.gmra.mrb[16].mxu1 %vm1193_vm9, %v6412_v42 }
 0x3d6   : > { %2518 = vmatprep.mubr.f32.mxu1 %v9850_v2 }
 0x3d9   : > { %6417 = vmatmul.mubr.msk.f32.gmra.mrb[18].mxu1 %vm1193_vm9, %v6413_v14 }
 0x3da   : > { %2686 = vmatprep.mubr.f32.mxu1 %v9850_v2 }
 0x400   : > { %v7115_v18 = vpop.permute.xlu1 %7114  ;;  %v7125_v19 = vpop.permute.xlu0 %7124 }
 0x401   : > { %v7117_v15 = vunpack.i.h.bf16 %v7115_v18  ;;  %v7116_v20 = vunpack.i.l.bf16 %v7115_v18  ;;  %v7127_v21 = vunpack.i.h.bf16 %v7125_v19  ;;  %v7126_v22 = vunpack.i.l.bf16 %v7125_v19 }
 0x403   : > { %v2595_v33 = vsel %vm1075_vm12, %v7116_v20, %v7117_v15  ;;  %v2597_v24 = vsel %vm1075_vm12, %v7126_v22, %v7127_v21 }
 0x404   : > { %v7120_v25 = vpop.permute.xlu1 %7119  ;;  %v7130_v27 = vpop.permute.xlu0 %7129  ;;  %v6581_v28 = vpack.c.bf16 %v2597_v24, %v2595_v33 }
 0x405   : > { %v7122_v34 = vunpack.i.h.bf16 %v7120_v25  ;;  %v7121_v47 = vunpack.i.l.bf16 %v7120_v25  ;;  %v7132_v32 = vunpack.i.h.bf16 %v7130_v27  ;;  %v7131_v26 = vunpack.i.l.bf16 %v7130_v27  ;;  %v6421_v25 = vld [vmem:[%s9817_s4 + $0xb8] sm:$0xff] }
 0x406   : > { %6582 = vmatprep.subr.bf16.mxu1 %v6581_v28 }
 0x407   : > { %v2594_v37 = vsel %vm1075_vm12, %v7121_v47, %v7116_v20  ;;  %v2596_v38 = vsel %vm1075_vm12, %v7122_v34, %v7126_v22  ;;  %v2599_v48 = vsel %vm1075_vm12, %v7131_v26, %v7132_v32 }
 0x408   : > { %v7135_v51 = vpop.permute.xlu1 %7134  ;;  %v7140_v10 = vpop.permute.xlu0 %7139  ;;  %v6583_v43 = vpack.c.bf16 %v2596_v38, %v2594_v37 }
 0x409   : > { %v7137_v8 = vunpack.i.h.bf16 %v7135_v51  ;;  %v7136_v45 = vunpack.i.l.bf16 %v7135_v51  ;;  %v7142_v36 = vunpack.i.h.bf16 %v7140_v10  ;;  %v7141_v39 = vunpack.i.l.bf16 %v7140_v10 }
 0x40a   : > { %6584 = vmatpush1.bf16.msra.mxu1 %v6583_v43 }
 0x40b   : > { %v2600_v30 = vsel %vm1075_vm12, %v7142_v36, %v7136_v45  ;;  %v2598_v31 = vsel %vm1075_vm12, %v7141_v39, %v7131_v26  ;;  %v2601_v49 = vsel %vm1075_vm12, %v7136_v45, %v7137_v8  ;;  %v6426_v26 = vld [vmem:[%s9817_s4 + $0xc0] sm:$0xff] }
 0x40c   : > { %v7145_v12 = vpop.permute.xlu1 %7144  ;;  %v7155_v23 = vpop.permute.xlu0 %7154  ;;  %v6585_v16 = vpack.c.bf16 %v2601_v49, %v2599_v48  ;;  %v6587_v11 = vpack.c.bf16 %v2600_v30, %v2598_v31 }
 0x40d   : > { %v7147_v17 = vunpack.i.h.bf16 %v7145_v12  ;;  %v7146_v50 = vunpack.i.l.bf16 %v7145_v12  ;;  %v7157_v13 = vunpack.i.h.bf16 %v7155_v23  ;;  %v7156_v44 = vunpack.i.l.bf16 %v7155_v23  ;;  %v6427_v23 = vld [vmem:[%s9817_s4 + $0xc8] sm:$0xff] }
 0x40e   : > { %6586 = vmatprep.subr.bf16.mxu1 %v6585_v16 }
 0x40f   : > { %6588 = vmatpush1.bf16.msra.mxu1 %v6587_v11  ;;  %v2781_v40 = vsel %vm9856_vm15, %v7146_v50, %v7147_v17  ;;  %v2783_v41 = vsel %vm9857_vm3, %v7156_v44, %v7157_v13  ;;  %vm9860_vm15 = vmmov %vm9859_vm1 }
 0x410   : > { %v7160_v52 = vpop.permute.xlu0 %7159  ;;  %v6589_v53 = vpack.c.bf16 %v2783_v41, %v2781_v40  ;;  %vm9861_vm3 = vmmov %vm9859_vm1 }
 0x411   : > { %v7150_v54 = vpop.permute.xlu1 %7149  ;;  %v7162_v61 = vunpack.i.h.bf16 %v7160_v52  ;;  %v7161_v62 = vunpack.i.l.bf16 %v7160_v52 }
 0x412   : > { %v7152_v55 = vunpack.i.h.bf16 %v7150_v54  ;;  %v7151_v56 = vunpack.i.l.bf16 %v7150_v54  ;;  %6422 = vmatmul.mubr.msk.f32.vlgmr.msra.gmra.mrb[12].mxu1 %vm1193_vm9, %v6418_v46  ;;  %6590 = vmatprep.subr.bf16.mxu1 %v6589_v53  ;;  %v6428_v54 = vld [vmem:[%s9817_s4 + $0xd0] sm:$0xff] }
 0x413   : > { %2692 = vmatprep.mubr.f32.mxu1 %v9850_v2 }
 0x414   : > { %v2780_v58 = vsel %vm9858_vm8, %v7151_v56, %v7146_v50  ;;  %v2782_v59 = vsel %vm9859_vm1, %v7152_v55, %v7156_v44  ;;  %v7170_v63 = vpop.permute.xlu0 %7169  ;;  %vm9862_vm8 = vmmov %vm9859_vm1 }
 0x415   : > { %v7165_v0 = vpop.permute.xlu1 %7164  ;;  %v7172_v35 = vunpack.i.h.bf16 %v7170_v63  ;;  %v7171_v1 = vunpack.i.l.bf16 %v7170_v63  ;;  %v6591_v29 = vpack.c.bf16 %v2782_v59, %v2780_v58  ;;  %v2785_v14 = vsel %vm9862_vm8, %v7161_v62, %v7162_v61  ;;  %v6429_v63 = vld [vmem:[%s9817_s4 + $0xd8] sm:$0xff] }
 0x416   : > { %v7167_v60 = vunpack.i.h.bf16 %v7165_v0  ;;  %v7166_v3 = vunpack.i.l.bf16 %v7165_v0  ;;  %6423 = vmatmul.mubr.msk.f32.gmra.mrb[14].mxu1 %vm1193_vm9, %v6419_v57 }
 0x417   : > { %v2784_v6 = vsel %vm9860_vm15, %v7171_v1, %v7161_v62  ;;  %6592 = vmatpush1.bf16.msra.mxu1 %v6591_v29  ;;  %2698 = vmatprep.mubr.f32.mxu1 %v9850_v2  ;;  %vm9863_vm15 = vcmask 777216  }
 0x418   : > { %v2786_v9 = vsel %vm9861_vm3, %v7172_v35, %v7166_v3  ;;  %v7180_v42 = vpop.permute.xlu0 %7179  ;;  %v2787_v18 = vsel %vm9859_vm1, %v7166_v3, %v7167_v60  ;;  %vm9864_vm3 = vmmov %vm9863_vm15 }
 0x419   : > { %v7175_v19 = vpop.permute.xlu1 %7174  ;;  %v7182_v15 = vunpack.i.h.bf16 %v7180_v42  ;;  %v7181_v20 = vunpack.i.l.bf16 %v7180_v42  ;;  %v6593_v21 = vpack.c.bf16 %v2787_v18, %v2785_v14  ;;  %v6595_v22 = vpack.c.bf16 %v2786_v9, %v2784_v6  ;;  %vm9865_vm8 = vmmov %vm9864_vm3  ;;  %v6434_v14 = vld [vmem:[%s9817_s4 + $0xe0] sm:$0xff] }
 0x41a   : > { %v7177_v33 = vunpack.i.h.bf16 %v7175_v19  ;;  %v7176_v24 = vunpack.i.l.bf16 %v7175_v19  ;;  %6424 = vmatmul.mubr.msk.f32.gmra.mrb[16].mxu1 %vm1193_vm9, %v6420_v7  ;;  %vm9866_vm1 = vmmov %vm9864_vm3 }
 0x41b   : > { %6594 = vmatprep.subr.bf16.mxu1 %v6593_v21  ;;  %2704 = vmatprep.mubr.f32.mxu1 %v9850_v2  ;;  %v2937_v27 = vsel %vm9863_vm15, %v7181_v20, %v7182_v15  ;;  %vm9867_vm15 = vmmov %vm9866_vm1 }
 0x41c   : > { %6596 = vmatpush1.bf16.msra.mxu1 %v6595_v22  ;;  %v7190_v28 = vpop.permute.xlu0 %7189  ;;  %v2935_v34 = vsel %vm9864_vm3, %v7176_v24, %v7177_v33  ;;  %vm9868_vm3 = vmmov %vm9866_vm1  ;;  %v6435_v33 = vld [vmem:[%s9817_s4 + $0xe8] sm:$0xff] }
 0x41d   : > { %v7185_v47 = vpop.permute.xlu1 %7184  ;;  %v6597_v37 = vpack.c.bf16 %v2937_v27, %v2935_v34  ;;  %v7192_v43 = vunpack.i.h.bf16 %v7190_v28  ;;  %v7191_v8 = vunpack.i.l.bf16 %v7190_v28  ;;  %v6437_v27 = vld [vmem:[%s9817_s4 + $0xf8] sm:$0xff]  ;;  %v6442_v28 = vld [vmem:[%s9817_s4 + $0x100] sm:$0xff]  ;;  %v6443_v34 = vld [vmem:[%s9817_s4 + $0x108] sm:$0xff] }
 0x41e   : > { %v7187_v38 = vunpack.i.h.bf16 %v7185_v47  ;;  %v7186_v32 = vunpack.i.l.bf16 %v7185_v47  ;;  %6425 = vmatmul.mubr.msk.f32.gmra.mrb[18].mxu1 %vm1193_vm9, %v6421_v25  ;;  %v6436_v25 = vld [vmem:[%s9817_s4 + $0xf0] sm:$0xff] }
 0x41f   : > { %6598 = vmatprep.subr.bf16.mxu1 %v6597_v37  ;;  %2872 = vmatprep.mubr.f32.mxu1 %v9850_v2  ;;  %v6444_v47 = vld [vmem:[%s9817_s4 + $0x110] sm:$0xff]  ;;  %v6445_v37 = vld [vmem:[%s9817_s4 + $0x118] sm:$0xff] }
 0x420   : > { %v2934_v51 = vsel %vm9865_vm8, %v7186_v32, %v7176_v24  ;;  %v2936_v10 = vsel %vm9866_vm1, %v7187_v38, %v7181_v20  ;;  %v7200_v45 = vpop.permute.xlu0 %7199  ;;  %vm9869_vm8 = vmmov %vm9866_vm1 }
 0x421   : > { %v7195_v36 = vpop.permute.xlu1 %7194  ;;  %v7202_v39 = vunpack.i.h.bf16 %v7200_v45  ;;  %v7201_v30 = vunpack.i.l.bf16 %v7200_v45  ;;  %v6599_v31 = vpack.c.bf16 %v2936_v10, %v2934_v51  ;;  %v2939_v17 = vsel %vm9869_vm8, %v7191_v8, %v7192_v43 }
 0x422   : > { %v7197_v48 = vunpack.i.h.bf16 %v7195_v36  ;;  %v7196_v49 = vunpack.i.l.bf16 %v7195_v36  ;;  %6430 = vmatmul.mubr.msk.f32.vlgmr.msra.gmra.mrb[12].mxu1 %vm1193_vm9, %v6426_v26 }
 0x423   : > { %v2938_v12 = vsel %vm9867_vm15, %v7201_v30, %v7191_v8  ;;  %6600 = vmatpush1.bf16.msra.mxu1 %v6599_v31  ;;  %2878 = vmatprep.mubr.f32.mxu1 %v9850_v2  ;;  %vm9870_vm15 = vcmask 769024  }
 0x424   : > { %v2940_v16 = vsel %vm9868_vm3, %v7202_v39, %v7196_v49  ;;  %v7215_v11 = vpop.permute.xlu0 %7214  ;;  %v2941_v50 = vsel %vm9866_vm1, %v7196_v49, %v7197_v48  ;;  %vm9871_vm3 = vmmov %vm9870_vm15 }
 0x425   : > { %v7205_v13 = vpop.permute.xlu1 %7204  ;;  %v7217_v44 = vunpack.i.h.bf16 %v7215_v11  ;;  %v7216_v46 = vunpack.i.l.bf16 %v7215_v11  ;;  %v6601_v40 = vpack.c.bf16 %v2941_v50, %v2939_v17  ;;  %v6603_v41 = vpack.c.bf16 %v2940_v16, %v2938_v12  ;;  %vm9872_vm8 = vmmov %vm9871_vm3 }
 0x426   : > { %v7207_v52 = vunpack.i.h.bf16 %v7205_v13  ;;  %v7206_v53 = vunpack.i.l.bf16 %v7205_v13  ;;  %6431 = vmatmul.mubr.msk.f32.gmra.mrb[14].mxu1 %vm1193_vm9, %v6427_v23  ;;  %vm9873_vm1 = vmmov %vm9871_vm3 }
 0x427   : > { %6602 = vmatprep.subr.bf16.mxu1 %v6601_v40  ;;  %2884 = vmatprep.mubr.f32.mxu1 %v9850_v2  ;;  %v3123_v55 = vsel %vm9870_vm15, %v7216_v46, %v7217_v44  ;;  %vm9874_vm15 = vmmov %vm9873_vm1 }
 0x428   : > { %6604 = vmatpush1.bf16.msra.mxu1 %v6603_v41  ;;  %v7220_v56 = vpop.permute.xlu0 %7219  ;;  %v3121_v57 = vsel %vm9871_vm3, %v7206_v53, %v7207_v52  ;;  %vm9875_vm3 = vmmov %vm9873_vm1 }
 0x429   : > { %v7210_v58 = vpop.permute.xlu1 %7209  ;;  %v6605_v59 = vpack.c.bf16 %v3123_v55, %v3121_v57  ;;  %v7222_v0 = vunpack.i.h.bf16 %v7220_v56  ;;  %v7221_v35 = vunpack.i.l.bf16 %v7220_v56 }
 0x42a   : > { %v7212_v61 = vunpack.i.h.bf16 %v7210_v58  ;;  %v7211_v62 = vunpack.i.l.bf16 %v7210_v58  ;;  %6432 = vmatmul.mubr.msk.f32.gmra.mrb[16].mxu1 %vm1193_vm9, %v6428_v54 }
 0x42b   : > { %6606 = vmatprep.subr.bf16.mxu1 %v6605_v59  ;;  %2890 = vmatprep.mubr.f32.mxu1 %v9850_v2  ;;  %v3125_v18 = vsel %vm9874_vm15, %v7221_v35, %v7222_v0 }
 0x42c   : > { %v7230_v1 = vpop.permute.xlu0 %7229  ;;  %v3120_v29 = vsel %vm9872_vm8, %v7211_v62, %v7206_v53  ;;  %v3122_v60 = vsel %vm9873_vm1, %v7212_v61, %v7216_v46  ;;  %vm9876_vm8 = vmmov %vm9873_vm1  ;;  %v6462_v61 = vld [vmem:[%s9814_s1 + $0x4] sm:$0x3] }
 0x42d   : > { %v7225_v3 = vpop.permute.xlu1 %7224  ;;  %v7232_v9 = vunpack.i.h.bf16 %v7230_v1  ;;  %v7231_v42 = vunpack.i.l.bf16 %v7230_v1  ;;  %v6607_v15 = vpack.c.bf16 %v3122_v60, %v3120_v29  ;;  %v8697_v1 = vrot.slane %v6462_v61, %v7824_v5  ;;  %v3361_v29 = vld [vmem:[%s9814_s1] sm:$0x3] }
 0x42e   : > { %v7227_v6 = vunpack.i.h.bf16 %v7225_v3  ;;  %v7226_v7 = vunpack.i.l.bf16 %v7225_v3  ;;  %6433 = vmatmul.mubr.msk.f32.gmra.mrb[18].mxu1 %vm1193_vm9, %v6429_v63  ;;  %v8705_v60 = vrot.slane %v3361_v29, %v7822_v4  ;;  %v8710_v3 = vrot.slane %v3361_v29, %v7824_v5 }
 0x42f   : > { %3026 = vmatprep.mubr.f32.mxu1 %v9850_v2  ;;  %v3124_v22 = vsel %vm9873_vm1, %v7231_v42, %v7221_v35  ;;  %v8693_v35 = vrot.slane %v6462_v61, %v7822_v4 }
 0x430   : > { %v3127_v19 = vsel %vm9875_vm3, %v7226_v7, %v7227_v6  ;;  %v3126_v21 = vsel %vm9876_vm8, %v7232_v9, %v7226_v7 }
 0x431   : > { %v6609_v20 = vpack.c.bf16 %v3127_v19, %v3125_v18  ;;  %v6611_v24 = vpack.c.bf16 %v3126_v21, %v3124_v22 }
 0x432   : > { %6438 = vmatmul.mubr.msk.f32.vlgmr.msra.gmra.mrb[12].mxu1 %vm1193_vm9, %v6434_v14 }
 0x433   : > { %6608 = vmatpush1.bf16.msra.mxu1 %v6607_v15  ;;  %3032 = vmatprep.mubr.f32.mxu1 %v9850_v2 }
 0x434   : > { %6610 = vmatprep.subr.bf16.mxu1 %v6609_v20 }
 0x436   : > { %6439 = vmatmul.mubr.msk.f32.gmra.mrb[14].mxu1 %vm1193_vm9, %v6435_v33 }
 0x437   : > { %6612 = vmatpush1.bf16.msra.mxu1 %v6611_v24  ;;  %3038 = vmatprep.mubr.f32.mxu1 %v9850_v2 }
 0x43a   : > { %6440 = vmatmul.mubr.msk.f32.gmra.mrb[16].mxu1 %vm1193_vm9, %v6436_v25 }
 0x43b   : > { %3044 = vmatprep.mubr.f32.mxu1 %v9850_v2 }
 0x43d   : > { %v3257_v8 = vpop.permute.xlu0 %3256 }
 0x43e   : > { %6441 = vmatmul.mubr.msk.f32.gmra.mrb[18].mxu1 %vm1193_vm9, %v6437_v27  ;;  %v3252_v38 = vpop.permute.xlu1 %3251 }
 0x43f   : > { %3212 = vmatprep.mubr.f32.mxu1 %v9850_v2 }
 0x441   : > { %v3267_v41 = vpop.permute.xlu0 %3266 }
 0x442   : > { %6446 = vmatmul.mubr.msk.f32.vlgmr.msra.gmra.mrb[12].mxu1 %vm1193_vm9, %v6442_v28  ;;  %v3262_v23 = vpop.permute.xlu1 %3261 }
 0x443   : > { %3218 = vmatprep.mubr.f32.mxu1 %v9850_v2 }
 0x446   : > { %6447 = vmatmul.mubr.msk.f32.gmra.mrb[14].mxu1 %vm1193_vm9, %v6443_v34 }
 0x447   : > { %3224 = vmatprep.mubr.f32.mxu1 %v9850_v2 }
 0x44a   : > { %6448 = vmatmul.mubr.msk.f32.gmra.mrb[16].mxu1 %vm1193_vm9, %v6444_v47 }
 0x44b   : > { %3230 = vmatprep.mubr.f32.mxu1 %v9850_v2 }
 0x44e   : > { %6449 = vmatmul.mubr.msk.f32.gmra.mrb[18].mxu1 %vm1193_vm9, %v6445_v37 }
 0x44f   : > { %5158 = vmatprep.mubr.f32.mxu1 %v9850_v2 }
 0x515   : > { %v3214_v32 = vpop.f32.mrb[12].mxu1 }
 0x516   : > { %v3269_v26 = vadd.f32 %v3252_v38, %v3214_v32  ;;  %v3216_v51 = vpop.f32.mrb[13].mxu1 }
 0x517   : > { %v3270_v10 = vadd.f32 %v3252_v38, %v3216_v51 }
 0x518   : > { %vm3277_vm15 = vcmp.gt.f32.partialorder %v3269_v26, 0.0  ;;  %v3285_v43 = vmul.f32 0.01, %v3269_v26 }
 0x519   : > { %vm3278_vm3 = vcmp.gt.f32.partialorder %v3270_v10, 0.0  ;;  %v3286_v45 = vmul.f32 0.01, %v3270_v10  ;;  %v3220_v36 = vpop.f32.mrb[14].mxu1 }
 0x51a   : > { %v3271_v39 = vadd.f32 %v3257_v8, %v3220_v36  ;;  %v3222_v30 = vpop.f32.mrb[15].mxu1  ;;  %v3293_v31 = vsel %vm3277_vm15, %v3269_v26, %v3285_v43 }
 0x51b   : > { %v3272_v48 = vadd.f32 %v3257_v8, %v3222_v30  ;;  %3309 = vrot.lane.b32.xlu1 %v3293_v31, %s7723_s21  ;;  %v3294_v49 = vsel %vm3278_vm3, %v3270_v10, %v3286_v45 }
 0x51c   : > { %vm3279_vm8 = vcmp.gt.f32.partialorder %v3271_v39, 0.0  ;;  %v3287_v12 = vmul.f32 0.01, %v3271_v39  ;;  %3311 = vrot.lane.b32.xlu0 %v3294_v49, %s7723_s21 }
 0x51d   : > { %vm3280_vm1 = vcmp.gt.f32.partialorder %v3272_v48, 0.0  ;;  %v3288_v16 = vmul.f32 0.01, %v3272_v48  ;;  %v3226_v11 = vpop.f32.mrb[16].mxu1 }
 0x51e   : > { %v3273_v17 = vadd.f32 %v3262_v23, %v3226_v11  ;;  %v3228_v50 = vpop.f32.mrb[17].mxu1  ;;  %v3295_v13 = vsel %vm3279_vm8, %v3271_v39, %v3287_v12 }
 0x51f   : > { %v3274_v44 = vadd.f32 %v3262_v23, %v3228_v50  ;;  %3313 = vrot.lane.b32.xlu1 %v3295_v13, %s7723_s21  ;;  %v3296_v46 = vsel %vm3280_vm1, %v3272_v48, %v3288_v16 }
 0x520   : > { %vm3281_vm15 = vcmp.gt.f32.partialorder %v3273_v17, 0.0  ;;  %v3289_v40 = vmul.f32 0.01, %v3273_v17  ;;  %3315 = vrot.lane.b32.xlu0 %v3296_v46, %s7723_s21 }
 0x521   : > { %vm3282_vm3 = vcmp.gt.f32.partialorder %v3274_v44, 0.0  ;;  %v3290_v52 = vmul.f32 0.01, %v3274_v44  ;;  %v3232_v53 = vpop.f32.mrb[18].mxu1 }
 0x522   : > { %v3275_v54 = vadd.f32 %v3267_v41, %v3232_v53  ;;  %v3234_v55 = vpop.f32.mrb[19].mxu1  ;;  %v3297_v56 = vsel %vm3281_vm15, %v3273_v17, %v3289_v40  ;;  %vm9880_vm15 = vcmask 785408  }
 0x523   : > { %v3276_v57 = vadd.f32 %v3267_v41, %v3234_v55  ;;  %3317 = vrot.lane.b32.xlu1 %v3297_v56, %s7723_s21  ;;  %v3298_v58 = vsel %vm3282_vm3, %v3274_v44, %v3290_v52  ;;  %vm9881_vm3 = vmmov %vm9880_vm15 }
 0x524   : > { %vm3283_vm8 = vcmp.gt.f32.partialorder %v3275_v54, 0.0  ;;  %v3291_v59 = vmul.f32 0.01, %v3275_v54  ;;  %3319 = vrot.lane.b32.xlu0 %v3298_v58, %s7723_s21 }
 0x525   : > { %vm3284_vm1 = vcmp.gt.f32.partialorder %v3276_v57, 0.0  ;;  %v3292_v62 = vmul.f32 0.01, %v3276_v57 }
 0x526   : > { %v3299_v63 = vsel %vm3283_vm8, %v3275_v54, %v3291_v59  ;;  %vm9882_vm8 = vmmov %vm9881_vm3 }
 0x527   : > { %3321 = vrot.lane.b32.xlu1 %v3299_v63, %s7723_s21  ;;  %v3300_v0 = vsel %vm3284_vm1, %v3276_v57, %v3292_v62  ;;  %vm9883_vm1 = vmmov %vm9881_vm3 }
 0x528   : > { %3323 = vrot.lane.b32.xlu0 %v3300_v0, %s7723_s21 }
 0x52b   : > { %3658 = vrot.lane.b32.xlu1 %v8693_v35, %s7724_s22 }
 0x52c   : > { %3660 = vrot.lane.b32.xlu0 %v8697_v1, %s7724_s22 }
 0x52f   : > { %3844 = vrot.lane.b32.xlu1 %v8705_v60, %s7725_s25 }
 0x530   : > { %3846 = vrot.lane.b32.xlu0 %v8710_v3, %s7725_s25 }
 0x58d   : > { %v3310_v6 = vpop.permute.xlu1 %3309 }
 0x58e   : > { %3341 = vst.msk [vmem:[#allocation2] sm:$0xff] %vm1689_vm13, %v3310_v6  ;;  %v3312_v7 = vpop.permute.xlu0 %3311 }
 0x58f   : > { %3343 = vst.msk [vmem:[#allocation2 + $0x10] sm:$0xff] %vm380_vm2, %v3312_v7  ;;  %v8721_v18 = vsel %vm380_vm2, %v3310_v6, %v3312_v7 }
 0x591   : > { %v3314_v9 = vpop.permute.xlu1 %3313 }
 0x592   : > { %3344 = vst.msk [vmem:[#allocation2 + $0x18] sm:$0xff] %vm1689_vm13, %v3314_v9  ;;  %v3316_v42 = vpop.permute.xlu0 %3315 }
 0x593   : > { %3346 = vst.msk [vmem:[#allocation2 + $0x28] sm:$0xff] %vm380_vm2, %v3316_v42  ;;  %v8738_v24 = vsel %vm380_vm2, %v3314_v9, %v3316_v42 }
 0x595   : > { %v3318_v14 = vpop.permute.xlu1 %3317  ;;  %v8733_v22 = vld [vmem:[#allocation2] sm:$0xff] }
 0x596   : > { %3347 = vst.msk [vmem:[#allocation2 + $0x30] sm:$0xff] %vm1689_vm13, %v3318_v14  ;;  %v3320_v19 = vpop.permute.xlu0 %3319  ;;  %v8724_v15 = vld [vmem:[#allocation2 + $0x10] sm:$0xff] }
 0x597   : > { %3349 = vst.msk [vmem:[#allocation2 + $0x40] sm:$0xff] %vm380_vm2, %v3320_v19  ;;  %v8729_v20 = vpack.i.bf16 %v8724_v15, %v8721_v18  ;;  %v8757_v47 = vsel %vm380_vm2, %v3318_v14, %v3320_v19 }
 0x599   : > { %v3322_v21 = vpop.permute.xlu1 %3321  ;;  %7234 = vrot.lane.b32.xlu1 %v8729_v20, %s9844_s15  ;;  %v8735_v33 = vld [vmem:[#allocation2 + $0x18] sm:$0xff] }
 0x59a   : > { %3350 = vst.msk [vmem:[#allocation2 + $0x48] sm:$0xff] %vm1689_vm13, %v3322_v21  ;;  %v3324_v25 = vpop.permute.xlu0 %3323  ;;  %v8743_v27 = vpack.i.bf16 %v8735_v33, %v8733_v22  ;;  %v8745_v28 = vld [vmem:[#allocation2 + $0x28] sm:$0xff] }
 0x59b   : > { %3352 = vst.msk [vmem:[#allocation2 + $0x58] sm:$0xff] %vm380_vm2, %v3324_v25  ;;  %v8750_v34 = vpack.i.bf16 %v8745_v28, %v8738_v24  ;;  %v8772_v43 = vsel %vm380_vm2, %v3322_v21, %v3324_v25 }
 0x59d   : > { %7239 = vrot.lane.b32.xlu1 %v8743_v27, %s9844_s15  ;;  %7244 = vrot.lane.b32.xlu0 %v8750_v34, %s9844_s15  ;;  %v3659_v32 = vpop.permute.xlu1 %3658  ;;  %v8767_v51 = vld [vmem:[#allocation2 + $0x30] sm:$0xff] }
 0x59e   : > { %v8759_v37 = vld [vmem:[#allocation2 + $0x40] sm:$0xff]  ;;  %v3661_v26 = vpop.permute.xlu0 %3660  ;;  %v3666_v16 = vmul.f32 %v3659_v32, %v8733_v22  ;;  %v3669_v11 = vmul.f32 %v3659_v32, %v8735_v33  ;;  %v3672_v54 = vmul.f32 %v3659_v32, %v8767_v51 }
 0x59f   : > { %v8763_v38 = vpack.i.bf16 %v8759_v37, %v8757_v47  ;;  %v3662_v39 = vsel %vm648_vm4, %v3659_v32, %v3661_v26  ;;  %v3671_v31 = vmul.f32 %v3661_v26, %v8745_v28  ;;  %v3668_v49 = vmul.f32 %v3661_v26, %v8724_v15 }
 0x5a0   : > { %v3670_v30 = vmul.f32 %v3662_v39, %v8738_v24  ;;  %v3667_v48 = vmul.f32 %v3662_v39, %v8721_v18  ;;  %v7273_v17 = vpack.i.bf16 %v3669_v11, %v3666_v16  ;;  %v3673_v50 = vmul.f32 %v3662_v39, %v8757_v47 }
 0x5a1   : > { %7249 = vrot.lane.b32.xlu0 %v8763_v38, %s9844_s15  ;;  %v8769_v10 = vld [vmem:[#allocation2 + $0x48] sm:$0xff]  ;;  %v3674_v13 = vmul.f32 %v3661_v26, %v8759_v37  ;;  %v3845_v44 = vpop.permute.xlu1 %3844  ;;  %v3676_v55 = vmul.f32 %v3662_v39, %v8772_v43 }
 0x5a2   : > { %v8776_v8 = vpack.i.bf16 %v8769_v10, %v8767_v51  ;;  %v8778_v45 = vld [vmem:[#allocation2 + $0x58] sm:$0xff]  ;;  %v7268_v12 = vpack.i.bf16 %v3671_v31, %v3670_v30  ;;  %v7263_v23 = vpack.i.bf16 %v3668_v49, %v3667_v48  ;;  %v3847_v46 = vpop.permute.xlu0 %3846  ;;  %v3675_v52 = vmul.f32 %v3659_v32, %v8769_v10 }
 0x5a3   : > { %v8782_v36 = vpack.i.bf16 %v8778_v45, %v8772_v43  ;;  %v3848_v40 = vsel %vm788_vm5, %v3845_v44, %v3847_v46  ;;  %v7278_v41 = vpack.i.bf16 %v3674_v13, %v3673_v50  ;;  %v3677_v53 = vmul.f32 %v3661_v26, %v8778_v45 }
 0x5a4   : > { %v3856_v56 = vmul.f32 %v3848_v40, %v8738_v24  ;;  %v3857_v57 = vmul.f32 %v3847_v46, %v8745_v28  ;;  %v7288_v58 = vpack.i.bf16 %v3675_v52, %v3672_v54  ;;  %v3853_v61 = vmul.f32 %v3848_v40, %v8721_v18 }
 0x5a5   : > { %7259 = vrot.lane.b32.xlu0 %v8776_v8, %s9844_s15  ;;  %7254 = vrot.lane.b32.xlu1 %v8782_v36, %s9844_s15  ;;  %v7283_v59 = vpack.i.bf16 %v3677_v53, %v3676_v55  ;;  %v3854_v62 = vmul.f32 %v3847_v46, %v8724_v15  ;;  %v3859_v0 = vmul.f32 %v3848_v40, %v8757_v47 }
 0x5a6   : > { %v7298_v63 = vpack.i.bf16 %v3857_v57, %v3856_v56  ;;  %v3860_v6 = vmul.f32 %v3847_v46, %v8759_v37  ;;  %v3852_v7 = vmul.f32 %v3845_v44, %v8733_v22  ;;  %v3855_v9 = vmul.f32 %v3845_v44, %v8735_v33 }
 0x5a7   : > { %v7293_v29 = vpack.i.bf16 %v3854_v62, %v3853_v61  ;;  %v3858_v42 = vmul.f32 %v3845_v44, %v8767_v51  ;;  %v3861_v14 = vmul.f32 %v3845_v44, %v8769_v10  ;;  %v3862_v25 = vmul.f32 %v3848_v40, %v8772_v43 }
 0x5a8   : > { %v7308_v19 = vpack.i.bf16 %v3860_v6, %v3859_v0  ;;  %v7303_v21 = vpack.i.bf16 %v3855_v9, %v3852_v7  ;;  %v3863_v32 = vmul.f32 %v3847_v46, %v8778_v45  ;;  %v3375_v61 = vmul.f32 %v8705_v60, %v8735_v33 }
 0x5a9   : > { %4186 = vrot.lane.b32.xlu0 %v8697_v1, %s9848_s26  ;;  %4184 = vrot.lane.b32.xlu1 %v8693_v35, %s9848_s26  ;;  %v7313_v26 = vpack.i.bf16 %v3861_v14, %v3858_v42  ;;  %v3380_v62 = vmul.f32 %v8710_v3, %v8772_v43 }
 0x5aa   : > { %v7318_v39 = vpack.i.bf16 %v3863_v32, %v3862_v25 }
 0x5ad   : > { %7269 = vrot.lane.b32.xlu0 %v7268_v12, %s9842_s27  ;;  %7264 = vrot.lane.b32.xlu1 %v7263_v23, %s9842_s27 }
 0x5b1   : > { %4370 = vrot.lane.b32.xlu0 %v8705_v60, %s9846_s28  ;;  %7274 = vrot.lane.b32.xlu1 %v7273_v17, %s9842_s27 }
 0x5b5   : > { %7279 = vrot.lane.b32.xlu0 %v7278_v41, %s9842_s27  ;;  %4372 = vrot.lane.b32.xlu1 %v8710_v3, %s9846_s28 }
 0x5b9   : > { %7289 = vrot.lane.b32.xlu0 %v7288_v58, %s9842_s27  ;;  %7284 = vrot.lane.b32.xlu1 %v7283_v59, %s9842_s27  ;;  %v3376_v59 = vmul.f32 %v8710_v3, %v8738_v24 }
 0x5bd   : > { %7299 = vrot.lane.b32.xlu0 %v7298_v63, %s9877_s29  ;;  %7294 = vrot.lane.b32.xlu1 %v7293_v29, %s9877_s29 }
 0x5c1   : > { %7309 = vrot.lane.b32.xlu0 %v7308_v19, %s9877_s29  ;;  %7304 = vrot.lane.b32.xlu1 %v7303_v21, %s9877_s29  ;;  %v3374_v19 = vmul.f32 %v8710_v3, %v8721_v18  ;;  %v3373_v21 = vmul.f32 %v8705_v60, %v8733_v22 }
 0x5c5   : > { %7314 = vrot.lane.b32.xlu0 %v7313_v26, %s9877_s29  ;;  %7319 = vrot.lane.b32.xlu1 %v7318_v39, %s9877_s29  ;;  %v3378_v39 = vmul.f32 %v8710_v3, %v8757_v47 }
 0x5c9   : > { %7329 = vrot.lane.b32.xlu0 %v8750_v34, %s9878_s11  ;;  %7324 = vrot.lane.b32.xlu1 %v8729_v20, %s9878_s11 }
 0x5cd   : > { %4710 = vrot.lane.b32.xlu0 %v8693_v35, %s9879_s24  ;;  %7334 = vrot.lane.b32.xlu1 %v8743_v27, %s9878_s11 }
 0x5d1   : > { %7339 = vrot.lane.b32.xlu0 %v8763_v38, %s9878_s11  ;;  %4712 = vrot.lane.b32.xlu1 %v8697_v1, %s9879_s24 }
 0x5d5   : > { %7349 = vrot.lane.b32.xlu0 %v8776_v8, %s9878_s11  ;;  %7344 = vrot.lane.b32.xlu1 %v8782_v36, %s9878_s11 }
 0x60b   : > { %v7235_v30 = vpop.permute.xlu1 %7234 }
 0x60c   : > { %v7237_v31 = vunpack.i.h.bf16 %v7235_v30  ;;  %v7236_v48 = vunpack.i.l.bf16 %v7235_v30  ;;  %v6621_v30 = vpack.c.bf16 %v3376_v59, %v3374_v19 }
 0x60e   : > { %v3431_v1 = vsel %vm425_vm14, %v7236_v48, %v7237_v31 }
 0x60f   : > { %v7240_v49 = vpop.permute.xlu1 %7239  ;;  %v7245_v35 = vpop.permute.xlu0 %7244 }
 0x610   : > { %v7242_v12 = vunpack.i.h.bf16 %v7240_v49  ;;  %v7241_v23 = vunpack.i.l.bf16 %v7240_v49  ;;  %v7247_v16 = vunpack.i.h.bf16 %v7245_v35  ;;  %v7246_v11 = vunpack.i.l.bf16 %v7245_v35 }
 0x611   : > { %v6623_v49 = vpack.c.bf16 %v3375_v61, %v3373_v21  ;;  %v6625_v35 = vpack.c.bf16 %v3380_v62, %v3378_v39  ;;  %v6452_v21 = vld [vmem:[%s9819_s6 + $0x30] sm:$0xff] }
 0x612   : > { %v3430_v17 = vsel %vm425_vm14, %v7241_v23, %v7236_v48  ;;  %v3432_v50 = vsel %vm425_vm14, %v7242_v12, %v7246_v11  ;;  %v3433_v13 = vsel %vm425_vm14, %v7246_v11, %v7247_v16 }
 0x613   : > { %v7250_v44 = vpop.permute.xlu0 %7249  ;;  %v6613_v46 = vpack.c.bf16 %v3433_v13, %v3431_v1  ;;  %v6615_v40 = vpack.c.bf16 %v3432_v50, %v3430_v17  ;;  %v6450_v50 = vld [vmem:[%s9819_s6 + $0x20] sm:$0xff] }
 0x614   : > { %v7252_v41 = vunpack.i.h.bf16 %v7250_v44  ;;  %v7251_v52 = vunpack.i.l.bf16 %v7250_v44 }
 0x615   : > { %6614 = vmatprep.subr.bf16.mxu0 %v6613_v46 }
 0x616   : > { %6616 = vmatpush1.bf16.msra.mxu0 %v6615_v40  ;;  %v3435_v29 = vsel %vm425_vm14, %v7251_v52, %v7252_v41 }
 0x617   : > { %v7255_v53 = vpop.permute.xlu1 %7254  ;;  %v7260_v54 = vpop.permute.xlu0 %7259 }
 0x618   : > { %v7257_v55 = vunpack.i.h.bf16 %v7255_v53  ;;  %v7256_v56 = vunpack.i.l.bf16 %v7255_v53  ;;  %v7262_v57 = vunpack.i.h.bf16 %v7260_v54  ;;  %v7261_v58 = vunpack.i.l.bf16 %v7260_v54 }
 0x619   : > { %v3379_v53 = vmul.f32 %v8705_v60, %v8769_v10 }
 0x61a   : > { %v3436_v63 = vsel %vm425_vm14, %v7262_v57, %v7256_v56  ;;  %v3434_v0 = vsel %vm425_vm14, %v7261_v58, %v7251_v52  ;;  %v3437_v6 = vsel %vm425_vm14, %v7256_v56, %v7257_v55  ;;  %v3377_v52 = vmul.f32 %v8705_v60, %v8767_v51  ;;  %v6451_v60 = vld [vmem:[%s9819_s6 + $0x28] sm:$0xff] }
 0x61b   : > { %v4185_v7 = vpop.permute.xlu1 %4184  ;;  %v4187_v9 = vpop.permute.xlu0 %4186  ;;  %v6617_v42 = vpack.c.bf16 %v3437_v6, %v3435_v29  ;;  %v6619_v14 = vpack.c.bf16 %v3436_v63, %v3434_v0 }
 0x61c   : > { %v4188_v25 = vsel %vm1053_vm6, %v4185_v7, %v4187_v9  ;;  %v4197_v32 = vmul.f32 %v4187_v9, %v8745_v28  ;;  %v4194_v26 = vmul.f32 %v4187_v9, %v8724_v15  ;;  %v4200_v23 = vmul.f32 %v4187_v9, %v8759_v37 }
 0x61d   : > { %6618 = vmatprep.subr.bf16.mxu0 %v6617_v42  ;;  %v4196_v31 = vmul.f32 %v4188_v25, %v8738_v24  ;;  %v4193_v48 = vmul.f32 %v4188_v25, %v8721_v18  ;;  %v4199_v12 = vmul.f32 %v4188_v25, %v8757_v47  ;;  %v4192_v1 = vmul.f32 %v4185_v7, %v8733_v22 }
 0x61e   : > { %6620 = vmatpush1.bf16.msra.mxu0 %v6619_v14  ;;  %v4195_v13 = vmul.f32 %v4185_v7, %v8735_v33  ;;  %v4198_v54 = vmul.f32 %v4185_v7, %v8767_v51  ;;  %v4201_v56 = vmul.f32 %v4185_v7, %v8769_v10  ;;  %v4202_v57 = vmul.f32 %v4188_v25, %v8772_v43 }
 0x61f   : > { %v8877_v16 = vpop.permute.xlu1 %7264  ;;  %v8879_v11 = vpop.permute.xlu0 %7269  ;;  %6622 = vmatprep.subr.bf16.mxu0 %v6621_v30  ;;  %v7358_v17 = vpack.i.bf16 %v4197_v32, %v4196_v31  ;;  %v7353_v3 = vpack.i.bf16 %v4194_v26, %v4193_v48  ;;  %v7368_v55 = vpack.i.bf16 %v4200_v23, %v4199_v12  ;;  %v4203_v58 = vmul.f32 %v4187_v9, %v8778_v45 }
 0x620   : > { %v7267_v44 = vunpack.i.h.bf16 %v8877_v16  ;;  %v7266_v46 = vunpack.i.l.bf16 %v8877_v16  ;;  %v7272_v40 = vunpack.i.h.bf16 %v8879_v11  ;;  %v7271_v41 = vunpack.i.l.bf16 %v8879_v11 }
 0x621   : > { %7359 = vrot.lane.b32.xlu0 %v7358_v17, %s9852_s18  ;;  %7354 = vrot.lane.b32.xlu1 %v7353_v3, %s9852_s18  ;;  %v7363_v62 = vpack.i.bf16 %v4195_v13, %v4192_v1  ;;  %v6627_v29 = vpack.c.bf16 %v3379_v53, %v3377_v52  ;;  %v7378_v14 = vpack.i.bf16 %v4201_v56, %v4198_v54  ;;  %v6453_v3 = vld [vmem:[%s9819_s6 + $0x38] sm:$0xff] }
 0x622   : > { %6454 = vmatmul.mubr.msk.f32.vlgmr.msra.gmra.mrb[8].mxu0 %vm1193_vm9, %v6450_v50  ;;  %v3720_v63 = vsel %vm670_vm7, %v7266_v46, %v7267_v44  ;;  %v3722_v0 = vsel %vm670_vm7, %v7271_v41, %v7272_v40  ;;  %v7373_v19 = vpack.i.bf16 %v4203_v58, %v4202_v57 }
 0x623   : > { %6624 = vmatpush1.bf16.msra.mxu0 %v6623_v49  ;;  %v7275_v59 = vpop.permute.xlu1 %7274  ;;  %v4371_v61 = vpop.permute.xlu0 %4370  ;;  %3528 = vmatprep.mubr.f32.mxu0 %v9850_v2  ;;  %v6629_v6 = vpack.c.bf16 %v3722_v0, %v3720_v63 }
 0x624   : > { %6626 = vmatprep.subr.bf16.mxu0 %v6625_v35  ;;  %v7277_v7 = vunpack.i.h.bf16 %v7275_v59  ;;  %v4378_v26 = vmul.f32 %v4371_v61, %v8733_v22  ;;  %v4381_v39 = vmul.f32 %v4371_v61, %v8735_v33  ;;  %v7276_v30 = vunpack.i.l.bf16 %v7275_v59 }
 0x625   : > { %7369 = vrot.lane.b32.xlu0 %v7368_v55, %s9852_s18  ;;  %7364 = vrot.lane.b32.xlu1 %v7363_v62, %s9852_s18  ;;  %v4384_v40 = vmul.f32 %v4371_v61, %v8767_v51  ;;  %v4387_v52 = vmul.f32 %v4371_v61, %v8769_v10 }
 0x626   : > { %6455 = vmatmul.mubr.msk.f32.gmra.mrb[10].mxu0 %vm1193_vm9, %v6451_v60  ;;  %v3719_v53 = vsel %vm670_vm7, %v7276_v30, %v7266_v46  ;;  %v3721_v54 = vsel %vm670_vm7, %v7277_v7, %v7271_v41  ;;  %v7393_v55 = vpack.i.bf16 %v4381_v39, %v4378_v26  ;;  %v3381_v41 = vld [vmem:[%s9819_s6] sm:$0xff] }
 0x627   : > { %6628 = vmatpush1.bf16.msra.mxu0 %v6627_v29  ;;  %v4373_v9 = vpop.permute.xlu1 %4372  ;;  %v7280_v42 = vpop.permute.xlu0 %7279  ;;  %3534 = vmatprep.mubr.f32.mxu0 %v9850_v2  ;;  %v7408_v39 = vpack.i.bf16 %v4387_v52, %v4384_v40 }
 0x628   : > { %v4374_v25 = vsel %vm1193_vm9, %v4371_v61, %v4373_v9  ;;  %6630 = vmatprep.subr.bf16.mxu0 %v6629_v6  ;;  %v4383_v32 = vmul.f32 %v4373_v9, %v8745_v28  ;;  %v4380_v49 = vmul.f32 %v4373_v9, %v8724_v15  ;;  %v7282_v35 = vunpack.i.h.bf16 %v7280_v42 }
 0x629   : > { %7379 = vrot.lane.b32.xlu0 %v7378_v14, %s9852_s18  ;;  %7374 = vrot.lane.b32.xlu1 %v7373_v19, %s9852_s18  ;;  %v4382_v31 = vmul.f32 %v4374_v25, %v8738_v24  ;;  %v4379_v48 = vmul.f32 %v4374_v25, %v8721_v18  ;;  %v7281_v12 = vunpack.i.l.bf16 %v7280_v42  ;;  %v4385_v50 = vmul.f32 %v4374_v25, %v8757_v47 }
 0x62a   : > { %6456 = vmatmul.mubr.msk.f32.gmra.mrb[12].mxu0 %vm1193_vm9, %v6452_v21  ;;  %v4386_v1 = vmul.f32 %v4373_v9, %v8759_v37  ;;  %v4388_v63 = vmul.f32 %v4374_v25, %v8772_v43  ;;  %v4389_v0 = vmul.f32 %v4373_v9, %v8778_v45  ;;  %v6631_v14 = vpack.c.bf16 %v3721_v54, %v3719_v53 }
 0x62b   : > { %v7285_v23 = vpop.permute.xlu1 %7284  ;;  %v7290_v16 = vpop.permute.xlu0 %7289  ;;  %3540 = vmatprep.mubr.f32.mxu0 %v9850_v2  ;;  %v7388_v11 = vpack.i.bf16 %v4383_v32, %v4382_v31  ;;  %v7383_v17 = vpack.i.bf16 %v4380_v49, %v4379_v48  ;;  %v3724_v58 = vsel %vm670_vm7, %v7281_v12, %v7282_v35  ;;  %v3382_v31 = vld [vmem:[%s9819_s6 + $0x8] sm:$0xff] }
 0x62c   : > { %v7287_v13 = vunpack.i.h.bf16 %v7285_v23  ;;  %v7286_v44 = vunpack.i.l.bf16 %v7285_v23  ;;  %v7292_v56 = vunpack.i.h.bf16 %v7290_v16  ;;  %v7291_v57 = vunpack.i.l.bf16 %v7290_v16  ;;  %v3383_v23 = vld [vmem:[%s9819_s6 + $0x10] sm:$0xff] }
 0x62d   : > { %7389 = vrot.lane.b32.xlu0 %v7388_v11, %s9853_s20  ;;  %7384 = vrot.lane.b32.xlu1 %v7383_v17, %s9853_s20  ;;  %v7398_v46 = vpack.i.bf16 %v4386_v1, %v4385_v50  ;;  %v7403_v30 = vpack.i.bf16 %v4389_v0, %v4388_v63 }
 0x62e   : > { %6457 = vmatmul.mubr.msk.f32.gmra.mrb[14].mxu0 %vm1193_vm9, %v6453_v3  ;;  %v3726_v59 = vsel %vm670_vm7, %v7286_v44, %v7287_v13  ;;  %v3725_v19 = vsel %vm670_vm7, %v7292_v56, %v7286_v44  ;;  %v3723_v21 = vsel %vm670_vm7, %v7291_v57, %v7281_v12  ;;  %v3384_v13 = vld [vmem:[%s9819_s6 + $0x18] sm:$0xff] }
 0x62f   : > { %v7295_v62 = vpop.permute.xlu1 %7294  ;;  %v7300_v60 = vpop.permute.xlu0 %7299  ;;  %3623 = vmatprep.mubr.f32.mxu0 %v9850_v2  ;;  %v6633_v61 = vpack.c.bf16 %v3726_v59, %v3724_v58  ;;  %v6635_v49 = vpack.c.bf16 %v3725_v19, %v3723_v21 }
 0x630   : > { %v7297_v29 = vunpack.i.h.bf16 %v7295_v62  ;;  %v7296_v6 = vunpack.i.l.bf16 %v7295_v62  ;;  %v7302_v7 = vunpack.i.h.bf16 %v7300_v60  ;;  %v7301_v42 = vunpack.i.l.bf16 %v7300_v60 }
 0x631   : > { %7399 = vrot.lane.b32.xlu0 %v7398_v46, %s9853_s20  ;;  %7394 = vrot.lane.b32.xlu1 %v7393_v55, %s9853_s20 }
 0x632   : > { %6458 = vmatmul.mubr.msk.f32.vlgmr.msra.gmra.mrb[8].mxu0 %vm1193_vm9, %v3381_v41  ;;  %v3906_v32 = vsel %vm810_vm10, %v7296_v6, %v7297_v29  ;;  %v3908_v25 = vsel %vm810_vm10, %v7301_v42, %v7302_v7 }
 0x633   : > { %6632 = vmatpush1.bf16.msra.mxu0 %v6631_v14  ;;  %v7305_v9 = vpop.permute.xlu1 %7304  ;;  %v7310_v26 = vpop.permute.xlu0 %7309  ;;  %3629 = vmatprep.mubr.f32.mxu0 %v9850_v2  ;;  %v6637_v48 = vpack.c.bf16 %v3908_v25, %v3906_v32 }
 0x634   : > { %6634 = vmatprep.subr.bf16.mxu0 %v6633_v61  ;;  %v7306_v16 = vunpack.i.l.bf16 %v7305_v9  ;;  %v7307_v11 = vunpack.i.h.bf16 %v7305_v9  ;;  %v7312_v44 = vunpack.i.h.bf16 %v7310_v26  ;;  %v7311_v40 = vunpack.i.l.bf16 %v7310_v26 }
 0x635   : > { %7409 = vrot.lane.b32.xlu0 %v7408_v39, %s9853_s20  ;;  %7404 = vrot.lane.b32.xlu1 %v7403_v30, %s9853_s20 }
 0x636   : > { %6459 = vmatmul.mubr.msk.f32.gmra.mrb[10].mxu0 %vm1193_vm9, %v3382_v31  ;;  %v3910_v60 = vsel %vm810_vm10, %v7311_v40, %v7312_v44 }
 0x637   : > { %6636 = vmatpush1.bf16.msra.mxu0 %v6635_v49  ;;  %v7320_v35 = vpop.permute.xlu1 %7319  ;;  %v7315_v12 = vpop.permute.xlu0 %7314  ;;  %3635 = vmatprep.mubr.f32.mxu0 %v9850_v2 }
 0x638   : > { %6638 = vmatprep.subr.bf16.mxu0 %v6637_v48  ;;  %v7322_v17 = vunpack.i.h.bf16 %v7320_v35  ;;  %v7321_v3 = vunpack.i.l.bf16 %v7320_v35  ;;  %v7317_v52 = vunpack.i.h.bf16 %v7315_v12  ;;  %v7316_v53 = vunpack.i.l.bf16 %v7315_v12 }
 0x639   : > { %7419 = vrot.lane.b32.xlu0 %v8750_v34, %s9854_s12  ;;  %7414 = vrot.lane.b32.xlu1 %v8729_v20, %s9854_s12  ;;  %v3905_v34 = vsel %vm810_vm10, %v7306_v16, %v7296_v6  ;;  %v3907_v20 = vsel %vm810_vm10, %v7307_v11, %v7301_v42 }
 0x63a   : > { %6460 = vmatmul.mubr.msk.f32.gmra.mrb[12].mxu0 %vm1193_vm9, %v3383_v23  ;;  %v3912_v54 = vsel %vm810_vm10, %v7321_v3, %v7322_v17  ;;  %v6639_v62 = vpack.c.bf16 %v3907_v20, %v3905_v34  ;;  %v3911_v46 = vsel %vm810_vm10, %v7317_v52, %v7321_v3  ;;  %v3909_v41 = vsel %vm810_vm10, %v7316_v53, %v7311_v40  ;;  %v6466_v23 = vld [vmem:[%s9819_s6 + $0x58] sm:$0xff]  ;;  %v4897_v53 = vld [vmem:[%s9820_s7 + $0x8] sm:$0xff] }
 0x63b   : > { %v8968_v50 = vpop.permute.xlu1 %7324  ;;  %v8970_v1 = vpop.permute.xlu0 %7329  ;;  %3641 = vmatprep.mubr.f32.mxu0 %v9850_v2  ;;  %v6641_v61 = vpack.c.bf16 %v3912_v54, %v3910_v60  ;;  %v6643_v42 = vpack.c.bf16 %v3911_v46, %v3909_v41  ;;  %v4896_v54 = vld [vmem:[%s9820_s7] sm:$0xff]  ;;  %v6481_v60 = vld [vmem:[%s9819_s6 + $0x90] sm:$0xff]  ;;  %v6482_v46 = vld [vmem:[%s9819_s6 + $0x98] sm:$0xff] }
 0x63c   : > { %v7327_v55 = vunpack.i.h.bf16 %v8968_v50  ;;  %v7326_v56 = vunpack.i.l.bf16 %v8968_v50  ;;  %v7332_v57 = vunpack.i.h.bf16 %v8970_v1  ;;  %v7331_v58 = vunpack.i.l.bf16 %v8970_v1 }
 0x63d   : > { %7429 = vrot.lane.b32.xlu0 %v8763_v38, %s9854_s12  ;;  %7424 = vrot.lane.b32.xlu1 %v8743_v27, %s9854_s12  ;;  %v6463_v27 = vld [vmem:[%s9819_s6 + $0x40] sm:$0xff] }
 0x63e   : > { %6461 = vmatmul.mubr.msk.f32.gmra.mrb[14].mxu0 %vm1193_vm9, %v3384_v13  ;;  %v4062_v0 = vsel %vm935_vm11, %v7331_v58, %v7332_v57  ;;  %v6471_v13 = vld [vmem:[%s9819_s6 + $0x60] sm:$0xff]  ;;  %v4899_v57 = vld [vmem:[%s9820_s7 + $0x18] sm:$0xff] }
 0x63f   : > { %v7335_v38 = vpop.permute.xlu1 %7334  ;;  %v4711_v59 = vpop.permute.xlu0 %4710  ;;  %3811 = vmatprep.mubr.f32.mxu0 %v9850_v2 }
 0x640   : > { %v4718_v9 = vmul.f32 %v4711_v59, %v8733_v22  ;;  %v4721_v26 = vmul.f32 %v4711_v59, %v8735_v33  ;;  %v7337_v30 = vunpack.i.h.bf16 %v7335_v38  ;;  %v7336_v31 = vunpack.i.l.bf16 %v7335_v38  ;;  %v6473_v38 = vld [vmem:[%s9819_s6 + $0x70] sm:$0xff] }
 0x641   : > { %7439 = vrot.lane.b32.xlu0 %v8776_v8, %s9854_s12  ;;  %7434 = vrot.lane.b32.xlu1 %v8782_v36, %s9854_s12  ;;  %v6464_v8 = vld [vmem:[%s9819_s6 + $0x48] sm:$0xff]  ;;  %v4060_v36 = vsel %vm935_vm11, %v7326_v56, %v7327_v55  ;;  %v4724_v33 = vmul.f32 %v4711_v59, %v8767_v51 }
 0x642   : > { %6467 = vmatmul.mubr.msk.f32.vlgmr.msra.gmra.mrb[8].mxu0 %vm1193_vm9, %v6463_v27  ;;  %v6645_v32 = vpack.c.bf16 %v4062_v0, %v4060_v36  ;;  %v7453_v22 = vpack.i.bf16 %v4721_v26, %v4718_v9  ;;  %v4059_v51 = vsel %vm935_vm11, %v7336_v31, %v7326_v56  ;;  %v6472_v55 = vld [vmem:[%s9819_s6 + $0x68] sm:$0xff]  ;;  %v6479_v27 = vld [vmem:[%s9819_s6 + $0x80] sm:$0xff] }
 0x643   : > { %6640 = vmatpush1.bf16.msra.mxu0 %v6639_v62  ;;  %v4713_v63 = vpop.permute.xlu1 %4712  ;;  %3817 = vmatprep.mubr.f32.mxu0 %v9850_v2  ;;  %v7340_v7 = vpop.permute.xlu0 %7339  ;;  %v6480_v62 = vld [vmem:[%s9819_s6 + $0x88] sm:$0xff] }
 0x644   : > { %6642 = vmatprep.subr.bf16.mxu0 %v6641_v61  ;;  %v4714_v29 = vsel %vm362_vm0, %v4711_v59, %v4713_v63  ;;  %v4723_v6 = vmul.f32 %v4713_v63, %v8745_v28  ;;  %v4720_v21 = vmul.f32 %v4713_v63, %v8724_v15  ;;  %v4726_v15 = vmul.f32 %v4713_v63, %v8759_v37 }
 0x645   : > { %v4722_v14 = vmul.f32 %v4714_v29, %v8738_v24  ;;  %v4719_v19 = vmul.f32 %v4714_v29, %v8721_v18  ;;  %v4725_v25 = vmul.f32 %v4714_v29, %v8757_v47  ;;  %v6465_v18 = vld [vmem:[%s9819_s6 + $0x50] sm:$0xff]  ;;  %v4727_v47 = vmul.f32 %v4711_v59, %v8769_v10  ;;  %v6474_v59 = vld [vmem:[%s9819_s6 + $0x78] sm:$0xff] }
 0x646   : > { %6468 = vmatmul.mubr.msk.f32.gmra.mrb[10].mxu0 %vm1193_vm9, %v6464_v8  ;;  %v4728_v48 = vmul.f32 %v4714_v29, %v8772_v43  ;;  %v4729_v16 = vmul.f32 %v4713_v63, %v8778_v45  ;;  %v7342_v11 = vunpack.i.h.bf16 %v7340_v7  ;;  %v7341_v17 = vunpack.i.l.bf16 %v7340_v7 }
 0x647   : > { %6644 = vmatpush1.bf16.msra.mxu0 %v6643_v42  ;;  %3823 = vmatprep.mubr.f32.mxu0 %v9850_v2  ;;  %v7448_v28 = vpack.i.bf16 %v4723_v6, %v4722_v14  ;;  %v7443_v39 = vpack.i.bf16 %v4720_v21, %v4719_v19  ;;  %v7345_v24 = vpop.permute.xlu1 %7344  ;;  %v7350_v37 = vpop.permute.xlu0 %7349  ;;  %v7458_v12 = vpack.i.bf16 %v4726_v15, %v4725_v25 }
 0x648   : > { %6646 = vmatprep.subr.bf16.mxu0 %v6645_v32  ;;  %v7347_v49 = vunpack.i.h.bf16 %v7345_v24  ;;  %v7346_v35 = vunpack.i.l.bf16 %v7345_v24  ;;  %v4061_v10 = vsel %vm935_vm11, %v7337_v30, %v7331_v58  ;;  %v7352_v43 = vunpack.i.h.bf16 %v7350_v37  ;;  %v4898_v58 = vld [vmem:[%s9820_s7 + $0x10] sm:$0xff] }
 0x649   : > { %7449 = vrot.lane.b32.xlu0 %v7448_v28, %s9855_s16  ;;  %7444 = vrot.lane.b32.xlu1 %v7443_v39, %s9855_s16  ;;  %v7351_v3 = vunpack.i.l.bf16 %v7350_v37  ;;  %v7468_v1 = vpack.i.bf16 %v4727_v47, %v4724_v33  ;;  %v7463_v45 = vpack.i.bf16 %v4729_v16, %v4728_v48  ;;  %v6647_v50 = vpack.c.bf16 %v4061_v10, %v4059_v51  ;;  %v6487_v51 = vld [vmem:[%s9819_s6 + $0xa0] sm:$0xff] }
 0x64a   : > { %6469 = vmatmul.mubr.msk.f32.gmra.mrb[12].mxu0 %vm1193_vm9, %v6465_v18  ;;  %v4066_v34 = vsel %vm935_vm11, %v7346_v35, %v7347_v49  ;;  %v4064_v44 = vsel %vm935_vm11, %v7341_v17, %v7342_v11  ;;  %v4065_v40 = vsel %vm935_vm11, %v7352_v43, %v7346_v35 }
 0x64b   : > { %3829 = vmatprep.mubr.f32.mxu0 %v9850_v2  ;;  %v4063_v20 = vsel %vm935_vm11, %v7351_v3, %v7341_v17  ;;  %v6649_v52 = vpack.c.bf16 %v4066_v34, %v4064_v44 }
 0x64c   : > { %v6651_v56 = vpack.c.bf16 %v4065_v40, %v4063_v20 }
 0x64d   : > { %7459 = vrot.lane.b32.xlu0 %v7458_v12, %s9855_s16  ;;  %7454 = vrot.lane.b32.xlu1 %v7453_v22, %s9855_s16 }
 0x64e   : > { %6470 = vmatmul.mubr.msk.f32.gmra.mrb[14].mxu0 %vm1193_vm9, %v6466_v23 }
 0x64f   : > { %3997 = vmatprep.mubr.f32.mxu0 %v9850_v2 }
 0x651   : > { %7469 = vrot.lane.b32.xlu0 %v7468_v1, %s9855_s16  ;;  %7464 = vrot.lane.b32.xlu1 %v7463_v45, %s9855_s16 }
 0x652   : > { %6475 = vmatmul.mubr.msk.f32.vlgmr.msra.gmra.mrb[8].mxu0 %vm1193_vm9, %v6471_v13 }
 0x653   : > { %6648 = vmatpush1.bf16.msra.mxu0 %v6647_v50  ;;  %4003 = vmatprep.mubr.f32.mxu0 %v9850_v2 }
 0x654   : > { %6650 = vmatprep.subr.bf16.mxu0 %v6649_v52  ;;  %v6488_v52 = vld [vmem:[%s9819_s6 + $0xa8] sm:$0xff] }
 0x655   : > { %4907 = vperm.xlu0 %6991, %v4897_v53   ;;  %4902 = vperm.xlu1 %6992, %v4896_v54  }
 0x656   : > { %6476 = vmatmul.mubr.msk.f32.gmra.mrb[10].mxu0 %vm1193_vm9, %v6472_v55 }
 0x657   : > { %6652 = vmatpush1.bf16.msra.mxu0 %v6651_v56  ;;  %4009 = vmatprep.mubr.f32.mxu0 %v9850_v2 }
 0x659   : > { %4917 = vperm.xlu0 %6991, %v4899_v57   ;;  %4912 = vperm.xlu1 %6992, %v4898_v58  }
 0x65a   : > { %6477 = vmatmul.mubr.msk.f32.gmra.mrb[12].mxu0 %vm1193_vm9, %v6473_v38 }
 0x65b   : > { %4015 = vmatprep.mubr.f32.mxu0 %v9850_v2 }
 0x65e   : > { %6478 = vmatmul.mubr.msk.f32.gmra.mrb[14].mxu0 %vm1193_vm9, %v6474_v59 }
 0x65f   : > { %4151 = vmatprep.mubr.f32.mxu0 %v9850_v2 }
 0x662   : > { %6483 = vmatmul.mubr.msk.f32.vlgmr.msra.gmra.mrb[8].mxu0 %vm1193_vm9, %v6479_v27 }
 0x663   : > { %4157 = vmatprep.mubr.f32.mxu0 %v9850_v2 }
 0x666   : > { %6484 = vmatmul.mubr.msk.f32.gmra.mrb[10].mxu0 %vm1193_vm9, %v6480_v62 }
 0x667   : > { %4163 = vmatprep.mubr.f32.mxu0 %v9850_v2 }
 0x66a   : > { %6485 = vmatmul.mubr.msk.f32.gmra.mrb[12].mxu0 %vm1193_vm9, %v6481_v60  ;;  %v6489_v60 = vld [vmem:[%s9819_s6 + $0xb0] sm:$0xff] }
 0x66b   : > { %4169 = vmatprep.mubr.f32.mxu0 %v9850_v2 }
 0x66e   : > { %6486 = vmatmul.mubr.msk.f32.gmra.mrb[14].mxu0 %vm1193_vm9, %v6482_v46 }
 0x66f   : > { %4337 = vmatprep.mubr.f32.mxu0 %v9850_v2 }
 0x693   : > { %v7355_v41 = vpop.permute.xlu1 %7354  ;;  %v7360_v61 = vpop.permute.xlu0 %7359 }
 0x694   : > { %v7357_v63 = vunpack.i.h.bf16 %v7355_v41  ;;  %v7356_v8 = vunpack.i.l.bf16 %v7355_v41  ;;  %v7362_v36 = vunpack.i.h.bf16 %v7360_v61  ;;  %v7361_v0 = vunpack.i.l.bf16 %v7360_v61 }
 0x696   : > { %v4246_v29 = vsel %vm1075_vm12, %v7356_v8, %v7357_v63  ;;  %v4248_v6 = vsel %vm1075_vm12, %v7361_v0, %v7362_v36 }
 0x697   : > { %v7365_v7 = vpop.permute.xlu1 %7364  ;;  %v7370_v42 = vpop.permute.xlu0 %7369  ;;  %v6653_v14 = vpack.c.bf16 %v4248_v6, %v4246_v29 }
 0x698   : > { %v7367_v19 = vunpack.i.h.bf16 %v7365_v7  ;;  %v7366_v21 = vunpack.i.l.bf16 %v7365_v7  ;;  %v7372_v9 = vunpack.i.h.bf16 %v7370_v42  ;;  %v7371_v26 = vunpack.i.l.bf16 %v7370_v42  ;;  %v6490_v7 = vld [vmem:[%s9819_s6 + $0xb8] sm:$0xff] }
 0x699   : > { %6654 = vmatprep.subr.bf16.mxu0 %v6653_v14 }
 0x69a   : > { %v4245_v32 = vsel %vm1075_vm12, %v7366_v21, %v7356_v8  ;;  %v4247_v25 = vsel %vm1075_vm12, %v7367_v19, %v7361_v0  ;;  %v4250_v47 = vsel %vm1075_vm12, %v7371_v26, %v7372_v9 }
 0x69b   : > { %v6655_v28 = vpack.c.bf16 %v4247_v25, %v4245_v32  ;;  %v7375_v39 = vpop.permute.xlu1 %7374  ;;  %v7380_v18 = vpop.permute.xlu0 %7379 }
 0x69c   : > { %v7377_v15 = vunpack.i.h.bf16 %v7375_v39  ;;  %v7376_v24 = vunpack.i.l.bf16 %v7375_v39  ;;  %v7382_v30 = vunpack.i.h.bf16 %v7380_v18  ;;  %v7381_v31 = vunpack.i.l.bf16 %v7380_v18 }
 0x69d   : > { %6656 = vmatpush1.bf16.msra.mxu0 %v6655_v28 }
 0x69e   : > { %v4251_v22 = vsel %vm1075_vm12, %v7382_v30, %v7376_v24  ;;  %v4249_v33 = vsel %vm1075_vm12, %v7381_v31, %v7371_v26  ;;  %v4252_v48 = vsel %vm1075_vm12, %v7376_v24, %v7377_v15  ;;  %v6495_v15 = vld [vmem:[%s9819_s6 + $0xc0] sm:$0xff] }
 0x69f   : > { %v6659_v49 = vpack.c.bf16 %v4251_v22, %v4249_v33  ;;  %v7385_v35 = vpop.permute.xlu1 %7384  ;;  %v7390_v37 = vpop.permute.xlu0 %7389  ;;  %v6657_v12 = vpack.c.bf16 %v4252_v48, %v4250_v47 }
 0x6a0   : > { %v7387_v23 = vunpack.i.h.bf16 %v7385_v35  ;;  %v7386_v16 = vunpack.i.l.bf16 %v7385_v35  ;;  %v7392_v11 = vunpack.i.h.bf16 %v7390_v37  ;;  %v7391_v17 = vunpack.i.l.bf16 %v7390_v37 }
 0x6a1   : > { %6658 = vmatprep.subr.bf16.mxu0 %v6657_v12  ;;  %v6496_v12 = vld [vmem:[%s9819_s6 + $0xc8] sm:$0xff] }
 0x6a2   : > { %6660 = vmatpush1.bf16.msra.mxu0 %v6659_v49  ;;  %v4432_v10 = vsel %vm9880_vm15, %v7386_v16, %v7387_v23  ;;  %v4434_v43 = vsel %vm9881_vm3, %v7391_v17, %v7392_v11  ;;  %vm9884_vm15 = vmmov %vm9883_vm1 }
 0x6a3   : > { %v7395_v3 = vpop.permute.xlu1 %7394  ;;  %v7400_v1 = vpop.permute.xlu0 %7399  ;;  %v6661_v45 = vpack.c.bf16 %v4434_v43, %v4432_v10  ;;  %vm9885_vm3 = vmmov %vm9883_vm1 }
 0x6a4   : > { %v7397_v13 = vunpack.i.h.bf16 %v7395_v3  ;;  %v7396_v34 = vunpack.i.l.bf16 %v7395_v3  ;;  %v7402_v50 = vunpack.i.h.bf16 %v7400_v1  ;;  %v7401_v44 = vunpack.i.l.bf16 %v7400_v1 }
 0x6a5   : > { %6491 = vmatmul.mubr.msk.f32.vlgmr.msra.gmra.mrb[8].mxu0 %vm1193_vm9, %v6487_v51  ;;  %6662 = vmatprep.subr.bf16.mxu0 %v6661_v45 }
 0x6a6   : > { %v4431_v40 = vsel %vm9882_vm8, %v7396_v34, %v7386_v16  ;;  %v4433_v20 = vsel %vm9883_vm1, %v7397_v13, %v7391_v17  ;;  %4343 = vmatprep.mubr.f32.mxu0 %v9850_v2  ;;  %v4436_v59 = vsel %vm9884_vm15, %v7401_v44, %v7402_v50  ;;  %vm9886_vm8 = vmmov %vm9883_vm1  ;;  %vm9887_vm15 = vcmask 777216   ;;  %v6497_v17 = vld [vmem:[%s9819_s6 + $0xd0] sm:$0xff]  ;;  %v6498_v13 = vld [vmem:[%s9819_s6 + $0xd8] sm:$0xff] }
 0x6a7   : > { %v6663_v53 = vpack.c.bf16 %v4433_v20, %v4431_v40  ;;  %v7405_v54 = vpop.permute.xlu1 %7404  ;;  %v7410_v55 = vpop.permute.xlu0 %7409 }
 0x6a8   : > { %v7407_v56 = vunpack.i.h.bf16 %v7405_v54  ;;  %v7406_v57 = vunpack.i.l.bf16 %v7405_v54  ;;  %v7412_v58 = vunpack.i.h.bf16 %v7410_v55  ;;  %v7411_v38 = vunpack.i.l.bf16 %v7410_v55 }
 0x6a9   : > { %6492 = vmatmul.mubr.msk.f32.gmra.mrb[10].mxu0 %vm1193_vm9, %v6488_v52 }
 0x6aa   : > { %v4437_v27 = vsel %vm9885_vm3, %v7412_v58, %v7406_v57  ;;  %v4435_v62 = vsel %vm9886_vm8, %v7411_v38, %v7401_v44  ;;  %6664 = vmatpush1.bf16.msra.mxu0 %v6663_v53  ;;  %4349 = vmatprep.mubr.f32.mxu0 %v9850_v2  ;;  %v4438_v46 = vsel %vm9883_vm1, %v7406_v57, %v7407_v56  ;;  %vm9888_vm3 = vmmov %vm9887_vm15  ;;  %v6503_v58 = vld [vmem:[%s9819_s6 + $0xe0] sm:$0xff] }
 0x6ab   : > { %v6667_v41 = vpack.c.bf16 %v4437_v27, %v4435_v62  ;;  %v7415_v61 = vpop.permute.xlu1 %7414  ;;  %v7420_v63 = vpop.permute.xlu0 %7419  ;;  %v6665_v8 = vpack.c.bf16 %v4438_v46, %v4436_v59  ;;  %vm9889_vm8 = vmmov %vm9888_vm3 }
 0x6ac   : > { %v7417_v36 = vunpack.i.h.bf16 %v7415_v61  ;;  %v7416_v0 = vunpack.i.l.bf16 %v7415_v61  ;;  %v7422_v29 = vunpack.i.h.bf16 %v7420_v63  ;;  %v7421_v6 = vunpack.i.l.bf16 %v7420_v63  ;;  %vm9890_vm1 = vmmov %vm9888_vm3 }
 0x6ad   : > { %6493 = vmatmul.mubr.msk.f32.gmra.mrb[12].mxu0 %vm1193_vm9, %v6489_v60  ;;  %6666 = vmatprep.subr.bf16.mxu0 %v6665_v8 }
 0x6ae   : > { %6668 = vmatpush1.bf16.msra.mxu0 %v6667_v41  ;;  %4355 = vmatprep.mubr.f32.mxu0 %v9850_v2  ;;  %v4586_v42 = vsel %vm9887_vm15, %v7416_v0, %v7417_v36  ;;  %v4588_v14 = vsel %vm9888_vm3, %v7421_v6, %v7422_v29  ;;  %vm9891_vm15 = vmmov %vm9890_vm1  ;;  %v6504_v36 = vld [vmem:[%s9819_s6 + $0xe8] sm:$0xff] }
 0x6af   : > { %v7425_v19 = vpop.permute.xlu1 %7424  ;;  %v7430_v21 = vpop.permute.xlu0 %7429  ;;  %v6669_v32 = vpack.c.bf16 %v4588_v14, %v4586_v42  ;;  %vm9892_vm3 = vmmov %vm9890_vm1  ;;  %v6506_v42 = vld [vmem:[%s9819_s6 + $0xf8] sm:$0xff]  ;;  %v6511_v14 = vld [vmem:[%s9819_s6 + $0x100] sm:$0xff] }
 0x6b0   : > { %v7427_v25 = vunpack.i.h.bf16 %v7425_v19  ;;  %v7426_v9 = vunpack.i.l.bf16 %v7425_v19  ;;  %v7432_v26 = vunpack.i.h.bf16 %v7430_v21  ;;  %v7431_v28 = vunpack.i.l.bf16 %v7430_v21  ;;  %v6512_v19 = vld [vmem:[%s9819_s6 + $0x108] sm:$0xff]  ;;  %v6513_v21 = vld [vmem:[%s9819_s6 + $0x110] sm:$0xff] }
 0x6b1   : > { %6494 = vmatmul.mubr.msk.f32.gmra.mrb[14].mxu0 %vm1193_vm9, %v6490_v7  ;;  %6670 = vmatprep.subr.bf16.mxu0 %v6669_v32  ;;  %v6505_v7 = vld [vmem:[%s9819_s6 + $0xf0] sm:$0xff]  ;;  %v6514_v32 = vld [vmem:[%s9819_s6 + $0x118] sm:$0xff] }
 0x6b2   : > { %v4585_v39 = vsel %vm9889_vm8, %v7426_v9, %v7416_v0  ;;  %v4587_v18 = vsel %vm9890_vm1, %v7427_v25, %v7421_v6  ;;  %4523 = vmatprep.mubr.f32.mxu0 %v9850_v2  ;;  %v4590_v49 = vsel %vm9891_vm15, %v7431_v28, %v7432_v26  ;;  %vm9893_vm8 = vmmov %vm9890_vm1  ;;  %vm9894_vm15 = vcmask 769024  }
 0x6b3   : > { %v6671_v24 = vpack.c.bf16 %v4587_v18, %v4585_v39  ;;  %v7435_v30 = vpop.permute.xlu1 %7434  ;;  %v7440_v31 = vpop.permute.xlu0 %7439 }
 0x6b4   : > { %v7437_v22 = vunpack.i.h.bf16 %v7435_v30  ;;  %v7436_v33 = vunpack.i.l.bf16 %v7435_v30  ;;  %v7442_v47 = vunpack.i.h.bf16 %v7440_v31  ;;  %v7441_v48 = vunpack.i.l.bf16 %v7440_v31 }
 0x6b5   : > { %6499 = vmatmul.mubr.msk.f32.vlgmr.msra.gmra.mrb[8].mxu0 %vm1193_vm9, %v6495_v15 }
 0x6b6   : > { %v4591_v35 = vsel %vm9892_vm3, %v7442_v47, %v7436_v33  ;;  %v4589_v37 = vsel %vm9893_vm8, %v7441_v48, %v7431_v28  ;;  %6672 = vmatpush1.bf16.msra.mxu0 %v6671_v24  ;;  %4529 = vmatprep.mubr.f32.mxu0 %v9850_v2  ;;  %v4592_v23 = vsel %vm9890_vm1, %v7436_v33, %v7437_v22  ;;  %vm9895_vm3 = vmmov %vm9894_vm15 }
 0x6b7   : > { %v6675_v16 = vpack.c.bf16 %v4591_v35, %v4589_v37  ;;  %v6673_v11 = vpack.c.bf16 %v4592_v23, %v4590_v49  ;;  %vm9896_vm8 = vmmov %vm9895_vm3 }
 0x6b8   : > { %vm9897_vm1 = vmmov %vm9895_vm3 }
 0x6b9   : > { %6500 = vmatmul.mubr.msk.f32.gmra.mrb[10].mxu0 %vm1193_vm9, %v6496_v12  ;;  %6674 = vmatprep.subr.bf16.mxu0 %v6673_v11 }
 0x6ba   : > { %6676 = vmatpush1.bf16.msra.mxu0 %v6675_v16  ;;  %4535 = vmatprep.mubr.f32.mxu0 %v9850_v2 }
 0x6bb   : > { %v7445_v51 = vpop.permute.xlu1 %7444  ;;  %v7450_v10 = vpop.permute.xlu0 %7449 }
 0x6bc   : > { %v7447_v43 = vunpack.i.h.bf16 %v7445_v51  ;;  %v7446_v3 = vunpack.i.l.bf16 %v7445_v51  ;;  %v7452_v1 = vunpack.i.h.bf16 %v7450_v10  ;;  %v7451_v45 = vunpack.i.l.bf16 %v7450_v10 }
 0x6bd   : > { %6501 = vmatmul.mubr.msk.f32.gmra.mrb[12].mxu0 %vm1193_vm9, %v6497_v17 }
 0x6be   : > { %4541 = vmatprep.mubr.f32.mxu0 %v9850_v2  ;;  %v4772_v34 = vsel %vm9894_vm15, %v7446_v3, %v7447_v43  ;;  %v4774_v50 = vsel %vm9895_vm3, %v7451_v45, %v7452_v1  ;;  %vm9898_vm15 = vmmov %vm9897_vm1 }
 0x6bf   : > { %v7455_v44 = vpop.permute.xlu1 %7454  ;;  %v7460_v40 = vpop.permute.xlu0 %7459  ;;  %v6677_v20 = vpack.c.bf16 %v4774_v50, %v4772_v34  ;;  %vm9899_vm3 = vmmov %vm9897_vm1 }
 0x6c0   : > { %v7457_v52 = vunpack.i.h.bf16 %v7455_v44  ;;  %v7456_v53 = vunpack.i.l.bf16 %v7455_v44  ;;  %v7462_v54 = vunpack.i.h.bf16 %v7460_v40  ;;  %v7461_v55 = vunpack.i.l.bf16 %v7460_v40 }
 0x6c1   : > { %6502 = vmatmul.mubr.msk.f32.gmra.mrb[14].mxu0 %vm1193_vm9, %v6498_v13  ;;  %6678 = vmatprep.subr.bf16.mxu0 %v6677_v20  ;;  %v6522_v20 = vld [vmem:[%s9814_s1 + $0x4] sm:$0x3] }
 0x6c2   : > { %v4771_v56 = vsel %vm9896_vm8, %v7456_v53, %v7446_v3  ;;  %v4773_v57 = vsel %vm9897_vm1, %v7457_v52, %v7451_v45  ;;  %4677 = vmatprep.mubr.f32.mxu0 %v9850_v2  ;;  %v4776_v61 = vsel %vm9898_vm15, %v7461_v55, %v7462_v54  ;;  %vm9900_vm8 = vmmov %vm9897_vm1 }
 0x6c3   : > { %v6679_v38 = vpack.c.bf16 %v4773_v57, %v4771_v56  ;;  %v7465_v59 = vpop.permute.xlu1 %7464  ;;  %v7470_v27 = vpop.permute.xlu0 %7469  ;;  %v5248_v56 = vrot.slane %v6522_v20, %v7824_v5  ;;  %v5012_v57 = vld [vmem:[%s9814_s1] sm:$0x3] }
 0x6c4   : > { %v7467_v62 = vunpack.i.h.bf16 %v7465_v59  ;;  %v7466_v60 = vunpack.i.l.bf16 %v7465_v59  ;;  %v7472_v46 = vunpack.i.h.bf16 %v7470_v27  ;;  %v7471_v41 = vunpack.i.l.bf16 %v7470_v27 }
 0x6c5   : > { %6507 = vmatmul.mubr.msk.f32.vlgmr.msra.gmra.mrb[8].mxu0 %vm1193_vm9, %v6503_v58  ;;  %v9228_v58 = vrot.slane %v5012_v57, %v7822_v4 }
 0x6c6   : > { %v4777_v63 = vsel %vm9899_vm3, %v7472_v46, %v7466_v60  ;;  %v4775_v8 = vsel %vm9900_vm8, %v7471_v41, %v7461_v55  ;;  %6680 = vmatpush1.bf16.msra.mxu0 %v6679_v38  ;;  %4683 = vmatprep.mubr.f32.mxu0 %v9850_v2  ;;  %v4778_v0 = vsel %vm9897_vm1, %v7466_v60, %v7467_v62 }
 0x6c7   : > { %v6683_v29 = vpack.c.bf16 %v4777_v63, %v4775_v8  ;;  %v6681_v6 = vpack.c.bf16 %v4778_v0, %v4776_v61  ;;  %v5244_v55 = vrot.slane %v6522_v20, %v7822_v4  ;;  %v5021_v38 = vrot.slane %v5012_v57, %v7824_v5 }
 0x6c9   : > { %6508 = vmatmul.mubr.msk.f32.gmra.mrb[10].mxu0 %vm1193_vm9, %v6504_v36  ;;  %6682 = vmatprep.subr.bf16.mxu0 %v6681_v6 }
 0x6ca   : > { %6684 = vmatpush1.bf16.msra.mxu0 %v6683_v29  ;;  %4689 = vmatprep.mubr.f32.mxu0 %v9850_v2 }
 0x6cd   : > { %6509 = vmatmul.mubr.msk.f32.gmra.mrb[12].mxu0 %vm1193_vm9, %v6505_v7 }
 0x6ce   : > { %4695 = vmatprep.mubr.f32.mxu0 %v9850_v2 }
 0x6d1   : > { %6510 = vmatmul.mubr.msk.f32.gmra.mrb[14].mxu0 %vm1193_vm9, %v6506_v42 }
 0x6d2   : > { %4863 = vmatprep.mubr.f32.mxu0 %v9850_v2 }
 0x6d4   : > { %v4903_v25 = vpop.permute.xlu1 %4902  ;;  %v4908_v15 = vpop.permute.xlu0 %4907 }
 0x6d5   : > { %6515 = vmatmul.mubr.msk.f32.vlgmr.msra.gmra.mrb[8].mxu0 %vm1193_vm9, %v6511_v14 }
 0x6d6   : > { %4869 = vmatprep.mubr.f32.mxu0 %v9850_v2 }
 0x6d8   : > { %v4913_v35 = vpop.permute.xlu1 %4912  ;;  %v4918_v43 = vpop.permute.xlu0 %4917 }
 0x6d9   : > { %6516 = vmatmul.mubr.msk.f32.gmra.mrb[10].mxu0 %vm1193_vm9, %v6512_v19 }
 0x6da   : > { %4875 = vmatprep.mubr.f32.mxu0 %v9850_v2 }
 0x6dd   : > { %6517 = vmatmul.mubr.msk.f32.gmra.mrb[12].mxu0 %vm1193_vm9, %v6513_v21 }
 0x6de   : > { %4881 = vmatprep.mubr.f32.mxu0 %v9850_v2 }
 0x6e1   : > { %6518 = vmatmul.mubr.msk.f32.gmra.mrb[14].mxu0 %vm1193_vm9, %v6514_v32 }
 0x7a8   : > { %v4865_v9 = vpop.f32.mrb[8].mxu0 }
 0x7a9   : > { %v4920_v26 = vadd.f32 %v4903_v25, %v4865_v9  ;;  %v4867_v28 = vpop.f32.mrb[9].mxu0 }
 0x7aa   : > { %v4921_v39 = vadd.f32 %v4903_v25, %v4867_v28 }
 0x7ab   : > { %vm4928_vm15 = vcmp.gt.f32.partialorder %v4920_v26, 0.0  ;;  %v4936_v18 = vmul.f32 0.01, %v4920_v26 }
 0x7ac   : > { %vm4929_vm3 = vcmp.gt.f32.partialorder %v4921_v39, 0.0  ;;  %v4937_v24 = vmul.f32 0.01, %v4921_v39  ;;  %v4871_v30 = vpop.f32.mrb[10].mxu0 }
 0x7ad   : > { %v4922_v31 = vadd.f32 %v4908_v15, %v4871_v30  ;;  %v4873_v22 = vpop.f32.mrb[11].mxu0  ;;  %v4944_v33 = vsel %vm4928_vm15, %v4920_v26, %v4936_v18 }
 0x7ae   : > { %v4923_v47 = vadd.f32 %v4908_v15, %v4873_v22  ;;  %4960 = vrot.lane.b32.xlu1 %v4944_v33, %s7723_s21  ;;  %v4945_v48 = vsel %vm4929_vm3, %v4921_v39, %v4937_v24 }
 0x7af   : > { %vm4930_vm8 = vcmp.gt.f32.partialorder %v4922_v31, 0.0  ;;  %v4938_v49 = vmul.f32 0.01, %v4922_v31  ;;  %4962 = vrot.lane.b32.xlu0 %v4945_v48, %s7723_s21 }
 0x7b0   : > { %vm4931_vm1 = vcmp.gt.f32.partialorder %v4923_v47, 0.0  ;;  %v4939_v37 = vmul.f32 0.01, %v4923_v47  ;;  %v4877_v12 = vpop.f32.mrb[12].mxu0 }
 0x7b1   : > { %v4924_v23 = vadd.f32 %v4913_v35, %v4877_v12  ;;  %v4879_v16 = vpop.f32.mrb[13].mxu0  ;;  %v4946_v11 = vsel %vm4930_vm8, %v4922_v31, %v4938_v49 }
 0x7b2   : > { %v4925_v17 = vadd.f32 %v4913_v35, %v4879_v16  ;;  %4964 = vrot.lane.b32.xlu1 %v4946_v11, %s7723_s21  ;;  %v4947_v51 = vsel %vm4931_vm1, %v4923_v47, %v4939_v37 }
 0x7b3   : > { %vm4932_vm15 = vcmp.gt.f32.partialorder %v4924_v23, 0.0  ;;  %v4940_v10 = vmul.f32 0.01, %v4924_v23  ;;  %4966 = vrot.lane.b32.xlu0 %v4947_v51, %s7723_s21 }
 0x7b4   : > { %vm4933_vm3 = vcmp.gt.f32.partialorder %v4925_v17, 0.0  ;;  %v4941_v3 = vmul.f32 0.01, %v4925_v17  ;;  %v4883_v1 = vpop.f32.mrb[14].mxu0 }
 0x7b5   : > { %v4926_v45 = vadd.f32 %v4918_v43, %v4883_v1  ;;  %v4885_v13 = vpop.f32.mrb[15].mxu0  ;;  %v4948_v34 = vsel %vm4932_vm15, %v4924_v23, %v4940_v10 }
 0x7b6   : > { %v4927_v50 = vadd.f32 %v4918_v43, %v4885_v13  ;;  %4968 = vrot.lane.b32.xlu1 %v4948_v34, %s7723_s21  ;;  %v4949_v44 = vsel %vm4933_vm3, %v4925_v17, %v4941_v3 }
 0x7b7   : > { %vm4934_vm8 = vcmp.gt.f32.partialorder %v4926_v45, 0.0  ;;  %v4942_v40 = vmul.f32 0.01, %v4926_v45  ;;  %4970 = vrot.lane.b32.xlu0 %v4949_v44, %s7723_s21 }
 0x7b8   : > { %vm4935_vm1 = vcmp.gt.f32.partialorder %v4927_v50, 0.0  ;;  %v4943_v52 = vmul.f32 0.01, %v4927_v50 }
 0x7b9   : > { %v4950_v53 = vsel %vm4934_vm8, %v4926_v45, %v4942_v40 }
 0x7ba   : > { %4972 = vrot.lane.b32.xlu1 %v4950_v53, %s7723_s21  ;;  %v4951_v54 = vsel %vm4935_vm1, %v4927_v50, %v4943_v52 }
 0x7bb   : > { %4974 = vrot.lane.b32.xlu0 %v4951_v54, %s7723_s21  ;;  %s9901_s21 = smov 18  }
 0x7be   : > { %5249 = vrot.lane.b32.xlu1 %v5244_v55, %s7724_s22 }
 0x7bf   : > { %5251 = vrot.lane.b32.xlu0 %v5248_v56, %s7724_s22  ;;  %s9903_s22 = smov 127  }
 0x7c2   : > { %5399 = vrot.lane.b32.xlu1 %v9228_v58, %s7725_s25 }
 0x7c3   : > { %5401 = vrot.lane.b32.xlu0 %v5021_v38, %s7725_s25  ;;  %s9904_s25 = smov 126  }
 0x7c6   : > { %5667 = vrot.lane.b32.xlu1 %v5244_v55, %s9901_s21 }
 0x7c7   : > { %5669 = vrot.lane.b32.xlu0 %v5248_v56, %s9901_s21 }
 0x7ca   : > { %5817 = vrot.lane.b32.xlu1 %v9228_v58, %s9902_s19 }
 0x7cb   : > { %5819 = vrot.lane.b32.xlu0 %v5021_v38, %s9902_s19 }
 0x7ce   : > { %6087 = vrot.lane.b32.xlu1 %v5248_v56, %s9879_s24 }
 0x7cf   : > { %6085 = vrot.lane.b32.xlu0 %v5244_v55, %s9879_s24 }
 0x820   : > { %v4961_v4 = vpop.permute.xlu1 %4960 }
 0x821   : > { %4992 = vst.msk [vmem:[#allocation2] sm:$0xff] %vm1689_vm13, %v4961_v4  ;;  %v4963_v5 = vpop.permute.xlu0 %4962 }
 0x822   : > { %v9244_v59 = vsel %vm380_vm2, %v4961_v4, %v4963_v5  ;;  %4994 = vst.msk [vmem:[#allocation2 + $0x10] sm:$0xff] %vm380_vm2, %v4963_v5 }
 0x823   : > { %4993 = vst [vmem:[#allocation2 + $0x8] sm:$0xff] %v9244_v59  ;;  %v9254_v46 = vmul.f32 %v5021_v38, %v9244_v59 }
 0x824   : > { %v4965_v27 = vpop.permute.xlu1 %4964 }
 0x825   : > { %4995 = vst.msk [vmem:[#allocation2 + $0x18] sm:$0xff] %vm1689_vm13, %v4965_v27  ;;  %v4967_v62 = vpop.permute.xlu0 %4966 }
 0x826   : > { %v9250_v60 = vsel %vm380_vm2, %v4965_v27, %v4967_v62  ;;  %4997 = vst.msk [vmem:[#allocation2 + $0x28] sm:$0xff] %vm380_vm2, %v4967_v62 }
 0x827   : > { %v9257_v41 = vmul.f32 %v5021_v38, %v9250_v60 }
 0x828   : > { %v4969_v61 = vpop.permute.xlu1 %4968  ;;  %v9272_v6 = vld [vmem:[#allocation2] sm:$0xff] }
 0x829   : > { %4998 = vst.msk [vmem:[#allocation2 + $0x30] sm:$0xff] %vm1689_vm13, %v4969_v61  ;;  %v4971_v63 = vpop.permute.xlu0 %4970  ;;  %v9260_v8 = vld [vmem:[#allocation2 + $0x10] sm:$0xff]  ;;  %v9287_v32 = vmul.f32 %v9228_v58, %v9272_v6 }
 0x82a   : > { %v9265_v0 = vsel %vm380_vm2, %v4969_v61, %v4971_v63  ;;  %5000 = vst.msk [vmem:[#allocation2 + $0x40] sm:$0xff] %vm380_vm2, %v4971_v63  ;;  %v9270_v29 = vpack.i.bf16 %v9260_v8, %v9244_v59 }
 0x82b   : > { %v9304_v39 = vmul.f32 %v5021_v38, %v9265_v0 }
 0x82c   : > { %v4973_v7 = vpop.permute.xlu1 %4972  ;;  %7474 = vrot.lane.b32.xlu1 %v9270_v29, %s9903_s22  ;;  %v9276_v42 = vld [vmem:[#allocation2 + $0x18] sm:$0xff] }
 0x82d   : > { %5001 = vst.msk [vmem:[#allocation2 + $0x48] sm:$0xff] %vm1689_vm13, %v4973_v7  ;;  %v4975_v14 = vpop.permute.xlu0 %4974  ;;  %v9279_v19 = vld [vmem:[#allocation2 + $0x28] sm:$0xff]  ;;  %v9283_v21 = vpack.i.bf16 %v9276_v42, %v9272_v6  ;;  %v9291_v25 = vmul.f32 %v9228_v58, %v9276_v42 }
 0x82e   : > { %v9294_v9 = vsel %vm380_vm2, %v4973_v7, %v4975_v14  ;;  %5003 = vst.msk [vmem:[#allocation2 + $0x58] sm:$0xff] %vm380_vm2, %v4975_v14  ;;  %v9299_v26 = vpack.i.bf16 %v9279_v19, %v9250_v60 }
 0x82f   : > { %v9307_v18 = vmul.f32 %v5021_v38, %v9294_v9 }
 0x830   : > { %v9309_v15 = vpop.permute.xlu1 %5249  ;;  %7479 = vrot.lane.b32.xlu1 %v9270_v29, %s9878_s11  ;;  %7499 = vrot.lane.b32.xlu0 %v9299_v26, %s9903_s22  ;;  %v9383_v56 = vld [vmem:[#allocation2 + $0x30] sm:$0xff] }
 0x831   : > { %v9315_v24 = vpop.permute.xlu0 %5251  ;;  %v5257_v45 = vmul.f32 %v9309_v15, %v9272_v6  ;;  %v5260_v13 = vmul.f32 %v9309_v15, %v9276_v42  ;;  %v9363_v34 = vld [vmem:[#allocation2 + $0x40] sm:$0xff]  ;;  %v5263_v28 = vmul.f32 %v9309_v15, %v9383_v56 }
 0x832   : > { %v9322_v31 = vsel %vm648_vm4, %v9309_v15, %v9315_v24  ;;  %v5262_v22 = vmul.f32 %v9315_v24, %v9279_v19  ;;  %v5259_v47 = vmul.f32 %v9315_v24, %v9260_v8  ;;  %v9373_v40 = vpack.i.bf16 %v9363_v34, %v9265_v0 }
 0x833   : > { %v5261_v33 = vmul.f32 %v9322_v31, %v9250_v60  ;;  %v5258_v49 = vmul.f32 %v9322_v31, %v9244_v59  ;;  %v7503_v54 = vpack.i.bf16 %v5260_v13, %v5257_v45  ;;  %v5265_v38 = vmul.f32 %v9315_v24, %v9363_v34 }
 0x834   : > { %v9330_v48 = vpop.permute.xlu1 %5399  ;;  %7484 = vrot.lane.b32.xlu1 %v9283_v21, %s9903_s22  ;;  %7514 = vrot.lane.b32.xlu0 %v9299_v26, %s9878_s11  ;;  %v9375_v20 = vld [vmem:[#allocation2 + $0x48] sm:$0xff]  ;;  %v5264_v5 = vmul.f32 %v9322_v31, %v9265_v0 }
 0x835   : > { %v9338_v35 = vpop.permute.xlu0 %5401  ;;  %v7518_v16 = vpack.i.bf16 %v5262_v22, %v5261_v33  ;;  %v7488_v17 = vpack.i.bf16 %v5259_v47, %v5258_v49  ;;  %v5407_v52 = vmul.f32 %v9330_v48, %v9272_v6  ;;  %v5410_v53 = vmul.f32 %v9330_v48, %v9276_v42  ;;  %v9396_v27 = vld [vmem:[#allocation2 + $0x58] sm:$0xff] }
 0x836   : > { %v9343_v37 = vsel %vm788_vm5, %v9330_v48, %v9338_v35  ;;  %v5409_v12 = vmul.f32 %v9338_v35, %v9260_v8  ;;  %v5412_v23 = vmul.f32 %v9338_v35, %v9279_v19  ;;  %v9392_v4 = vpack.i.bf16 %v9375_v20, %v9383_v56 }
 0x837   : > { %v5411_v51 = vmul.f32 %v9343_v37, %v9250_v60  ;;  %v5408_v10 = vmul.f32 %v9343_v37, %v9244_v59  ;;  %v7508_v63 = vpack.i.bf16 %v5410_v53, %v5407_v52  ;;  %v5415_v33 = vmul.f32 %v9338_v35, %v9363_v34 }
 0x838   : > { %v9349_v11 = vpop.permute.xlu1 %5667  ;;  %7519 = vrot.lane.b32.xlu0 %v7518_v16, %s9904_s25  ;;  %7489 = vrot.lane.b32.xlu1 %v7488_v17, %s9904_s25  ;;  %v9426_v49 = vmul.f32 %v9228_v58, %v9383_v56  ;;  %v9434_v16 = vpack.i.bf16 %v9396_v27, %v9294_v9  ;;  %v5414_v17 = vmul.f32 %v9343_v37, %v9265_v0 }
 0x839   : > { %v9356_v43 = vpop.permute.xlu0 %5669  ;;  %v7523_v3 = vpack.i.bf16 %v5412_v23, %v5411_v51  ;;  %v7493_v1 = vpack.i.bf16 %v5409_v12, %v5408_v10  ;;  %v7538_v23 = vpack.i.bf16 %v5265_v38, %v5264_v5  ;;  %v9465_v53 = vmul.f32 %v9228_v58, %v9375_v20 }
 0x83a   : > { %v9421_v47 = vsel %vm1053_vm6, %v9349_v11, %v9356_v43  ;;  %v7543_v38 = vpack.i.bf16 %v5415_v33, %v5414_v17  ;;  %v5677_v58 = vmul.f32 %v9356_v43, %v9260_v8  ;;  %v5680_v33 = vmul.f32 %v9356_v43, %v9279_v19 }
 0x83b   : > { %v5679_v17 = vmul.f32 %v9421_v47, %v9250_v60  ;;  %v5678_v2 = vmul.f32 %v9349_v11, %v9276_v42  ;;  %v5418_v36 = vmul.f32 %v9338_v35, %v9396_v27 }
 0x83c   : > { %v9365_v50 = vpop.permute.xlu1 %5817  ;;  %7524 = vrot.lane.b32.xlu0 %v7523_v3, %s9877_s29  ;;  %7494 = vrot.lane.b32.xlu1 %v7493_v1, %s9877_s29 }
 0x83d   : > { %v9368_v44 = vpop.permute.xlu0 %5819 }
 0x840   : > { %7529 = vrot.lane.b32.xlu0 %v9373_v40, %s9903_s22  ;;  %v9385_v57 = vpop.permute.xlu1 %6087  ;;  %7504 = vrot.lane.b32.xlu1 %v7503_v54, %s9904_s25 }
 0x841   : > { %v6086_v55 = vpop.permute.xlu0 %6085  ;;  %v9430_v12 = vmul.f32 %v9385_v57, %v9260_v8  ;;  %v9440_v51 = vmul.f32 %v9385_v57, %v9279_v19  ;;  %v9454_v45 = vmul.f32 %v9385_v57, %v9363_v34 }
 0x842   : > { %v9399_v62 = vmul.f32 %v6086_v55, %v9272_v6  ;;  %v9402_v61 = vmul.f32 %v6086_v55, %v9276_v42  ;;  %v9406_v7 = vsel %vm362_vm0, %v6086_v55, %v9385_v57  ;;  %v9409_v14 = vmul.f32 %v6086_v55, %v9383_v56 }
 0x843   : > { %v9412_v22 = vmul.f32 %v6086_v55, %v9375_v20  ;;  %v9444_v10 = vmul.f32 %v9406_v7, %v9244_v59  ;;  %v9448_v3 = vmul.f32 %v9406_v7, %v9250_v60  ;;  %v9459_v13 = vmul.f32 %v9406_v7, %v9265_v0 }
 0x844   : > { %7534 = vrot.lane.b32.xlu0 %v9392_v4, %s9903_s22  ;;  %7509 = vrot.lane.b32.xlu1 %v7508_v63, %s9877_s29  ;;  %v7693_v1 = vpack.i.bf16 %v9402_v61, %v9399_v62  ;;  %v5268_v63 = vmul.f32 %v9315_v24, %v9396_v27  ;;  %vm9911_vm0 = vcmask 785408  }
 0x845   : > { %v7683_v54 = vpack.i.bf16 %v9430_v12, %v9444_v10  ;;  %v7688_v55 = vpack.i.bf16 %v9440_v51, %v9448_v3  ;;  %v7698_v5 = vpack.i.bf16 %v9454_v45, %v9459_v13  ;;  %vm9912_vm2 = vmmov %vm9911_vm0 }
 0x846   : > { %vm9913_vm4 = vmmov %vm9911_vm0 }
 0x847   : > { %vm9914_vm5 = vmmov %vm9911_vm0 }
 0x848   : > { %7539 = vrot.lane.b32.xlu0 %v7538_v23, %s9904_s25  ;;  %7549 = vrot.lane.b32.xlu1 %v9434_v16, %s9903_s22  ;;  %v5676_v23 = vmul.f32 %v9421_v47, %v9244_v59  ;;  %vm9915_vm6 = vmmov %vm9911_vm0 }
 0x84a   : > { %v7568_v30 = vpack.i.bf16 %v5677_v58, %v5676_v23  ;;  %v7573_v58 = vpack.i.bf16 %v5680_v33, %v5679_v17  ;;  %v5675_v23 = vmul.f32 %v9349_v11, %v9272_v6  ;;  %v5416_v33 = vmul.f32 %v9330_v48, %v9375_v20 }
 0x84c   : > { %7544 = vrot.lane.b32.xlu0 %v7543_v38, %s9877_s29  ;;  %7554 = vrot.lane.b32.xlu1 %v9283_v21, %s9878_s11  ;;  %v5267_v38 = vmul.f32 %v9322_v31, %v9294_v9  ;;  %v5413_v31 = vmul.f32 %v9330_v48, %v9383_v56  ;;  %v7598_v52 = vpack.i.bf16 %v5678_v2, %v5675_v23 }
 0x84d   : > { %v5827_v2 = vmul.f32 %v9368_v44, %v9260_v8  ;;  %v5825_v23 = vmul.f32 %v9365_v50, %v9272_v6  ;;  %v5828_v8 = vmul.f32 %v9365_v50, %v9276_v42  ;;  %v5833_v6 = vmul.f32 %v9368_v44, %v9363_v34 }
 0x84e   : > { %v7593_v24 = vpack.i.bf16 %v5268_v63, %v5267_v38  ;;  %v5417_v63 = vmul.f32 %v9343_v37, %v9294_v9  ;;  %v5683_v38 = vmul.f32 %v9356_v43, %v9363_v34  ;;  %v7583_v48 = vpack.i.bf16 %v5416_v33, %v5413_v31 }
 0x84f   : > { %v7628_v33 = vpack.i.bf16 %v5828_v8, %v5825_v23  ;;  %v5834_v34 = vmul.f32 %v9365_v50, %v9375_v20 }
 0x850   : > { %7559 = vrot.lane.b32.xlu0 %v9373_v40, %s9878_s11  ;;  %7569 = vrot.lane.b32.xlu1 %v7568_v30, %s9852_s18  ;;  %v5266_v30 = vmul.f32 %v9309_v15, %v9375_v20  ;;  %v5821_v15 = vsel %vm1193_vm9, %v9365_v50, %v9368_v44  ;;  %v7613_v35 = vpack.i.bf16 %v5418_v36, %v5417_v63 }
 0x851   : > { %v5826_v37 = vmul.f32 %v5821_v15, %v9244_v59  ;;  %v5830_v59 = vmul.f32 %v9368_v44, %v9279_v19  ;;  %v5829_v31 = vmul.f32 %v5821_v15, %v9250_v60  ;;  %v5685_v19 = vmul.f32 %v9421_v47, %v9294_v9 }
 0x852   : > { %v7578_v17 = vpack.i.bf16 %v5266_v30, %v5263_v28  ;;  %v5682_v28 = vmul.f32 %v9421_v47, %v9265_v0  ;;  %v5684_v30 = vmul.f32 %v9349_v11, %v9375_v20  ;;  %v5831_v60 = vmul.f32 %v9365_v50, %v9383_v56 }
 0x853   : > { %v7618_v36 = vpack.i.bf16 %v5827_v2, %v5826_v37  ;;  %v7623_v42 = vpack.i.bf16 %v5830_v59, %v5829_v31  ;;  %v5835_v47 = vmul.f32 %v5821_v15, %v9294_v9 }
 0x854   : > { %7564 = vrot.lane.b32.xlu0 %v9392_v4, %s9878_s11  ;;  %7589 = vrot.lane.b32.xlu1 %v9434_v16, %s9878_s11 }
 0x858   : > { %7574 = vrot.lane.b32.xlu0 %v7573_v58, %s9852_s18  ;;  %7594 = vrot.lane.b32.xlu1 %v7593_v24, %s9904_s25  ;;  %v7603_v58 = vpack.i.bf16 %v5683_v38, %v5682_v28 }
 0x85c   : > { %7579 = vrot.lane.b32.xlu0 %v7578_v17, %s9904_s25  ;;  %7599 = vrot.lane.b32.xlu1 %v7598_v52, %s9852_s18  ;;  %v5681_v52 = vmul.f32 %v9349_v11, %v9383_v56  ;;  %v5832_v11 = vmul.f32 %v5821_v15, %v9265_v0  ;;  %v5686_v17 = vmul.f32 %v9356_v43, %v9396_v27 }
 0x85d   : > { %v7638_v0 = vpack.i.bf16 %v5834_v34, %v5831_v60  ;;  %v5836_v43 = vmul.f32 %v9368_v44, %v9396_v27  ;;  %v9905_v44 = vpack.i.bf16 %v9412_v22, %v9409_v14 }
 0x85e   : > { %v7608_v24 = vpack.i.bf16 %v5684_v30, %v5681_v52  ;;  %v7633_v63 = vpack.i.bf16 %v5833_v6, %v5832_v11  ;;  %v7653_v38 = vpack.i.bf16 %v5686_v17, %v5685_v19 }
 0x860   : > { %7584 = vrot.lane.b32.xlu0 %v7583_v48, %s9877_s29  ;;  %7614 = vrot.lane.b32.xlu1 %v7613_v35, %s9877_s29 }
 0x864   : > { %7604 = vrot.lane.b32.xlu0 %v7603_v58, %s9852_s18  ;;  %7619 = vrot.lane.b32.xlu1 %v7618_v36, %s9853_s20 }
 0x868   : > { %7609 = vrot.lane.b32.xlu0 %v7608_v24, %s9852_s18  ;;  %7629 = vrot.lane.b32.xlu1 %v7628_v33, %s9853_s20 }
 0x86c   : > { %7624 = vrot.lane.b32.xlu0 %v7623_v42, %s9853_s20  ;;  %7644 = vrot.lane.b32.xlu1 %v9270_v29, %s9854_s12  ;;  %v7668_v29 = vpack.i.bf16 %v5836_v43, %v5835_v47  ;;  %v9906_v43 = vpack.c.bf16 %v9257_v41, %v9254_v46  ;;  %v9909_v46 = vpack.c.bf16 %v9307_v18, %v9304_v39 }
 0x86d   : > { %v9910_v39 = vpack.c.bf16 %v9465_v53, %v9426_v49 }
 0x870   : > { %7634 = vrot.lane.b32.xlu0 %v7633_v63, %s9853_s20  ;;  %7654 = vrot.lane.b32.xlu1 %v7653_v38, %s9852_s18  ;;  %v6519_v38 = vld [vmem:[%s9821_s8 + $0x4] sm:$0xf] }
 0x874   : > { %7639 = vrot.lane.b32.xlu0 %v7638_v0, %s9853_s20  ;;  %7659 = vrot.lane.b32.xlu1 %v9283_v21, %s9854_s12  ;;  %v6103_v21 = vmul.f32 %v9406_v7, %v9294_v9  ;;  %v6235_v9 = vld [vmem:[%s9822_s9] sm:$0xf] }
 0x878   : > { %7649 = vrot.lane.b32.xlu0 %v9299_v26, %s9854_s12  ;;  %7669 = vrot.lane.b32.xlu1 %v7668_v29, %s9853_s20  ;;  %v6104_v26 = vmul.f32 %v9385_v57, %v9396_v27 }
 0x87a   : > { %v7703_v50 = vpack.i.bf16 %v6104_v26, %v6103_v21  ;;  %v9907_v21 = vpack.c.bf16 %v9291_v25, %v9287_v32 }
 0x87c   : > { %7664 = vrot.lane.b32.xlu0 %v9373_v40, %s9854_s12  ;;  %7674 = vrot.lane.b32.xlu1 %v9434_v16, %s9854_s12 }
 0x880   : > { %7679 = vrot.lane.b32.xlu0 %v9392_v4, %s9854_s12  ;;  %7684 = vrot.lane.b32.xlu1 %v7683_v54, %s9855_s16  ;;  %s9935_s12 = sshll.u32 %s9937_s14, 3 }
 0x881   : > { %s359_s11 = scalar_lea.vmem %s9823_s10, %s9935_s12 }
 0x884   : > { %7689 = vrot.lane.b32.xlu0 %v7688_v55, %s9855_s16  ;;  %7694 = vrot.lane.b32.xlu1 %v7693_v1, %s9855_s16 }
 0x888   : > { %7699 = vrot.lane.b32.xlu0 %v7698_v5, %s9855_s16  ;;  %7704 = vrot.lane.b32.xlu1 %v7703_v50, %s9855_s16 }
 0x88c   : > { %7709 = vrot.lane.b32.xlu0 %v9905_v44, %s9855_s16  ;;  %6238 = vperm.xlu1 %6992, %v6235_v9   ;;  %v9908_v44 = vmov 0.0  }
 0x89e   : > { %v7475_v40 = vpop.permute.xlu1 %7474 }
 0x89f   : > { %v7477_v20 = vunpack.i.h.bf16 %v7475_v40  ;;  %v7476_v56 = vunpack.i.l.bf16 %v7475_v40 }
 0x8a1   : > { %v5076_v61 = vsel %vm425_vm14, %v7476_v56, %v7477_v20 }
 0x8a2   : > { %v9605_v57 = vpop.permute.xlu1 %7479  ;;  %v7500_v4 = vpop.permute.xlu0 %7499 }
 0x8a3   : > { %v7502_v27 = vunpack.i.h.bf16 %v7500_v4  ;;  %v7501_v62 = vunpack.i.l.bf16 %v7500_v4 }
 0x8a5   : > { %v5078_v7 = vsel %vm425_vm14, %v7501_v62, %v7502_v27 }
 0x8a6   : > { %v7485_v12 = vpop.permute.xlu1 %7484  ;;  %v9609_v16 = vpop.permute.xlu0 %7514  ;;  %v6685_v51 = vpack.c.bf16 %v5078_v7, %v5076_v61  ;;  %v5032_v7 = vld [vmem:[%s9821_s8] sm:$0xf] }
 0x8a7   : > { %v7487_v10 = vunpack.i.h.bf16 %v7485_v12  ;;  %v7486_v14 = vunpack.i.l.bf16 %v7485_v12 }
 0x8a8   : > { %6686 = vmatprep.subr.bf16.mxu1 %v6685_v51 }
 0x8a9   : > { %v5075_v22 = vsel %vm425_vm14, %v7486_v14, %v7476_v56  ;;  %v5077_v3 = vsel %vm425_vm14, %v7487_v10, %v7501_v62 }
 0x8aa   : > { %v6687_v1 = vpack.c.bf16 %v5077_v3, %v5075_v22  ;;  %v7520_v45 = vpop.permute.xlu0 %7519  ;;  %v7490_v13 = vpop.permute.xlu1 %7489 }
 0x8ab   : > { %v7492_v17 = vunpack.i.h.bf16 %v7490_v13  ;;  %v7491_v19 = vunpack.i.l.bf16 %v7490_v13  ;;  %v7522_v60 = vunpack.i.h.bf16 %v7520_v45  ;;  %v7521_v34 = vunpack.i.l.bf16 %v7520_v45 }
 0x8ac   : > { %6688 = vmatpush1.bf16.msra.mxu1 %v6687_v1 }
 0x8ad   : > { %v5308_v50 = vsel %vm670_vm7, %v7491_v19, %v7492_v17  ;;  %v5310_v9 = vsel %vm670_vm7, %v7521_v34, %v7522_v60  ;;  %v7482_v17 = vunpack.i.h.bf16 %v9605_v57 }
 0x8ae   : > { %v9613_v54 = vpop.permute.xlu0 %7524  ;;  %v9615_v55 = vpop.permute.xlu1 %7494  ;;  %v6701_v56 = vpack.c.bf16 %v5310_v9, %v5308_v50 }
 0x8af   : > { %v7527_v41 = vunpack.i.h.bf16 %v9613_v54  ;;  %v7526_v20 = vunpack.i.l.bf16 %v9613_v54  ;;  %v7497_v4 = vunpack.i.h.bf16 %v9615_v55  ;;  %v7496_v27 = vunpack.i.l.bf16 %v9615_v55 }
 0x8b1   : > { %v5460_v22 = vsel %vm810_vm10, %v7526_v20, %v7527_v41  ;;  %v5458_v45 = vsel %vm810_vm10, %v7496_v27, %v7497_v4 }
 0x8b2   : > { %v7530_v5 = vpop.permute.xlu0 %7529  ;;  %v7505_v15 = vpop.permute.xlu1 %7504 }
 0x8b3   : > { %v7532_v2 = vunpack.i.h.bf16 %v7530_v5  ;;  %v7531_v35 = vunpack.i.l.bf16 %v7530_v5  ;;  %v7507_v47 = vunpack.i.h.bf16 %v7505_v15  ;;  %v7506_v29 = vunpack.i.l.bf16 %v7505_v15 }
 0x8b5   : > { %v5080_v31 = vsel %vm425_vm14, %v7531_v35, %v7532_v2  ;;  %v5307_v32 = vsel %vm670_vm7, %v7506_v29, %v7491_v19  ;;  %v5309_v25 = vsel %vm670_vm7, %v7507_v47, %v7521_v34  ;;  %v7481_v19 = vunpack.i.l.bf16 %v9605_v57 }
 0x8b6   : > { %v7535_v48 = vpop.permute.xlu0 %7534  ;;  %v9617_v28 = vpop.permute.xlu1 %7509  ;;  %v6703_v51 = vpack.c.bf16 %v5309_v25, %v5307_v32 }
 0x8b7   : > { %v7536_v37 = vunpack.i.l.bf16 %v7535_v48  ;;  %v7537_v58 = vunpack.i.h.bf16 %v7535_v48  ;;  %v7512_v3 = vunpack.i.h.bf16 %v9617_v28  ;;  %v7511_v13 = vunpack.i.l.bf16 %v9617_v28 }
 0x8b8   : > { %v5576_v25 = vsel %vm935_vm11, %v7481_v19, %v7482_v17 }
 0x8b9   : > { %v5079_v36 = vsel %vm425_vm14, %v7536_v37, %v7531_v35  ;;  %v5459_v28 = vsel %vm810_vm10, %v7512_v3, %v7526_v20 }
 0x8ba   : > { %v9619_v52 = vpop.permute.xlu0 %7539  ;;  %v7550_v30 = vpop.permute.xlu1 %7549 }
 0x8bb   : > { %v7552_v23 = vunpack.i.h.bf16 %v7550_v30  ;;  %v7551_v8 = vunpack.i.l.bf16 %v7550_v30  ;;  %v7542_v62 = vunpack.i.h.bf16 %v9619_v52  ;;  %v7541_v61 = vunpack.i.l.bf16 %v9619_v52 }
 0x8bd   : > { %v5081_v59 = vsel %vm425_vm14, %v7537_v58, %v7551_v8  ;;  %v5082_v33 = vsel %vm425_vm14, %v7551_v8, %v7552_v23  ;;  %v5312_v53 = vsel %vm670_vm7, %v7541_v61, %v7542_v62  ;;  %v6709_v58 = vpack.c.bf16 %v5460_v22, %v5458_v45 }
 0x8be   : > { %v9623_v24 = vpop.permute.xlu0 %7544  ;;  %v6691_v6 = vpack.c.bf16 %v5081_v59, %v5079_v36  ;;  %v9627_v42 = vpop.permute.xlu1 %7554  ;;  %v6689_v11 = vpack.c.bf16 %v5082_v33, %v5080_v31  ;;  %v5457_v23 = vsel %vm810_vm10, %v7511_v13, %v7496_v27  ;;  %v7517_v31 = vunpack.i.h.bf16 %v9609_v16 }
 0x8bf   : > { %v7547_v35 = vunpack.i.h.bf16 %v9623_v24  ;;  %v7546_v37 = vunpack.i.l.bf16 %v9623_v24  ;;  %v7516_v33 = vunpack.i.l.bf16 %v9609_v16  ;;  %v6523_v24 = vld [vmem:[%s9821_s8 + $0x8] sm:$0xf]  ;;  %v7556_v60 = vunpack.i.l.bf16 %v9627_v42 }
 0x8c0   : > { %6690 = vmatprep.subr.bf16.mxu1 %v6689_v11  ;;  %v6711_v34 = vpack.c.bf16 %v5459_v28, %v5457_v23 }
 0x8c1   : > { %6692 = vmatpush1.bf16.msra.mxu1 %v6691_v6  ;;  %v5462_v16 = vsel %vm810_vm10, %v7546_v37, %v7547_v35  ;;  %v5575_v41 = vsel %vm935_vm11, %v7556_v60, %v7481_v19 }
 0x8c2   : > { %v9629_v63 = vpop.permute.xlu0 %7559  ;;  %v9634_v0 = vpop.permute.xlu1 %7569  ;;  %6694 = vmatprep.subr.bf16.mxu1 %v9906_v43 }
 0x8c3   : > { %v7562_v20 = vunpack.i.h.bf16 %v9629_v63  ;;  %v7561_v32 = vunpack.i.l.bf16 %v9629_v63  ;;  %v6525_v63 = vld [vmem:[%s9821_s8 + $0xc] sm:$0xf] }
 0x8c4   : > { %6520 = vmatmul.mubr.msk.f32.vlgmr.msra.gmra.mrb[20].mxu1 %vm1193_vm9, %v6519_v38  ;;  %v7557_v38 = vunpack.i.h.bf16 %v9627_v42  ;;  %v5578_v42 = vsel %vm935_vm11, %v7516_v33, %v7517_v31 }
 0x8c5   : > { %6696 = vmatpush1.bf16.msra.mxu1 %v9907_v21  ;;  %5232 = vmatprep.mubr.f32.mxu1 %v9908_v44  ;;  %v5580_v22 = vsel %vm935_vm11, %v7561_v32, %v7562_v20 }
 0x8c6   : > { %v9643_v26 = vpop.permute.xlu0 %7564  ;;  %v9648_v40 = vpop.permute.xlu1 %7589  ;;  %6698 = vmatprep.subr.bf16.mxu1 %v9909_v46 }
 0x8c7   : > { %v7592_v9 = vunpack.i.h.bf16 %v9648_v40  ;;  %v7591_v46 = vunpack.i.l.bf16 %v9648_v40  ;;  %v7567_v4 = vunpack.i.h.bf16 %v9643_v26  ;;  %v7566_v40 = vunpack.i.l.bf16 %v9643_v26 }
 0x8c8   : > { %v7571_v26 = vunpack.i.l.bf16 %v9634_v0 }
 0x8c9   : > { %6700 = vmatpush1.bf16.msra.mxu1 %v9910_v39  ;;  %v6717_v39 = vpack.c.bf16 %v5578_v42, %v5576_v25  ;;  %v5581_v3 = vsel %vm935_vm11, %v7567_v4, %v7591_v46 }
 0x8ca   : > { %v9664_v18 = vpop.permute.xlu0 %7574  ;;  %v7595_v12 = vpop.permute.xlu1 %7594  ;;  %6702 = vmatprep.subr.bf16.mxu1 %v6701_v56  ;;  %v5577_v56 = vsel %vm935_vm11, %v7557_v38, %v7516_v33 }
 0x8cb   : > { %v7597_v10 = vunpack.i.h.bf16 %v7595_v12  ;;  %v7596_v14 = vunpack.i.l.bf16 %v7595_v12  ;;  %v7576_v12 = vunpack.i.l.bf16 %v9664_v18 }
 0x8cc   : > { %6521 = vmatmul.mubr.msk.f32.vlgmr.msra.gmra.mrb[20].mxu1 %vm1193_vm9, %v5032_v7  ;;  %v7577_v7 = vunpack.i.h.bf16 %v9664_v18 }
 0x8cd   : > { %6704 = vmatpush1.bf16.msra.mxu1 %v6703_v51  ;;  %v5314_v1 = vsel %vm670_vm7, %v7596_v14, %v7597_v10  ;;  %5390 = vmatprep.mubr.f32.mxu1 %v9908_v44  ;;  %v5582_v51 = vsel %vm935_vm11, %v7591_v46, %v7592_v9  ;;  %v6719_v10 = vpack.c.bf16 %v5577_v56, %v5575_v41 }
 0x8ce   : > { %v7580_v49 = vpop.permute.xlu0 %7579  ;;  %v9677_v54 = vpop.permute.xlu1 %7599  ;;  %v6705_v15 = vpack.c.bf16 %v5314_v1, %v5312_v53  ;;  %v6721_v13 = vpack.c.bf16 %v5582_v51, %v5580_v22 }
 0x8cf   : > { %v7582_v55 = vunpack.i.h.bf16 %v7580_v49  ;;  %v7581_v5 = vunpack.i.l.bf16 %v7580_v49  ;;  %v5579_v49 = vsel %vm935_vm11, %v7566_v40, %v7561_v32  ;;  %v7602_v18 = vunpack.i.h.bf16 %v9677_v54  ;;  %v6529_v40 = vld [vmem:[%s9821_s8 + $0x14] sm:$0xf]  ;;  %vm9918_vm11 = vmmov %vm9911_vm0 }
 0x8d0   : > { %6706 = vmatprep.subr.bf16.mxu1 %v6705_v15  ;;  %v7601_v53 = vunpack.i.l.bf16 %v9677_v54 }
 0x8d1   : > { %v5313_v48 = vsel %vm670_vm7, %v7582_v55, %v7596_v14  ;;  %v5311_v2 = vsel %vm670_vm7, %v7581_v5, %v7541_v61  ;;  %v7572_v14 = vunpack.i.h.bf16 %v9634_v0  ;;  %v5728_v0 = vsel %vm1075_vm12, %v7576_v12, %v7577_v7  ;;  %vm9916_vm7 = vmmov %vm9911_vm0 }
 0x8d2   : > { %v6707_v52 = vpack.c.bf16 %v5313_v48, %v5311_v2  ;;  %v7585_v30 = vpop.permute.xlu0 %7584  ;;  %v7615_v8 = vpop.permute.xlu1 %7614  ;;  %v6723_v55 = vpack.c.bf16 %v5581_v3, %v5579_v49  ;;  %v5725_v15 = vsel %vm1075_vm12, %v7601_v53, %v7571_v26  ;;  %v5727_v48 = vsel %vm1075_vm12, %v7602_v18, %v7576_v12 }
 0x8d3   : > { %v7587_v36 = vunpack.i.h.bf16 %v7585_v30  ;;  %v7586_v59 = vunpack.i.l.bf16 %v7585_v30  ;;  %v7617_v6 = vunpack.i.h.bf16 %v7615_v8  ;;  %v7616_v11 = vunpack.i.l.bf16 %v7615_v8  ;;  %v6527_v8 = vld [vmem:[%s9821_s8 + $0x10] sm:$0xf] }
 0x8d4   : > { %6708 = vmatpush1.bf16.msra.mxu1 %v6707_v52  ;;  %v5726_v5 = vsel %vm1075_vm12, %v7571_v26, %v7572_v14 }
 0x8d5   : > { %6710 = vmatprep.subr.bf16.mxu1 %v6709_v58  ;;  %v5464_v47 = vsel %vm810_vm10, %v7616_v11, %v7617_v6  ;;  %v5463_v29 = vsel %vm810_vm10, %v7587_v36, %v7616_v11  ;;  %v5461_v21 = vsel %vm810_vm10, %v7586_v59, %v7546_v37  ;;  %v6725_v52 = vpack.c.bf16 %v5728_v0, %v5726_v5 }
 0x8d6   : > { %v9694_v43 = vpop.permute.xlu0 %7604  ;;  %v9700_v50 = vpop.permute.xlu1 %7619  ;;  %v6713_v57 = vpack.c.bf16 %v5464_v47, %v5462_v16  ;;  %v6715_v27 = vpack.c.bf16 %v5463_v29, %v5461_v21  ;;  %v6727_v36 = vpack.c.bf16 %v5727_v48, %v5725_v15  ;;  %vm9917_vm10 = vcmask 777216  }
 0x8d7   : > { %6524 = vmatmul.mubr.msk.f32.vlgmr.msra.gmra.mrb[20].mxu1 %vm1193_vm9, %v6523_v24  ;;  %v7607_v54 = vunpack.i.h.bf16 %v9694_v43  ;;  %v7606_v2 = vunpack.i.l.bf16 %v9694_v43  ;;  %v7622_v33 = vunpack.i.h.bf16 %v9700_v50  ;;  %v7621_v6 = vunpack.i.l.bf16 %v9700_v50  ;;  %vm9920_vm14 = vmmov %vm9917_vm10 }
 0x8d8   : > { %6712 = vmatpush1.bf16.msra.mxu1 %v6711_v34  ;;  %5540 = vmatprep.mubr.f32.mxu1 %v9908_v44  ;;  %vm9921_vm13 = vmmov %vm9917_vm10 }
 0x8d9   : > { %6714 = vmatprep.subr.bf16.mxu1 %v6713_v57  ;;  %v5730_v24 = vsel %vm1075_vm12, %v7606_v2, %v7607_v54  ;;  %v5876_v9 = vsel %vm9912_vm2, %v7621_v6, %v7622_v33  ;;  %vm9922_vm15 = vmmov %vm9917_vm10  ;;  %vm9927_vm2 = vcmask 769024  }
 0x8da   : > { %v7610_v62 = vpop.permute.xlu0 %7609  ;;  %v9714_v61 = vpop.permute.xlu1 %7629  ;;  %vm9923_vm3 = vmmov %vm9917_vm10 }
 0x8db   : > { %v7612_v59 = vunpack.i.h.bf16 %v7610_v62  ;;  %v7611_v31 = vunpack.i.l.bf16 %v7610_v62  ;;  %v7631_v38 = vunpack.i.l.bf16 %v9714_v61  ;;  %v7632_v16 = vunpack.i.h.bf16 %v9714_v61  ;;  %vm9924_vm8 = vmmov %vm9923_vm3 }
 0x8dc   : > { %6716 = vmatpush1.bf16.msra.mxu1 %v6715_v27  ;;  %vm9925_vm1 = vmmov %vm9923_vm3 }
 0x8dd   : > { %6718 = vmatprep.subr.bf16.mxu1 %v6717_v39  ;;  %v5729_v47 = vsel %vm1075_vm12, %v7611_v31, %v7606_v2  ;;  %v5875_v25 = vsel %vm9914_vm5, %v7631_v38, %v7621_v6  ;;  %vm9929_vm5 = vmmov %vm9927_vm2 }
 0x8de   : > { %v7625_v1 = vpop.permute.xlu0 %7624  ;;  %v9729_v45 = vpop.permute.xlu1 %7644 }
 0x8df   : > { %6526 = vmatmul.mubr.msk.f32.vlgmr.msra.gmra.mrb[20].mxu1 %vm1193_vm9, %v6525_v63  ;;  %v7627_v30 = vunpack.i.h.bf16 %v7625_v1  ;;  %v7626_v58 = vunpack.i.l.bf16 %v7625_v1  ;;  %v7647_v27 = vunpack.i.h.bf16 %v9729_v45  ;;  %v7646_v62 = vunpack.i.l.bf16 %v9729_v45 }
 0x8e0   : > { %6720 = vmatpush1.bf16.msra.mxu1 %v6719_v10  ;;  %5658 = vmatprep.mubr.f32.mxu1 %v9908_v44 }
 0x8e1   : > { %6722 = vmatprep.subr.bf16.mxu1 %v6721_v13  ;;  %v5878_v43 = vsel %vm9911_vm0, %v7626_v58, %v7627_v30  ;;  %v5877_v46 = vsel %vm9913_vm4, %v7632_v16, %v7626_v58  ;;  %v5994_v0 = vsel %vm9920_vm14, %v7646_v62, %v7647_v27  ;;  %v6531_v30 = vld [vmem:[%s9821_s8 + $0x18] sm:$0xf]  ;;  %vm9928_vm4 = vmmov %vm9927_vm2 }
 0x8e2   : > { %v9739_v35 = vpop.permute.xlu0 %7634  ;;  %v7655_v37 = vpop.permute.xlu1 %7654  ;;  %v6733_v32 = vpack.c.bf16 %v5878_v43, %v5876_v9  ;;  %v6735_v7 = vpack.c.bf16 %v5877_v46, %v5875_v25 }
 0x8e3   : > { %v7657_v23 = vunpack.i.h.bf16 %v7655_v37  ;;  %v7656_v28 = vunpack.i.l.bf16 %v7655_v37  ;;  %v7637_v21 = vunpack.i.h.bf16 %v9739_v35  ;;  %v7636_v50 = vunpack.i.l.bf16 %v9739_v35 }
 0x8e4   : > { %6724 = vmatpush1.bf16.msra.mxu1 %v6723_v55 }
 0x8e5   : > { %6726 = vmatprep.subr.bf16.mxu1 %v6725_v52  ;;  %v5732_v17 = vsel %vm1075_vm12, %v7656_v28, %v7657_v23  ;;  %v5731_v19 = vsel %vm1075_vm12, %v7612_v59, %v7656_v28  ;;  %v5880_v63 = vsel %vm9915_vm6, %v7636_v50, %v7637_v21  ;;  %vm9919_vm12 = vmmov %vm9911_vm0 }
 0x8e6   : > { %v7640_v11 = vpop.permute.xlu0 %7639  ;;  %v9749_v60 = vpop.permute.xlu1 %7659  ;;  %v6729_v34 = vpack.c.bf16 %v5732_v17, %v5730_v24  ;;  %v6731_v29 = vpack.c.bf16 %v5731_v19, %v5729_v47  ;;  %vm9926_vm0 = vmmov %vm9925_vm1 }
 0x8e7   : > { %6528 = vmatmul.mubr.msk.f32.vlgmr.msra.gmra.mrb[20].mxu1 %vm1193_vm9, %v6527_v8  ;;  %v7642_v61 = vunpack.i.h.bf16 %v7640_v11  ;;  %v7641_v39 = vunpack.i.l.bf16 %v7640_v11  ;;  %v7662_v18 = vunpack.i.h.bf16 %v9749_v60  ;;  %v7661_v45 = vunpack.i.l.bf16 %v9749_v60  ;;  %vm9930_vm6 = vmmov %vm9927_vm2 }
 0x8e8   : > { %6728 = vmatpush1.bf16.msra.mxu1 %v6727_v36  ;;  %5808 = vmatprep.mubr.f32.mxu1 %v9908_v44 }
 0x8e9   : > { %6730 = vmatprep.subr.bf16.mxu1 %v6729_v34  ;;  %v5879_v13 = vsel %vm9919_vm12, %v7641_v39, %v7636_v50  ;;  %v5993_v58 = vsel %vm9924_vm8, %v7661_v45, %v7646_v62  ;;  %vm9934_vm12 = vmmov %vm9927_vm2  ;;  %v6535_v39 = vld [vmem:[%s9821_s8 + $0x20] sm:$0xf] }
 0x8ea   : > { %v7650_v57 = vpop.permute.xlu0 %7649  ;;  %v7670_v42 = vpop.permute.xlu1 %7669 }
 0x8eb   : > { %v7652_v41 = vunpack.i.h.bf16 %v7650_v57  ;;  %v7651_v20 = vunpack.i.l.bf16 %v7650_v57  ;;  %v7672_v56 = vunpack.i.h.bf16 %v7670_v42  ;;  %v7671_v4 = vunpack.i.l.bf16 %v7670_v42  ;;  %v6533_v42 = vld [vmem:[%s9821_s8 + $0x1c] sm:$0xf] }
 0x8ec   : > { %6732 = vmatpush1.bf16.msra.mxu1 %v6731_v29 }
 0x8ed   : > { %6734 = vmatprep.subr.bf16.mxu1 %v6733_v32  ;;  %v5882_v51 = vsel %vm9916_vm7, %v7671_v4, %v7672_v56  ;;  %v5996_v10 = vsel %vm9917_vm10, %v7651_v20, %v7652_v41  ;;  %v5881_v14 = vsel %vm9918_vm11, %v7642_v61, %v7671_v4  ;;  %v5995_v5 = vsel %vm9921_vm13, %v7662_v18, %v7651_v20  ;;  %vm9931_vm7 = vmmov %vm9927_vm2 }
 0x8ee   : > { %v7665_v12 = vpop.permute.xlu0 %7664  ;;  %v7675_v26 = vpop.permute.xlu1 %7674  ;;  %v6737_v49 = vpack.c.bf16 %v5882_v51, %v5880_v63  ;;  %v6739_v55 = vpack.c.bf16 %v5881_v14, %v5879_v13  ;;  %v6741_v48 = vpack.c.bf16 %v5996_v10, %v5994_v0  ;;  %v6743_v8 = vpack.c.bf16 %v5995_v5, %v5993_v58  ;;  %vm9932_vm10 = vmmov %vm9927_vm2 }
 0x8ef   : > { %v7667_v22 = vunpack.i.h.bf16 %v7665_v12  ;;  %v7666_v3 = vunpack.i.l.bf16 %v7665_v12  ;;  %6530 = vmatmul.mubr.msk.f32.vlgmr.msra.gmra.mrb[20].mxu1 %vm1193_vm9, %v6529_v40  ;;  %v7677_v53 = vunpack.i.h.bf16 %v7675_v26  ;;  %v7676_v1 = vunpack.i.l.bf16 %v7675_v26  ;;  %vm9933_vm11 = vmmov %vm9927_vm2 }
 0x8f0   : > { %6736 = vmatpush1.bf16.msra.mxu1 %v6735_v7  ;;  %5958 = vmatprep.mubr.f32.mxu1 %v9908_v44 }
 0x8f1   : > { %6738 = vmatprep.subr.bf16.mxu1 %v6737_v49  ;;  %v5998_v37 = vsel %vm9922_vm15, %v7666_v3, %v7667_v22  ;;  %v6000_v52 = vsel %vm9923_vm3, %v7676_v1, %v7677_v53 }
 0x8f2   : > { %v7680_v15 = vpop.permute.xlu0 %7679  ;;  %v7685_v54 = vpop.permute.xlu1 %7684  ;;  %v6745_v59 = vpack.c.bf16 %v6000_v52, %v5998_v37 }
 0x8f3   : > { %v7682_v2 = vunpack.i.h.bf16 %v7680_v15  ;;  %v7681_v35 = vunpack.i.l.bf16 %v7680_v15  ;;  %v7687_v23 = vunpack.i.h.bf16 %v7685_v54  ;;  %v7686_v28 = vunpack.i.l.bf16 %v7685_v54 }
 0x8f4   : > { %6740 = vmatpush1.bf16.msra.mxu1 %v6739_v55 }
 0x8f5   : > { %6742 = vmatprep.subr.bf16.mxu1 %v6741_v48  ;;  %v5999_v31 = vsel %vm9925_vm1, %v7682_v2, %v7676_v1  ;;  %v5997_v33 = vsel %vm9926_vm0, %v7681_v35, %v7666_v3  ;;  %v6144_v60 = vsel %vm9927_vm2, %v7686_v28, %v7687_v23 }
 0x8f6   : > { %v7690_v36 = vpop.permute.xlu0 %7689  ;;  %v7695_v6 = vpop.permute.xlu1 %7694  ;;  %v6747_v38 = vpack.c.bf16 %v5999_v31, %v5997_v33 }
 0x8f7   : > { %v7692_v11 = vunpack.i.h.bf16 %v7690_v36  ;;  %v7691_v24 = vunpack.i.l.bf16 %v7690_v36  ;;  %6532 = vmatmul.mubr.msk.f32.vlgmr.msra.gmra.mrb[20].mxu1 %vm1193_vm9, %v6531_v30  ;;  %v7697_v17 = vunpack.i.h.bf16 %v7695_v6  ;;  %v7696_v19 = vunpack.i.l.bf16 %v7695_v6 }
 0x8f8   : > { %6744 = vmatpush1.bf16.msra.mxu1 %v6743_v8  ;;  %6076 = vmatprep.mubr.f32.mxu1 %v9908_v44 }
 0x8f9   : > { %6746 = vmatprep.subr.bf16.mxu1 %v6745_v59  ;;  %v6146_v34 = vsel %vm9928_vm4, %v7691_v24, %v7692_v11  ;;  %v6143_v47 = vsel %vm9929_vm5, %v7696_v19, %v7686_v28  ;;  %v6145_v29 = vsel %vm9930_vm6, %v7697_v17, %v7691_v24 }
 0x8fa   : > { %v7700_v43 = vpop.permute.xlu0 %7699  ;;  %v6749_v16 = vpack.c.bf16 %v6146_v34, %v6144_v60  ;;  %v7705_v21 = vpop.permute.xlu1 %7704  ;;  %v6751_v20 = vpack.c.bf16 %v6145_v29, %v6143_v47 }
 0x8fb   : > { %v7702_v50 = vunpack.i.h.bf16 %v7700_v43  ;;  %v7701_v57 = vunpack.i.l.bf16 %v7700_v43  ;;  %v7707_v9 = vunpack.i.h.bf16 %v7705_v21  ;;  %v7706_v46 = vunpack.i.l.bf16 %v7705_v21 }
 0x8fc   : > { %6748 = vmatpush1.bf16.msra.mxu1 %v6747_v38 }
 0x8fd   : > { %6750 = vmatprep.subr.bf16.mxu1 %v6749_v16  ;;  %v6148_v41 = vsel %vm9931_vm7, %v7701_v57, %v7702_v50  ;;  %v6150_v25 = vsel %vm9932_vm10, %v7706_v46, %v7707_v9 }
 0x8fe   : > { %v7710_v32 = vpop.permute.xlu0 %7709  ;;  %v6753_v40 = vpack.c.bf16 %v6150_v25, %v6148_v41 }
 0x8ff   : > { %v7712_v56 = vunpack.i.h.bf16 %v7710_v32  ;;  %v7711_v4 = vunpack.i.l.bf16 %v7710_v32  ;;  %6534 = vmatmul.mubr.msk.f32.vlgmr.msra.gmra.mrb[20].mxu1 %vm1193_vm9, %v6533_v42 }
 0x900   : > { %6752 = vmatpush1.bf16.msra.mxu1 %v6751_v20  ;;  %6226 = vmatprep.mubr.f32.mxu1 %v9908_v44 }
 0x901   : > { %v6149_v27 = vsel %vm9933_vm11, %v7712_v56, %v7706_v46  ;;  %v6147_v62 = vsel %vm9934_vm12, %v7711_v4, %v7701_v57  ;;  %6754 = vmatprep.subr.bf16.mxu1 %v6753_v40 }
 0x902   : > { %v6755_v61 = vpack.c.bf16 %v6149_v27, %v6147_v62 }
 0x904   : > { %6756 = vmatpush1.bf16.msra.mxu1 %v6755_v61 }
 0x907   : > { %6536 = vmatmul.mubr.msk.f32.vlgmr.msra.gmra.mrb[20].mxu1 %vm1193_vm9, %v6535_v39 }
 0x90b   : > { %v6239_v7 = vpop.permute.xlu1 %6238 }
 0x9da   : > { %v6228_v12 = vpop.f32.mrb[20].mxu1 }
 0x9db   : > { %v6241_v63 = vadd.f32 %v6239_v7, %v6228_v12  ;;  %v6230_v51 = vpop.f32.mrb[21].mxu1 }
 0x9dc   : > { %v6242_v10 = vadd.f32 %v6239_v7, %v6230_v51 }
 0x9de   : > { %v6245_v44 = vcombine.low %v6241_v63, %v6242_v10 }
 0x9e0   : > { %6247 = vst [vmem:[%s359_s11] sm:$0xff] %v6245_v44 }
 0x9e1 PF: > { %s20_s13 = sadd.s32 1, %s7720_s13  }
 0x9e2   : > { %p17_p4 = scmp.ge.s32.totalorder %s20_s13, 4  }
 0x9e4   :  { %19 = sbr.rel (!%p17_p4) target bundleno = 1 (0x1), region = 123 }

</bundles_post_ra>
